<compile_context>
chip_gen: v7x
topology: tpu7x:2x2x1
jax: 0.10.0
libtpu: 0.0.40
codegen_flags: <defaults>
</compile_context>

<pallas_src>
import numpy as np
import jax
import jax.numpy as jnp
from jax.experimental import pallas as pl
from jax.experimental.pallas import tpu as pltpu

KSIZE = 3
PADDING = 1
CHANNELS = [16, 24, 32, 48, 64]     # all multiples of 8 (keeps concats aligned)
STRIDES = [1, 2, 2, 2, 2]
N_TAIL_REFS = 10


# ---------------------------------------------------------------------------
# Fused kernel: conv stack + flatten + embedding + GRU + heads (one batch elem)
# ---------------------------------------------------------------------------
def gru_fused_kernel(x_ref, h0_ref, *rest):
    """rest = (S_1, W_1, b_1, ..., S_L, W_L, b_L,
               emb_w, emb_b, gru_wi, gru_bi, gru_wh, gru_bh,
               pi_w, pi_b, val_w, val_b, out_ref)

      S_l : (9, HWin, HWout) bf16  0/1 shift matrices (padding + stride baked in),
                                   transposed so the spatial dim lands on lanes.
      W_l : (Cout, 9*Cin)    f32   conv weights, tap-major concatenated K axis.
      b_l : (Cout, 1)        f32
      out : (1, 1, LANES)    f32   [val | pi | h | zero pad] packed row.
    """
    out_ref = rest[-1]
    refs = rest[:-1]
    n_conv = (len(refs) - N_TAIL_REFS) // 3
    conv_refs = refs[:3 * n_conv]
    (emb_w_ref, emb_b_ref, wi_ref, bi_ref, wh_ref, bh_ref,
     pi_w_ref, pi_b_ref, val_w_ref, val_b_ref) = refs[3 * n_conv:]

    # ---- conv stack (channels-first: feat is (C, H*W), spatial on lanes) ----
    feat = x_ref[0]                                          # (Cin_pad, HW) f32
    for l in range(n_conv):
        s_ref = conv_refs[3 * l + 0]                         # (9, HWin, HWout) bf16
        w_ref = conv_refs[3 * l + 1]                         # (Cout, 9*Cin)    f32
        b_ref = conv_refs[3 * l + 2]                         # (Cout, 1)        f32
        n_taps = s_ref.shape[0]
        # MXU operands only are narrowed to bf16; S is exactly 0/1 so each gather
        # output equals one (bf16-rounded) activation -- exact selection.
        feat_bf = feat.astype(jnp.bfloat16)
        gathered = [
            jnp.dot(feat_bf, s_ref[k], preferred_element_type=jnp.float32)
            for k in range(n_taps)                           # each (Cin, HWout)
        ]
        patches = jnp.concatenate(gathered, axis=0)          # (9*Cin, HWout)
        out = jnp.dot(w_ref[...], patches,
                      preferred_element_type=jnp.float32)    # (Cout, HWout)
        out = out + b_ref[...]                               # lane-broadcast bias
        # conv_block(activation='lerelu') hits the `'relu' in activation` branch
        # first -> plain nn.ReLU(); bnorm defaults to False -> no batchnorm.
        feat = jnp.maximum(out, 0.0)

    # ---- channel-major flatten (== feats.view(B, -1) on NCHW) ----
    cf, hwf = feat.shape
    if hwf == 1:
        flat = jnp.transpose(feat)                           # (1, Cf)
    else:
        # TODO(synk): general HWf>1 channel-major flatten relies on Mosaic reshape.
        flat = feat.reshape(1, cf * hwf)

    # ---- embedding Linear + ReLU ----
    embs = jnp.dot(flat, emb_w_ref[...], preferred_element_type=jnp.float32)
    embs = jnp.maximum(embs + emb_b_ref[...], 0.0)           # (1, H)

    # ---- GRU cell (packed gates, column order [r | z | n]) ----
    # TODO(synk): the custom `GRU` class is not in the reference source; standard
    # torch.nn.GRUCell gate math (r/z/n, h' = (1-z)*n + z*h) is assumed.
    hs = h0_ref.shape[-1]
    h0 = h0_ref[0]                                           # (1, H)
    gi = jnp.dot(embs, wi_ref[...], preferred_element_type=jnp.float32) + bi_ref[...]
    gh = jnp.dot(h0, wh_ref[...], preferred_element_type=jnp.float32) + bh_ref[...]
    r = jax.nn.sigmoid(gi[:, 0:hs] + gh[:, 0:hs])
    z = jax.nn.sigmoid(gi[:, hs:2 * hs] + gh[:, hs:2 * hs])
    n = jnp.tanh(gi[:, 2 * hs:3 * hs] + r * gh[:, 2 * hs:3 * hs])
    h_new = (1.0 - z) * n + z * h0                           # (1, H)

    # ---- policy / value heads ----
    pi = jnp.dot(h_new, pi_w_ref[...], preferred_element_type=jnp.float32) + pi_b_ref[...]
    val = jnp.dot(h_new, val_w_ref[...], preferred_element_type=jnp.float32) + val_b_ref[...]

    # ---- pack [val | pi | h | pad] into one lane-dense row, single store ----
    n_out = pi.shape[1]
    used = 1 + n_out + hs
    pad = out_ref.shape[-1] - used
    pieces = [val, pi, h_new]
    if pad > 0:
        pieces.append(jnp.zeros((1, pad), jnp.float32))
    out_ref[0] = jnp.concatenate(pieces, axis=1)


# ---------------------------------------------------------------------------
# Init: weights + constant transposed shift ("gather") matrices (all static)
# ---------------------------------------------------------------------------
def _make_shift_mats_T(H, W, ksize, stride, padding):
    """S_T[k, ih*W+iw, oh*Wo+ow] = 1 iff input pixel feeds output pixel at tap k."""
    Ho = (H - ksize + 2 * padding) // stride + 1
    Wo = (W - ksize + 2 * padding) // stride + 1
    S = np.zeros((ksize * ksize, H * W, Ho * Wo), dtype=np.float32)
    for di in range(ksize):
        for dj in range(ksize):
            k = di * ksize + dj
            for oh in range(Ho):
                ih = oh * stride + di - padding
                if ih < 0 or ih >= H:
                    continue
                for ow in range(Wo):
                    iw = ow * stride + dj - padding
                    if 0 <= iw < W:
                        S[k, ih * W + iw, oh * Wo + ow] = 1.0
    return S, Ho, Wo


def _uniform(key, shape, bound):
    return jax.random.uniform(key, shape, minval=-bound, maxval=bound,
                              dtype=jnp.float32)


def _round8(n):
    return -(-n // 8) * 8


def init_gru_model(key, input_space, output_space, h_size):
    C_in, H, W = input_space
    chans = [C_in] + CHANNELS
    params = {"convs": []}
    h_sp, w_sp = H, W
    for li in range(len(CHANNELS)):
        key, kw, kb = jax.random.split(key, 3)
        cin, cout = chans[li], chans[li + 1]
        cin_pad = _round8(cin)
        bound = 1.0 / float(np.sqrt(KSIZE * KSIZE * cin))
        # Tap-major packed conv weight: w[co, k*cin_pad + c] == torch_w[co, c, di, dj]
        # with k = di*3 + dj; padded input channels get zero columns.
        # (Pretrained torch weights (Cout,Cin,3,3) -> permute(0,2,3,1).reshape.)
        w_core = _uniform(kw, (cout, KSIZE * KSIZE, cin), bound)
        w = jnp.zeros((cout, KSIZE * KSIZE, cin_pad), jnp.float32)
        w = w.at[:, :, :cin].set(w_core).reshape(cout, KSIZE * KSIZE * cin_pad)
        b = _uniform(kb, (cout, 1), bound)
        S, h_sp, w_sp = _make_shift_mats_T(h_sp, w_sp, KSIZE, STRIDES[li], PADDING)
        params["convs"].append({"s": jnp.asarray(S, dtype=jnp.bfloat16),  # exact 0/1
                                "w": w, "b": b})

    flat_size = chans[-1] * h_sp * w_sp

    (key, k_ew, k_eb, k_wi, k_bi, k_wh, k_bh,
     k_pw, k_pb, k_vw, k_vb) = jax.random.split(key, 11)
    eb = 1.0 / float(np.sqrt(flat_size))
    params["emb_w"] = _uniform(k_ew, (flat_size, h_size), eb)
    params["emb_b"] = _uniform(k_eb, (1, h_size), eb)
    gb = 1.0 / float(np.sqrt(h_size))
    # Packed GRU gates, column order [r | z | n]; torch GRUCell weight_ih/weight_hh
    # are (3h, h) row-stacked [r|z|n] -> use weight.T when loading pretrained.
    params["gru_wi"] = _uniform(k_wi, (h_size, 3 * h_size), gb)
    params["gru_bi"] = _uniform(k_bi, (1, 3 * h_size), gb)
    params["gru_wh"] = _uniform(k_wh, (h_size, 3 * h_size), gb)
    params["gru_bh"] = _uniform(k_bh, (1, 3 * h_size), gb)
    params["pi_w"] = _uniform(k_pw, (h_size, output_space), gb)
    params["pi_b"] = _uniform(k_pb, (1, output_space), gb)
    params["val_w"] = _uniform(k_vw, (h_size, 1), gb)
    params["val_b"] = _uniform(k_vb, (1, 1), gb)

    config = {"final_h": h_sp, "final_w": w_sp, "final_c": chans[-1],
              "flat_size": flat_size}
    return params, config


# ---------------------------------------------------------------------------
# Forward: one fused pallas_call over a batch grid
# ---------------------------------------------------------------------------
def gru_model_forward(params, x, old_h):
    """x: (B, C, H, W) NCHW f32; old_h: (B, h_size). Returns (val, pi, h)."""
    B, C, H, W = x.shape
    hs = old_h.shape[1]
    n_out = params["pi_w"].shape[1]
    used = 1 + n_out + hs
    out_lanes = ((used + 127) // 128) * 128

    # Channels-first, spatial on the lane axis; pad channels to a multiple of 8.
    x3 = x.reshape(B, C, H * W)
    c_pad = _round8(C)
    if c_pad != C:
        x3 = jnp.pad(x3, ((0, 0), (0, c_pad - C), (0, 0)))
    h3 = old_h.reshape(B, 1, hs)

    args = [x3, h3]
    in_specs = [pl.BlockSpec((1, c_pad, H * W), lambda b: (b, 0, 0)),
                pl.BlockSpec((1, 1, hs), lambda b: (b, 0, 0))]
    for layer in params["convs"]:
        args += [layer["s"], layer["w"], layer["b"]]
        in_specs += [pl.BlockSpec(layer["s"].shape, lambda b: (0, 0, 0)),
                     pl.BlockSpec(layer["w"].shape, lambda b: (0, 0)),
                     pl.BlockSpec(layer["b"].shape, lambda b: (0, 0))]
    for name in ("emb_w", "emb_b", "gru_wi", "gru_bi", "gru_wh", "gru_bh",
                 "pi_w", "pi_b", "val_w", "val_b"):
        args.append(params[name])
        in_specs.append(pl.BlockSpec(params[name].shape, lambda b: (0, 0)))

    out = pl.pallas_call(
        gru_fused_kernel,
        out_shape=jax.ShapeDtypeStruct((B, 1, out_lanes), jnp.float32),
        grid=(B,),
        in_specs=in_specs,
        out_specs=pl.BlockSpec((1, 1, out_lanes), lambda b: (b, 0, 0)),
        compiler_params=pltpu.CompilerParams(
            dimension_semantics=("parallel",)),   # v7x: batch split over 2 TCs
    )(*args)

    out = out[:, 0, :]
    val = out[:, 0:1]
    pi = out[:, 1:1 + n_out]
    h = out[:, 1 + n_out:1 + n_out + hs]
    return val, pi, h


# ---------------------------------------------------------------------------
if __name__ == "__main__":
    key = jax.random.PRNGKey(0)

    input_space = [4, 16, 16]   # (C, H, W)
    output_space = 6
    h_size = 32
    batch = 2

    key, k_params, k_x, k_h = jax.random.split(key, 4)
    params, config = init_gru_model(k_params, input_space, output_space, h_size)

    x = jax.random.normal(k_x, (batch, *input_space), dtype=jnp.float32)
    old_h = jax.random.normal(k_h, (batch, h_size), dtype=jnp.float32)

    fwd = jax.jit(gru_model_forward)
    val, pi, h = fwd(params, x, old_h)
    jax.block_until_ready((val, pi, h))

    assert val.shape == (batch, 1)
    assert pi.shape == (batch, output_space)
    assert h.shape == (batch, h_size)
    assert bool(jnp.all(jnp.isfinite(val)))
    assert bool(jnp.all(jnp.isfinite(pi)))
    assert bool(jnp.all(jnp.isfinite(h)))
    print("KERNEL_OK")
</pallas_src>

<mosaic_0001>
module attributes {stable_mosaic.version = 11 : i64} {
  func.func @gru_fused_kernel(%arg0: i32, %arg1: memref<1x8x256xf32, #tpu.memory_space<vmem>>, %arg2: memref<1x1x32xf32, #tpu.memory_space<vmem>>, %arg3: memref<9x256x256xbf16, #tpu.memory_space<vmem>>, %arg4: memref<16x72xf32, #tpu.memory_space<vmem>>, %arg5: memref<16x1xf32, #tpu.memory_space<vmem>>, %arg6: memref<9x256x64xbf16, #tpu.memory_space<vmem>>, %arg7: memref<24x144xf32, #tpu.memory_space<vmem>>, %arg8: memref<24x1xf32, #tpu.memory_space<vmem>>, %arg9: memref<9x64x16xbf16, #tpu.memory_space<vmem>>, %arg10: memref<32x216xf32, #tpu.memory_space<vmem>>, %arg11: memref<32x1xf32, #tpu.memory_space<vmem>>, %arg12: memref<9x16x4xbf16, #tpu.memory_space<vmem>>, %arg13: memref<48x288xf32, #tpu.memory_space<vmem>>, %arg14: memref<48x1xf32, #tpu.memory_space<vmem>>, %arg15: memref<9x4x1xbf16, #tpu.memory_space<vmem>>, %arg16: memref<64x432xf32, #tpu.memory_space<vmem>>, %arg17: memref<64x1xf32, #tpu.memory_space<vmem>>, %arg18: memref<64x32xf32, #tpu.memory_space<vmem>>, %arg19: memref<1x32xf32, #tpu.memory_space<vmem>>, %arg20: memref<32x96xf32, #tpu.memory_space<vmem>>, %arg21: memref<1x96xf32, #tpu.memory_space<vmem>>, %arg22: memref<32x96xf32, #tpu.memory_space<vmem>>, %arg23: memref<1x96xf32, #tpu.memory_space<vmem>>, %arg24: memref<32x6xf32, #tpu.memory_space<vmem>>, %arg25: memref<1x6xf32, #tpu.memory_space<vmem>>, %arg26: memref<32x1xf32, #tpu.memory_space<vmem>>, %arg27: memref<1x1xf32, #tpu.memory_space<vmem>>, %arg28: memref<1x1x128xf32, #tpu.memory_space<vmem>>) attributes {dimension_semantics = [#tpu.dimension_semantics<parallel>], iteration_bounds = array<i64: 2>, scalar_prefetch = 0 : i64, scratch_operands = 0 : i64, tpu.core_type = #tpu.core_type<tc>, window_params = [{transform_indices = @transform_0, window_bounds = array<i64: 1, 8, 256>}, {transform_indices = @transform_1, window_bounds = array<i64: 1, 1, 32>}, {pipeline_mode = #tpu.pipeline_mode<synchronous>, transform_indices = @transform_2, window_bounds = array<i64: 9, 256, 256>}, {pipeline_mode = #tpu.pipeline_mode<synchronous>, transform_indices = @transform_3, window_bounds = array<i64: 16, 72>}, {pipeline_mode = #tpu.pipeline_mode<synchronous>, transform_indices = @transform_4, window_bounds = array<i64: 16, 1>}, {pipeline_mode = #tpu.pipeline_mode<synchronous>, transform_indices = @transform_5, window_bounds = array<i64: 9, 256, 64>}, {pipeline_mode = #tpu.pipeline_mode<synchronous>, transform_indices = @transform_6, window_bounds = array<i64: 24, 144>}, {pipeline_mode = #tpu.pipeline_mode<synchronous>, transform_indices = @transform_7, window_bounds = array<i64: 24, 1>}, {pipeline_mode = #tpu.pipeline_mode<synchronous>, transform_indices = @transform_8, window_bounds = array<i64: 9, 64, 16>}, {pipeline_mode = #tpu.pipeline_mode<synchronous>, transform_indices = @transform_9, window_bounds = array<i64: 32, 216>}, {pipeline_mode = #tpu.pipeline_mode<synchronous>, transform_indices = @transform_10, window_bounds = array<i64: 32, 1>}, {pipeline_mode = #tpu.pipeline_mode<synchronous>, transform_indices = @transform_11, window_bounds = array<i64: 9, 16, 4>}, {pipeline_mode = #tpu.pipeline_mode<synchronous>, transform_indices = @transform_12, window_bounds = array<i64: 48, 288>}, {pipeline_mode = #tpu.pipeline_mode<synchronous>, transform_indices = @transform_13, window_bounds = array<i64: 48, 1>}, {pipeline_mode = #tpu.pipeline_mode<synchronous>, transform_indices = @transform_14, window_bounds = array<i64: 9, 4, 1>}, {pipeline_mode = #tpu.pipeline_mode<synchronous>, transform_indices = @transform_15, window_bounds = array<i64: 64, 432>}, {pipeline_mode = #tpu.pipeline_mode<synchronous>, transform_indices = @transform_16, window_bounds = array<i64: 64, 1>}, {pipeline_mode = #tpu.pipeline_mode<synchronous>, transform_indices = @transform_17, window_bounds = array<i64: 64, 32>}, {pipeline_mode = #tpu.pipeline_mode<synchronous>, transform_indices = @transform_18, window_bounds = array<i64: 1, 32>}, {pipeline_mode = #tpu.pipeline_mode<synchronous>, transform_indices = @transform_19, window_bounds = array<i64: 32, 96>}, {pipeline_mode = #tpu.pipeline_mode<synchronous>, transform_indices = @transform_20, window_bounds = array<i64: 1, 96>}, {pipeline_mode = #tpu.pipeline_mode<synchronous>, transform_indices = @transform_21, window_bounds = array<i64: 32, 96>}, {pipeline_mode = #tpu.pipeline_mode<synchronous>, transform_indices = @transform_22, window_bounds = array<i64: 1, 96>}, {pipeline_mode = #tpu.pipeline_mode<synchronous>, transform_indices = @transform_23, window_bounds = array<i64: 32, 6>}, {pipeline_mode = #tpu.pipeline_mode<synchronous>, transform_indices = @transform_24, window_bounds = array<i64: 1, 6>}, {pipeline_mode = #tpu.pipeline_mode<synchronous>, transform_indices = @transform_25, window_bounds = array<i64: 32, 1>}, {pipeline_mode = #tpu.pipeline_mode<synchronous>, transform_indices = @transform_26, window_bounds = array<i64: 1, 1>}, {transform_indices = @transform_27, window_bounds = array<i64: 1, 1, 128>}]} {
    %c0 = arith.constant 0 : index
    %c0_0 = arith.constant 0 : index
    %c0_1 = arith.constant 0 : index
    %0 = vector.load %arg1[%c0, %c0_0, %c0_1] : memref<1x8x256xf32, #tpu.memory_space<vmem>>, vector<1x8x256xf32>
    %1 = vector.shape_cast %0 : vector<1x8x256xf32> to vector<8x256xf32>
    %2 = arith.truncf %1 : vector<8x256xf32> to vector<8x256xbf16>
    %c0_2 = arith.constant 0 : index
    %c0_3 = arith.constant 0 : index
    %c0_4 = arith.constant 0 : index
    %3 = vector.load %arg3[%c0_2, %c0_3, %c0_4] : memref<9x256x256xbf16, #tpu.memory_space<vmem>>, vector<1x256x256xbf16>
    %4 = vector.shape_cast %3 : vector<1x256x256xbf16> to vector<256x256xbf16>
    %cst = arith.constant dense<0.000000e+00> : vector<8x256xf32>
    %5 = tpu.matmul %2, %4, %cst {dimension_numbers = #tpu.dot_dimension_numbers<[1], [0], [0], [1], [0, 0, 1, 1], [], []>} : vector<8x256xbf16>, vector<256x256xbf16>, vector<8x256xf32> -> vector<8x256xf32>
    %c1 = arith.constant 1 : index
    %c0_5 = arith.constant 0 : index
    %c0_6 = arith.constant 0 : index
    %6 = vector.load %arg3[%c1, %c0_5, %c0_6] : memref<9x256x256xbf16, #tpu.memory_space<vmem>>, vector<1x256x256xbf16>
    %7 = vector.shape_cast %6 : vector<1x256x256xbf16> to vector<256x256xbf16>
    %cst_7 = arith.constant dense<0.000000e+00> : vector<8x256xf32>
    %8 = tpu.matmul %2, %7, %cst_7 {dimension_numbers = #tpu.dot_dimension_numbers<[1], [0], [0], [1], [0, 0, 1, 1], [], []>} : vector<8x256xbf16>, vector<256x256xbf16>, vector<8x256xf32> -> vector<8x256xf32>
    %c2 = arith.constant 2 : index
    %c0_8 = arith.constant 0 : index
    %c0_9 = arith.constant 0 : index
    %9 = vector.load %arg3[%c2, %c0_8, %c0_9] : memref<9x256x256xbf16, #tpu.memory_space<vmem>>, vector<1x256x256xbf16>
    %10 = vector.shape_cast %9 : vector<1x256x256xbf16> to vector<256x256xbf16>
    %cst_10 = arith.constant dense<0.000000e+00> : vector<8x256xf32>
    %11 = tpu.matmul %2, %10, %cst_10 {dimension_numbers = #tpu.dot_dimension_numbers<[1], [0], [0], [1], [0, 0, 1, 1], [], []>} : vector<8x256xbf16>, vector<256x256xbf16>, vector<8x256xf32> -> vector<8x256xf32>
    %c3 = arith.constant 3 : index
    %c0_11 = arith.constant 0 : index
    %c0_12 = arith.constant 0 : index
    %12 = vector.load %arg3[%c3, %c0_11, %c0_12] : memref<9x256x256xbf16, #tpu.memory_space<vmem>>, vector<1x256x256xbf16>
    %13 = vector.shape_cast %12 : vector<1x256x256xbf16> to vector<256x256xbf16>
    %cst_13 = arith.constant dense<0.000000e+00> : vector<8x256xf32>
    %14 = tpu.matmul %2, %13, %cst_13 {dimension_numbers = #tpu.dot_dimension_numbers<[1], [0], [0], [1], [0, 0, 1, 1], [], []>} : vector<8x256xbf16>, vector<256x256xbf16>, vector<8x256xf32> -> vector<8x256xf32>
    %c4 = arith.constant 4 : index
    %c0_14 = arith.constant 0 : index
    %c0_15 = arith.constant 0 : index
    %15 = vector.load %arg3[%c4, %c0_14, %c0_15] : memref<9x256x256xbf16, #tpu.memory_space<vmem>>, vector<1x256x256xbf16>
    %16 = vector.shape_cast %15 : vector<1x256x256xbf16> to vector<256x256xbf16>
    %cst_16 = arith.constant dense<0.000000e+00> : vector<8x256xf32>
    %17 = tpu.matmul %2, %16, %cst_16 {dimension_numbers = #tpu.dot_dimension_numbers<[1], [0], [0], [1], [0, 0, 1, 1], [], []>} : vector<8x256xbf16>, vector<256x256xbf16>, vector<8x256xf32> -> vector<8x256xf32>
    %c5 = arith.constant 5 : index
    %c0_17 = arith.constant 0 : index
    %c0_18 = arith.constant 0 : index
    %18 = vector.load %arg3[%c5, %c0_17, %c0_18] : memref<9x256x256xbf16, #tpu.memory_space<vmem>>, vector<1x256x256xbf16>
    %19 = vector.shape_cast %18 : vector<1x256x256xbf16> to vector<256x256xbf16>
    %cst_19 = arith.constant dense<0.000000e+00> : vector<8x256xf32>
    %20 = tpu.matmul %2, %19, %cst_19 {dimension_numbers = #tpu.dot_dimension_numbers<[1], [0], [0], [1], [0, 0, 1, 1], [], []>} : vector<8x256xbf16>, vector<256x256xbf16>, vector<8x256xf32> -> vector<8x256xf32>
    %c6 = arith.constant 6 : index
    %c0_20 = arith.constant 0 : index
    %c0_21 = arith.constant 0 : index
    %21 = vector.load %arg3[%c6, %c0_20, %c0_21] : memref<9x256x256xbf16, #tpu.memory_space<vmem>>, vector<1x256x256xbf16>
    %22 = vector.shape_cast %21 : vector<1x256x256xbf16> to vector<256x256xbf16>
    %cst_22 = arith.constant dense<0.000000e+00> : vector<8x256xf32>
    %23 = tpu.matmul %2, %22, %cst_22 {dimension_numbers = #tpu.dot_dimension_numbers<[1], [0], [0], [1], [0, 0, 1, 1], [], []>} : vector<8x256xbf16>, vector<256x256xbf16>, vector<8x256xf32> -> vector<8x256xf32>
    %c7 = arith.constant 7 : index
    %c0_23 = arith.constant 0 : index
    %c0_24 = arith.constant 0 : index
    %24 = vector.load %arg3[%c7, %c0_23, %c0_24] : memref<9x256x256xbf16, #tpu.memory_space<vmem>>, vector<1x256x256xbf16>
    %25 = vector.shape_cast %24 : vector<1x256x256xbf16> to vector<256x256xbf16>
    %cst_25 = arith.constant dense<0.000000e+00> : vector<8x256xf32>
    %26 = tpu.matmul %2, %25, %cst_25 {dimension_numbers = #tpu.dot_dimension_numbers<[1], [0], [0], [1], [0, 0, 1, 1], [], []>} : vector<8x256xbf16>, vector<256x256xbf16>, vector<8x256xf32> -> vector<8x256xf32>
    %c8 = arith.constant 8 : index
    %c0_26 = arith.constant 0 : index
    %c0_27 = arith.constant 0 : index
    %27 = vector.load %arg3[%c8, %c0_26, %c0_27] : memref<9x256x256xbf16, #tpu.memory_space<vmem>>, vector<1x256x256xbf16>
    %28 = vector.shape_cast %27 : vector<1x256x256xbf16> to vector<256x256xbf16>
    %cst_28 = arith.constant dense<0.000000e+00> : vector<8x256xf32>
    %29 = tpu.matmul %2, %28, %cst_28 {dimension_numbers = #tpu.dot_dimension_numbers<[1], [0], [0], [1], [0, 0, 1, 1], [], []>} : vector<8x256xbf16>, vector<256x256xbf16>, vector<8x256xf32> -> vector<8x256xf32>
    %30 = tpu.concatenate %5, %8, %11, %14, %17, %20, %23, %26, %29 in 0 : vector<8x256xf32>, vector<8x256xf32>, vector<8x256xf32>, vector<8x256xf32>, vector<8x256xf32>, vector<8x256xf32>, vector<8x256xf32>, vector<8x256xf32>, vector<8x256xf32> -> vector<72x256xf32>
    %c0_29 = arith.constant 0 : index
    %c0_30 = arith.constant 0 : index
    %31 = vector.load %arg4[%c0_29, %c0_30] : memref<16x72xf32, #tpu.memory_space<vmem>>, vector<16x72xf32>
    %cst_31 = arith.constant dense<0.000000e+00> : vector<16x256xf32>
    %32 = tpu.matmul %31, %30, %cst_31 {dimension_numbers = #tpu.dot_dimension_numbers<[1], [0], [0], [1], [0, 0, 1, 1], [], []>} : vector<16x72xf32>, vector<72x256xf32>, vector<16x256xf32> -> vector<16x256xf32>
    %c0_32 = arith.constant 0 : index
    %c0_33 = arith.constant 0 : index
    %33 = vector.load %arg5[%c0_32, %c0_33] : memref<16x1xf32, #tpu.memory_space<vmem>>, vector<16x1xf32>
    %34 = vector.broadcast %33 : vector<16x1xf32> to vector<16x256xf32>
    %35 = arith.addf %32, %34 : vector<16x256xf32>
    %cst_34 = arith.constant 0.000000e+00 : f32
    %36 = vector.broadcast %cst_34 : f32 to vector<16x256xf32>
    %37 = arith.maximumf %35, %36 : vector<16x256xf32>
    %38 = arith.truncf %37 : vector<16x256xf32> to vector<16x256xbf16>
    %c0_35 = arith.constant 0 : index
    %c0_36 = arith.constant 0 : index
    %c0_37 = arith.constant 0 : index
    %39 = vector.load %arg6[%c0_35, %c0_36, %c0_37] : memref<9x256x64xbf16, #tpu.memory_space<vmem>>, vector<1x256x64xbf16>
    %40 = vector.shape_cast %39 : vector<1x256x64xbf16> to vector<256x64xbf16>
    %cst_38 = arith.constant dense<0.000000e+00> : vector<16x64xf32>
    %41 = tpu.matmul %38, %40, %cst_38 {dimension_numbers = #tpu.dot_dimension_numbers<[1], [0], [0], [1], [0, 0, 1, 1], [], []>} : vector<16x256xbf16>, vector<256x64xbf16>, vector<16x64xf32> -> vector<16x64xf32>
    %c1_39 = arith.constant 1 : index
    %c0_40 = arith.constant 0 : index
    %c0_41 = arith.constant 0 : index
    %42 = vector.load %arg6[%c1_39, %c0_40, %c0_41] : memref<9x256x64xbf16, #tpu.memory_space<vmem>>, vector<1x256x64xbf16>
    %43 = vector.shape_cast %42 : vector<1x256x64xbf16> to vector<256x64xbf16>
    %cst_42 = arith.constant dense<0.000000e+00> : vector<16x64xf32>
    %44 = tpu.matmul %38, %43, %cst_42 {dimension_numbers = #tpu.dot_dimension_numbers<[1], [0], [0], [1], [0, 0, 1, 1], [], []>} : vector<16x256xbf16>, vector<256x64xbf16>, vector<16x64xf32> -> vector<16x64xf32>
    %c2_43 = arith.constant 2 : index
    %c0_44 = arith.constant 0 : index
    %c0_45 = arith.constant 0 : index
    %45 = vector.load %arg6[%c2_43, %c0_44, %c0_45] : memref<9x256x64xbf16, #tpu.memory_space<vmem>>, vector<1x256x64xbf16>
    %46 = vector.shape_cast %45 : vector<1x256x64xbf16> to vector<256x64xbf16>
    %cst_46 = arith.constant dense<0.000000e+00> : vector<16x64xf32>
    %47 = tpu.matmul %38, %46, %cst_46 {dimension_numbers = #tpu.dot_dimension_numbers<[1], [0], [0], [1], [0, 0, 1, 1], [], []>} : vector<16x256xbf16>, vector<256x64xbf16>, vector<16x64xf32> -> vector<16x64xf32>
    %c3_47 = arith.constant 3 : index
    %c0_48 = arith.constant 0 : index
    %c0_49 = arith.constant 0 : index
    %48 = vector.load %arg6[%c3_47, %c0_48, %c0_49] : memref<9x256x64xbf16, #tpu.memory_space<vmem>>, vector<1x256x64xbf16>
    %49 = vector.shape_cast %48 : vector<1x256x64xbf16> to vector<256x64xbf16>
    %cst_50 = arith.constant dense<0.000000e+00> : vector<16x64xf32>
    %50 = tpu.matmul %38, %49, %cst_50 {dimension_numbers = #tpu.dot_dimension_numbers<[1], [0], [0], [1], [0, 0, 1, 1], [], []>} : vector<16x256xbf16>, vector<256x64xbf16>, vector<16x64xf32> -> vector<16x64xf32>
    %c4_51 = arith.constant 4 : index
    %c0_52 = arith.constant 0 : index
    %c0_53 = arith.constant 0 : index
    %51 = vector.load %arg6[%c4_51, %c0_52, %c0_53] : memref<9x256x64xbf16, #tpu.memory_space<vmem>>, vector<1x256x64xbf16>
    %52 = vector.shape_cast %51 : vector<1x256x64xbf16> to vector<256x64xbf16>
    %cst_54 = arith.constant dense<0.000000e+00> : vector<16x64xf32>
    %53 = tpu.matmul %38, %52, %cst_54 {dimension_numbers = #tpu.dot_dimension_numbers<[1], [0], [0], [1], [0, 0, 1, 1], [], []>} : vector<16x256xbf16>, vector<256x64xbf16>, vector<16x64xf32> -> vector<16x64xf32>
    %c5_55 = arith.constant 5 : index
    %c0_56 = arith.constant 0 : index
    %c0_57 = arith.constant 0 : index
    %54 = vector.load %arg6[%c5_55, %c0_56, %c0_57] : memref<9x256x64xbf16, #tpu.memory_space<vmem>>, vector<1x256x64xbf16>
    %55 = vector.shape_cast %54 : vector<1x256x64xbf16> to vector<256x64xbf16>
    %cst_58 = arith.constant dense<0.000000e+00> : vector<16x64xf32>
    %56 = tpu.matmul %38, %55, %cst_58 {dimension_numbers = #tpu.dot_dimension_numbers<[1], [0], [0], [1], [0, 0, 1, 1], [], []>} : vector<16x256xbf16>, vector<256x64xbf16>, vector<16x64xf32> -> vector<16x64xf32>
    %c6_59 = arith.constant 6 : index
    %c0_60 = arith.constant 0 : index
    %c0_61 = arith.constant 0 : index
    %57 = vector.load %arg6[%c6_59, %c0_60, %c0_61] : memref<9x256x64xbf16, #tpu.memory_space<vmem>>, vector<1x256x64xbf16>
    %58 = vector.shape_cast %57 : vector<1x256x64xbf16> to vector<256x64xbf16>
    %cst_62 = arith.constant dense<0.000000e+00> : vector<16x64xf32>
    %59 = tpu.matmul %38, %58, %cst_62 {dimension_numbers = #tpu.dot_dimension_numbers<[1], [0], [0], [1], [0, 0, 1, 1], [], []>} : vector<16x256xbf16>, vector<256x64xbf16>, vector<16x64xf32> -> vector<16x64xf32>
    %c7_63 = arith.constant 7 : index
    %c0_64 = arith.constant 0 : index
    %c0_65 = arith.constant 0 : index
    %60 = vector.load %arg6[%c7_63, %c0_64, %c0_65] : memref<9x256x64xbf16, #tpu.memory_space<vmem>>, vector<1x256x64xbf16>
    %61 = vector.shape_cast %60 : vector<1x256x64xbf16> to vector<256x64xbf16>
    %cst_66 = arith.constant dense<0.000000e+00> : vector<16x64xf32>
    %62 = tpu.matmul %38, %61, %cst_66 {dimension_numbers = #tpu.dot_dimension_numbers<[1], [0], [0], [1], [0, 0, 1, 1], [], []>} : vector<16x256xbf16>, vector<256x64xbf16>, vector<16x64xf32> -> vector<16x64xf32>
    %c8_67 = arith.constant 8 : index
    %c0_68 = arith.constant 0 : index
    %c0_69 = arith.constant 0 : index
    %63 = vector.load %arg6[%c8_67, %c0_68, %c0_69] : memref<9x256x64xbf16, #tpu.memory_space<vmem>>, vector<1x256x64xbf16>
    %64 = vector.shape_cast %63 : vector<1x256x64xbf16> to vector<256x64xbf16>
    %cst_70 = arith.constant dense<0.000000e+00> : vector<16x64xf32>
    %65 = tpu.matmul %38, %64, %cst_70 {dimension_numbers = #tpu.dot_dimension_numbers<[1], [0], [0], [1], [0, 0, 1, 1], [], []>} : vector<16x256xbf16>, vector<256x64xbf16>, vector<16x64xf32> -> vector<16x64xf32>
    %66 = tpu.concatenate %41, %44, %47, %50, %53, %56, %59, %62, %65 in 0 : vector<16x64xf32>, vector<16x64xf32>, vector<16x64xf32>, vector<16x64xf32>, vector<16x64xf32>, vector<16x64xf32>, vector<16x64xf32>, vector<16x64xf32>, vector<16x64xf32> -> vector<144x64xf32>
    %c0_71 = arith.constant 0 : index
    %c0_72 = arith.constant 0 : index
    %67 = vector.load %arg7[%c0_71, %c0_72] : memref<24x144xf32, #tpu.memory_space<vmem>>, vector<24x144xf32>
    %cst_73 = arith.constant dense<0.000000e+00> : vector<24x64xf32>
    %68 = tpu.matmul %67, %66, %cst_73 {dimension_numbers = #tpu.dot_dimension_numbers<[1], [0], [0], [1], [0, 0, 1, 1], [], []>} : vector<24x144xf32>, vector<144x64xf32>, vector<24x64xf32> -> vector<24x64xf32>
    %c0_74 = arith.constant 0 : index
    %c0_75 = arith.constant 0 : index
    %69 = vector.load %arg8[%c0_74, %c0_75] : memref<24x1xf32, #tpu.memory_space<vmem>>, vector<24x1xf32>
    %70 = vector.broadcast %69 : vector<24x1xf32> to vector<24x64xf32>
    %71 = arith.addf %68, %70 : vector<24x64xf32>
    %cst_76 = arith.constant 0.000000e+00 : f32
    %72 = vector.broadcast %cst_76 : f32 to vector<24x64xf32>
    %73 = arith.maximumf %71, %72 : vector<24x64xf32>
    %74 = arith.truncf %73 : vector<24x64xf32> to vector<24x64xbf16>
    %c0_77 = arith.constant 0 : index
    %c0_78 = arith.constant 0 : index
    %c0_79 = arith.constant 0 : index
    %75 = vector.load %arg9[%c0_77, %c0_78, %c0_79] : memref<9x64x16xbf16, #tpu.memory_space<vmem>>, vector<1x64x16xbf16>
    %76 = vector.shape_cast %75 : vector<1x64x16xbf16> to vector<64x16xbf16>
    %cst_80 = arith.constant dense<0.000000e+00> : vector<24x16xf32>
    %77 = tpu.matmul %74, %76, %cst_80 {dimension_numbers = #tpu.dot_dimension_numbers<[1], [0], [0], [1], [0, 0, 1, 1], [], []>} : vector<24x64xbf16>, vector<64x16xbf16>, vector<24x16xf32> -> vector<24x16xf32>
    %c1_81 = arith.constant 1 : index
    %c0_82 = arith.constant 0 : index
    %c0_83 = arith.constant 0 : index
    %78 = vector.load %arg9[%c1_81, %c0_82, %c0_83] : memref<9x64x16xbf16, #tpu.memory_space<vmem>>, vector<1x64x16xbf16>
    %79 = vector.shape_cast %78 : vector<1x64x16xbf16> to vector<64x16xbf16>
    %cst_84 = arith.constant dense<0.000000e+00> : vector<24x16xf32>
    %80 = tpu.matmul %74, %79, %cst_84 {dimension_numbers = #tpu.dot_dimension_numbers<[1], [0], [0], [1], [0, 0, 1, 1], [], []>} : vector<24x64xbf16>, vector<64x16xbf16>, vector<24x16xf32> -> vector<24x16xf32>
    %c2_85 = arith.constant 2 : index
    %c0_86 = arith.constant 0 : index
    %c0_87 = arith.constant 0 : index
    %81 = vector.load %arg9[%c2_85, %c0_86, %c0_87] : memref<9x64x16xbf16, #tpu.memory_space<vmem>>, vector<1x64x16xbf16>
    %82 = vector.shape_cast %81 : vector<1x64x16xbf16> to vector<64x16xbf16>
    %cst_88 = arith.constant dense<0.000000e+00> : vector<24x16xf32>
    %83 = tpu.matmul %74, %82, %cst_88 {dimension_numbers = #tpu.dot_dimension_numbers<[1], [0], [0], [1], [0, 0, 1, 1], [], []>} : vector<24x64xbf16>, vector<64x16xbf16>, vector<24x16xf32> -> vector<24x16xf32>
    %c3_89 = arith.constant 3 : index
    %c0_90 = arith.constant 0 : index
    %c0_91 = arith.constant 0 : index
    %84 = vector.load %arg9[%c3_89, %c0_90, %c0_91] : memref<9x64x16xbf16, #tpu.memory_space<vmem>>, vector<1x64x16xbf16>
    %85 = vector.shape_cast %84 : vector<1x64x16xbf16> to vector<64x16xbf16>
    %cst_92 = arith.constant dense<0.000000e+00> : vector<24x16xf32>
    %86 = tpu.matmul %74, %85, %cst_92 {dimension_numbers = #tpu.dot_dimension_numbers<[1], [0], [0], [1], [0, 0, 1, 1], [], []>} : vector<24x64xbf16>, vector<64x16xbf16>, vector<24x16xf32> -> vector<24x16xf32>
    %c4_93 = arith.constant 4 : index
    %c0_94 = arith.constant 0 : index
    %c0_95 = arith.constant 0 : index
    %87 = vector.load %arg9[%c4_93, %c0_94, %c0_95] : memref<9x64x16xbf16, #tpu.memory_space<vmem>>, vector<1x64x16xbf16>
    %88 = vector.shape_cast %87 : vector<1x64x16xbf16> to vector<64x16xbf16>
    %cst_96 = arith.constant dense<0.000000e+00> : vector<24x16xf32>
    %89 = tpu.matmul %74, %88, %cst_96 {dimension_numbers = #tpu.dot_dimension_numbers<[1], [0], [0], [1], [0, 0, 1, 1], [], []>} : vector<24x64xbf16>, vector<64x16xbf16>, vector<24x16xf32> -> vector<24x16xf32>
    %c5_97 = arith.constant 5 : index
    %c0_98 = arith.constant 0 : index
    %c0_99 = arith.constant 0 : index
    %90 = vector.load %arg9[%c5_97, %c0_98, %c0_99] : memref<9x64x16xbf16, #tpu.memory_space<vmem>>, vector<1x64x16xbf16>
    %91 = vector.shape_cast %90 : vector<1x64x16xbf16> to vector<64x16xbf16>
    %cst_100 = arith.constant dense<0.000000e+00> : vector<24x16xf32>
    %92 = tpu.matmul %74, %91, %cst_100 {dimension_numbers = #tpu.dot_dimension_numbers<[1], [0], [0], [1], [0, 0, 1, 1], [], []>} : vector<24x64xbf16>, vector<64x16xbf16>, vector<24x16xf32> -> vector<24x16xf32>
    %c6_101 = arith.constant 6 : index
    %c0_102 = arith.constant 0 : index
    %c0_103 = arith.constant 0 : index
    %93 = vector.load %arg9[%c6_101, %c0_102, %c0_103] : memref<9x64x16xbf16, #tpu.memory_space<vmem>>, vector<1x64x16xbf16>
    %94 = vector.shape_cast %93 : vector<1x64x16xbf16> to vector<64x16xbf16>
    %cst_104 = arith.constant dense<0.000000e+00> : vector<24x16xf32>
    %95 = tpu.matmul %74, %94, %cst_104 {dimension_numbers = #tpu.dot_dimension_numbers<[1], [0], [0], [1], [0, 0, 1, 1], [], []>} : vector<24x64xbf16>, vector<64x16xbf16>, vector<24x16xf32> -> vector<24x16xf32>
    %c7_105 = arith.constant 7 : index
    %c0_106 = arith.constant 0 : index
    %c0_107 = arith.constant 0 : index
    %96 = vector.load %arg9[%c7_105, %c0_106, %c0_107] : memref<9x64x16xbf16, #tpu.memory_space<vmem>>, vector<1x64x16xbf16>
    %97 = vector.shape_cast %96 : vector<1x64x16xbf16> to vector<64x16xbf16>
    %cst_108 = arith.constant dense<0.000000e+00> : vector<24x16xf32>
    %98 = tpu.matmul %74, %97, %cst_108 {dimension_numbers = #tpu.dot_dimension_numbers<[1], [0], [0], [1], [0, 0, 1, 1], [], []>} : vector<24x64xbf16>, vector<64x16xbf16>, vector<24x16xf32> -> vector<24x16xf32>
    %c8_109 = arith.constant 8 : index
    %c0_110 = arith.constant 0 : index
    %c0_111 = arith.constant 0 : index
    %99 = vector.load %arg9[%c8_109, %c0_110, %c0_111] : memref<9x64x16xbf16, #tpu.memory_space<vmem>>, vector<1x64x16xbf16>
    %100 = vector.shape_cast %99 : vector<1x64x16xbf16> to vector<64x16xbf16>
    %cst_112 = arith.constant dense<0.000000e+00> : vector<24x16xf32>
    %101 = tpu.matmul %74, %100, %cst_112 {dimension_numbers = #tpu.dot_dimension_numbers<[1], [0], [0], [1], [0, 0, 1, 1], [], []>} : vector<24x64xbf16>, vector<64x16xbf16>, vector<24x16xf32> -> vector<24x16xf32>
    %102 = tpu.concatenate %77, %80, %83, %86, %89, %92, %95, %98, %101 in 0 : vector<24x16xf32>, vector<24x16xf32>, vector<24x16xf32>, vector<24x16xf32>, vector<24x16xf32>, vector<24x16xf32>, vector<24x16xf32>, vector<24x16xf32>, vector<24x16xf32> -> vector<216x16xf32>
    %c0_113 = arith.constant 0 : index
    %c0_114 = arith.constant 0 : index
    %103 = vector.load %arg10[%c0_113, %c0_114] : memref<32x216xf32, #tpu.memory_space<vmem>>, vector<32x216xf32>
    %cst_115 = arith.constant dense<0.000000e+00> : vector<32x16xf32>
    %104 = tpu.matmul %103, %102, %cst_115 {dimension_numbers = #tpu.dot_dimension_numbers<[1], [0], [0], [1], [0, 0, 1, 1], [], []>} : vector<32x216xf32>, vector<216x16xf32>, vector<32x16xf32> -> vector<32x16xf32>
    %c0_116 = arith.constant 0 : index
    %c0_117 = arith.constant 0 : index
    %105 = vector.load %arg11[%c0_116, %c0_117] : memref<32x1xf32, #tpu.memory_space<vmem>>, vector<32x1xf32>
    %106 = vector.broadcast %105 : vector<32x1xf32> to vector<32x16xf32>
    %107 = arith.addf %104, %106 : vector<32x16xf32>
    %cst_118 = arith.constant 0.000000e+00 : f32
    %108 = vector.broadcast %cst_118 : f32 to vector<32x16xf32>
    %109 = arith.maximumf %107, %108 : vector<32x16xf32>
    %110 = arith.truncf %109 : vector<32x16xf32> to vector<32x16xbf16>
    %c0_119 = arith.constant 0 : index
    %c0_120 = arith.constant 0 : index
    %c0_121 = arith.constant 0 : index
    %111 = vector.load %arg12[%c0_119, %c0_120, %c0_121] : memref<9x16x4xbf16, #tpu.memory_space<vmem>>, vector<1x16x4xbf16>
    %112 = vector.shape_cast %111 : vector<1x16x4xbf16> to vector<16x4xbf16>
    %cst_122 = arith.constant dense<0.000000e+00> : vector<32x4xf32>
    %113 = tpu.matmul %110, %112, %cst_122 {dimension_numbers = #tpu.dot_dimension_numbers<[1], [0], [0], [1], [0, 0, 1, 1], [], []>} : vector<32x16xbf16>, vector<16x4xbf16>, vector<32x4xf32> -> vector<32x4xf32>
    %c1_123 = arith.constant 1 : index
    %c0_124 = arith.constant 0 : index
    %c0_125 = arith.constant 0 : index
    %114 = vector.load %arg12[%c1_123, %c0_124, %c0_125] : memref<9x16x4xbf16, #tpu.memory_space<vmem>>, vector<1x16x4xbf16>
    %115 = vector.shape_cast %114 : vector<1x16x4xbf16> to vector<16x4xbf16>
    %cst_126 = arith.constant dense<0.000000e+00> : vector<32x4xf32>
    %116 = tpu.matmul %110, %115, %cst_126 {dimension_numbers = #tpu.dot_dimension_numbers<[1], [0], [0], [1], [0, 0, 1, 1], [], []>} : vector<32x16xbf16>, vector<16x4xbf16>, vector<32x4xf32> -> vector<32x4xf32>
    %c2_127 = arith.constant 2 : index
    %c0_128 = arith.constant 0 : index
    %c0_129 = arith.constant 0 : index
    %117 = vector.load %arg12[%c2_127, %c0_128, %c0_129] : memref<9x16x4xbf16, #tpu.memory_space<vmem>>, vector<1x16x4xbf16>
    %118 = vector.shape_cast %117 : vector<1x16x4xbf16> to vector<16x4xbf16>
    %cst_130 = arith.constant dense<0.000000e+00> : vector<32x4xf32>
    %119 = tpu.matmul %110, %118, %cst_130 {dimension_numbers = #tpu.dot_dimension_numbers<[1], [0], [0], [1], [0, 0, 1, 1], [], []>} : vector<32x16xbf16>, vector<16x4xbf16>, vector<32x4xf32> -> vector<32x4xf32>
    %c3_131 = arith.constant 3 : index
    %c0_132 = arith.constant 0 : index
    %c0_133 = arith.constant 0 : index
    %120 = vector.load %arg12[%c3_131, %c0_132, %c0_133] : memref<9x16x4xbf16, #tpu.memory_space<vmem>>, vector<1x16x4xbf16>
    %121 = vector.shape_cast %120 : vector<1x16x4xbf16> to vector<16x4xbf16>
    %cst_134 = arith.constant dense<0.000000e+00> : vector<32x4xf32>
    %122 = tpu.matmul %110, %121, %cst_134 {dimension_numbers = #tpu.dot_dimension_numbers<[1], [0], [0], [1], [0, 0, 1, 1], [], []>} : vector<32x16xbf16>, vector<16x4xbf16>, vector<32x4xf32> -> vector<32x4xf32>
    %c4_135 = arith.constant 4 : index
    %c0_136 = arith.constant 0 : index
    %c0_137 = arith.constant 0 : index
    %123 = vector.load %arg12[%c4_135, %c0_136, %c0_137] : memref<9x16x4xbf16, #tpu.memory_space<vmem>>, vector<1x16x4xbf16>
    %124 = vector.shape_cast %123 : vector<1x16x4xbf16> to vector<16x4xbf16>
    %cst_138 = arith.constant dense<0.000000e+00> : vector<32x4xf32>
    %125 = tpu.matmul %110, %124, %cst_138 {dimension_numbers = #tpu.dot_dimension_numbers<[1], [0], [0], [1], [0, 0, 1, 1], [], []>} : vector<32x16xbf16>, vector<16x4xbf16>, vector<32x4xf32> -> vector<32x4xf32>
    %c5_139 = arith.constant 5 : index
    %c0_140 = arith.constant 0 : index
    %c0_141 = arith.constant 0 : index
    %126 = vector.load %arg12[%c5_139, %c0_140, %c0_141] : memref<9x16x4xbf16, #tpu.memory_space<vmem>>, vector<1x16x4xbf16>
    %127 = vector.shape_cast %126 : vector<1x16x4xbf16> to vector<16x4xbf16>
    %cst_142 = arith.constant dense<0.000000e+00> : vector<32x4xf32>
    %128 = tpu.matmul %110, %127, %cst_142 {dimension_numbers = #tpu.dot_dimension_numbers<[1], [0], [0], [1], [0, 0, 1, 1], [], []>} : vector<32x16xbf16>, vector<16x4xbf16>, vector<32x4xf32> -> vector<32x4xf32>
    %c6_143 = arith.constant 6 : index
    %c0_144 = arith.constant 0 : index
    %c0_145 = arith.constant 0 : index
    %129 = vector.load %arg12[%c6_143, %c0_144, %c0_145] : memref<9x16x4xbf16, #tpu.memory_space<vmem>>, vector<1x16x4xbf16>
    %130 = vector.shape_cast %129 : vector<1x16x4xbf16> to vector<16x4xbf16>
    %cst_146 = arith.constant dense<0.000000e+00> : vector<32x4xf32>
    %131 = tpu.matmul %110, %130, %cst_146 {dimension_numbers = #tpu.dot_dimension_numbers<[1], [0], [0], [1], [0, 0, 1, 1], [], []>} : vector<32x16xbf16>, vector<16x4xbf16>, vector<32x4xf32> -> vector<32x4xf32>
    %c7_147 = arith.constant 7 : index
    %c0_148 = arith.constant 0 : index
    %c0_149 = arith.constant 0 : index
    %132 = vector.load %arg12[%c7_147, %c0_148, %c0_149] : memref<9x16x4xbf16, #tpu.memory_space<vmem>>, vector<1x16x4xbf16>
    %133 = vector.shape_cast %132 : vector<1x16x4xbf16> to vector<16x4xbf16>
    %cst_150 = arith.constant dense<0.000000e+00> : vector<32x4xf32>
    %134 = tpu.matmul %110, %133, %cst_150 {dimension_numbers = #tpu.dot_dimension_numbers<[1], [0], [0], [1], [0, 0, 1, 1], [], []>} : vector<32x16xbf16>, vector<16x4xbf16>, vector<32x4xf32> -> vector<32x4xf32>
    %c8_151 = arith.constant 8 : index
    %c0_152 = arith.constant 0 : index
    %c0_153 = arith.constant 0 : index
    %135 = vector.load %arg12[%c8_151, %c0_152, %c0_153] : memref<9x16x4xbf16, #tpu.memory_space<vmem>>, vector<1x16x4xbf16>
    %136 = vector.shape_cast %135 : vector<1x16x4xbf16> to vector<16x4xbf16>
    %cst_154 = arith.constant dense<0.000000e+00> : vector<32x4xf32>
    %137 = tpu.matmul %110, %136, %cst_154 {dimension_numbers = #tpu.dot_dimension_numbers<[1], [0], [0], [1], [0, 0, 1, 1], [], []>} : vector<32x16xbf16>, vector<16x4xbf16>, vector<32x4xf32> -> vector<32x4xf32>
    %138 = tpu.concatenate %113, %116, %119, %122, %125, %128, %131, %134, %137 in 0 : vector<32x4xf32>, vector<32x4xf32>, vector<32x4xf32>, vector<32x4xf32>, vector<32x4xf32>, vector<32x4xf32>, vector<32x4xf32>, vector<32x4xf32>, vector<32x4xf32> -> vector<288x4xf32>
    %c0_155 = arith.constant 0 : index
    %c0_156 = arith.constant 0 : index
    %139 = vector.load %arg13[%c0_155, %c0_156] : memref<48x288xf32, #tpu.memory_space<vmem>>, vector<48x288xf32>
    %cst_157 = arith.constant dense<0.000000e+00> : vector<48x4xf32>
    %140 = tpu.matmul %139, %138, %cst_157 {dimension_numbers = #tpu.dot_dimension_numbers<[1], [0], [0], [1], [0, 0, 1, 1], [], []>} : vector<48x288xf32>, vector<288x4xf32>, vector<48x4xf32> -> vector<48x4xf32>
    %c0_158 = arith.constant 0 : index
    %c0_159 = arith.constant 0 : index
    %141 = vector.load %arg14[%c0_158, %c0_159] : memref<48x1xf32, #tpu.memory_space<vmem>>, vector<48x1xf32>
    %142 = vector.broadcast %141 : vector<48x1xf32> to vector<48x4xf32>
    %143 = arith.addf %140, %142 : vector<48x4xf32>
    %cst_160 = arith.constant 0.000000e+00 : f32
    %144 = vector.broadcast %cst_160 : f32 to vector<48x4xf32>
    %145 = arith.maximumf %143, %144 : vector<48x4xf32>
    %146 = arith.truncf %145 : vector<48x4xf32> to vector<48x4xbf16>
    %c0_161 = arith.constant 0 : index
    %c0_162 = arith.constant 0 : index
    %c0_163 = arith.constant 0 : index
    %147 = vector.load %arg15[%c0_161, %c0_162, %c0_163] : memref<9x4x1xbf16, #tpu.memory_space<vmem>>, vector<1x4x1xbf16>
    %148 = vector.shape_cast %147 : vector<1x4x1xbf16> to vector<4x1xbf16>
    %cst_164 = arith.constant dense<0.000000e+00> : vector<48x1xf32>
    %149 = tpu.matmul %146, %148, %cst_164 {dimension_numbers = #tpu.dot_dimension_numbers<[1], [0], [0], [1], [0, 0, 1, 1], [], []>} : vector<48x4xbf16>, vector<4x1xbf16>, vector<48x1xf32> -> vector<48x1xf32>
    %c1_165 = arith.constant 1 : index
    %c0_166 = arith.constant 0 : index
    %c0_167 = arith.constant 0 : index
    %150 = vector.load %arg15[%c1_165, %c0_166, %c0_167] : memref<9x4x1xbf16, #tpu.memory_space<vmem>>, vector<1x4x1xbf16>
    %151 = vector.shape_cast %150 : vector<1x4x1xbf16> to vector<4x1xbf16>
    %cst_168 = arith.constant dense<0.000000e+00> : vector<48x1xf32>
    %152 = tpu.matmul %146, %151, %cst_168 {dimension_numbers = #tpu.dot_dimension_numbers<[1], [0], [0], [1], [0, 0, 1, 1], [], []>} : vector<48x4xbf16>, vector<4x1xbf16>, vector<48x1xf32> -> vector<48x1xf32>
    %c2_169 = arith.constant 2 : index
    %c0_170 = arith.constant 0 : index
    %c0_171 = arith.constant 0 : index
    %153 = vector.load %arg15[%c2_169, %c0_170, %c0_171] : memref<9x4x1xbf16, #tpu.memory_space<vmem>>, vector<1x4x1xbf16>
    %154 = vector.shape_cast %153 : vector<1x4x1xbf16> to vector<4x1xbf16>
    %cst_172 = arith.constant dense<0.000000e+00> : vector<48x1xf32>
    %155 = tpu.matmul %146, %154, %cst_172 {dimension_numbers = #tpu.dot_dimension_numbers<[1], [0], [0], [1], [0, 0, 1, 1], [], []>} : vector<48x4xbf16>, vector<4x1xbf16>, vector<48x1xf32> -> vector<48x1xf32>
    %c3_173 = arith.constant 3 : index
    %c0_174 = arith.constant 0 : index
    %c0_175 = arith.constant 0 : index
    %156 = vector.load %arg15[%c3_173, %c0_174, %c0_175] : memref<9x4x1xbf16, #tpu.memory_space<vmem>>, vector<1x4x1xbf16>
    %157 = vector.shape_cast %156 : vector<1x4x1xbf16> to vector<4x1xbf16>
    %cst_176 = arith.constant dense<0.000000e+00> : vector<48x1xf32>
    %158 = tpu.matmul %146, %157, %cst_176 {dimension_numbers = #tpu.dot_dimension_numbers<[1], [0], [0], [1], [0, 0, 1, 1], [], []>} : vector<48x4xbf16>, vector<4x1xbf16>, vector<48x1xf32> -> vector<48x1xf32>
    %c4_177 = arith.constant 4 : index
    %c0_178 = arith.constant 0 : index
    %c0_179 = arith.constant 0 : index
    %159 = vector.load %arg15[%c4_177, %c0_178, %c0_179] : memref<9x4x1xbf16, #tpu.memory_space<vmem>>, vector<1x4x1xbf16>
    %160 = vector.shape_cast %159 : vector<1x4x1xbf16> to vector<4x1xbf16>
    %cst_180 = arith.constant dense<0.000000e+00> : vector<48x1xf32>
    %161 = tpu.matmul %146, %160, %cst_180 {dimension_numbers = #tpu.dot_dimension_numbers<[1], [0], [0], [1], [0, 0, 1, 1], [], []>} : vector<48x4xbf16>, vector<4x1xbf16>, vector<48x1xf32> -> vector<48x1xf32>
    %c5_181 = arith.constant 5 : index
    %c0_182 = arith.constant 0 : index
    %c0_183 = arith.constant 0 : index
    %162 = vector.load %arg15[%c5_181, %c0_182, %c0_183] : memref<9x4x1xbf16, #tpu.memory_space<vmem>>, vector<1x4x1xbf16>
    %163 = vector.shape_cast %162 : vector<1x4x1xbf16> to vector<4x1xbf16>
    %cst_184 = arith.constant dense<0.000000e+00> : vector<48x1xf32>
    %164 = tpu.matmul %146, %163, %cst_184 {dimension_numbers = #tpu.dot_dimension_numbers<[1], [0], [0], [1], [0, 0, 1, 1], [], []>} : vector<48x4xbf16>, vector<4x1xbf16>, vector<48x1xf32> -> vector<48x1xf32>
    %c6_185 = arith.constant 6 : index
    %c0_186 = arith.constant 0 : index
    %c0_187 = arith.constant 0 : index
    %165 = vector.load %arg15[%c6_185, %c0_186, %c0_187] : memref<9x4x1xbf16, #tpu.memory_space<vmem>>, vector<1x4x1xbf16>
    %166 = vector.shape_cast %165 : vector<1x4x1xbf16> to vector<4x1xbf16>
    %cst_188 = arith.constant dense<0.000000e+00> : vector<48x1xf32>
    %167 = tpu.matmul %146, %166, %cst_188 {dimension_numbers = #tpu.dot_dimension_numbers<[1], [0], [0], [1], [0, 0, 1, 1], [], []>} : vector<48x4xbf16>, vector<4x1xbf16>, vector<48x1xf32> -> vector<48x1xf32>
    %c7_189 = arith.constant 7 : index
    %c0_190 = arith.constant 0 : index
    %c0_191 = arith.constant 0 : index
    %168 = vector.load %arg15[%c7_189, %c0_190, %c0_191] : memref<9x4x1xbf16, #tpu.memory_space<vmem>>, vector<1x4x1xbf16>
    %169 = vector.shape_cast %168 : vector<1x4x1xbf16> to vector<4x1xbf16>
    %cst_192 = arith.constant dense<0.000000e+00> : vector<48x1xf32>
    %170 = tpu.matmul %146, %169, %cst_192 {dimension_numbers = #tpu.dot_dimension_numbers<[1], [0], [0], [1], [0, 0, 1, 1], [], []>} : vector<48x4xbf16>, vector<4x1xbf16>, vector<48x1xf32> -> vector<48x1xf32>
    %c8_193 = arith.constant 8 : index
    %c0_194 = arith.constant 0 : index
    %c0_195 = arith.constant 0 : index
    %171 = vector.load %arg15[%c8_193, %c0_194, %c0_195] : memref<9x4x1xbf16, #tpu.memory_space<vmem>>, vector<1x4x1xbf16>
    %172 = vector.shape_cast %171 : vector<1x4x1xbf16> to vector<4x1xbf16>
    %cst_196 = arith.constant dense<0.000000e+00> : vector<48x1xf32>
    %173 = tpu.matmul %146, %172, %cst_196 {dimension_numbers = #tpu.dot_dimension_numbers<[1], [0], [0], [1], [0, 0, 1, 1], [], []>} : vector<48x4xbf16>, vector<4x1xbf16>, vector<48x1xf32> -> vector<48x1xf32>
    %174 = tpu.concatenate %149, %152, %155, %158, %161, %164, %167, %170, %173 in 0 : vector<48x1xf32>, vector<48x1xf32>, vector<48x1xf32>, vector<48x1xf32>, vector<48x1xf32>, vector<48x1xf32>, vector<48x1xf32>, vector<48x1xf32>, vector<48x1xf32> -> vector<432x1xf32>
    %c0_197 = arith.constant 0 : index
    %c0_198 = arith.constant 0 : index
    %175 = vector.load %arg16[%c0_197, %c0_198] : memref<64x432xf32, #tpu.memory_space<vmem>>, vector<64x432xf32>
    %cst_199 = arith.constant dense<0.000000e+00> : vector<64x1xf32>
    %176 = tpu.matmul %175, %174, %cst_199 {dimension_numbers = #tpu.dot_dimension_numbers<[1], [0], [0], [1], [0, 0, 1, 1], [], []>} : vector<64x432xf32>, vector<432x1xf32>, vector<64x1xf32> -> vector<64x1xf32>
    %c0_200 = arith.constant 0 : index
    %c0_201 = arith.constant 0 : index
    %177 = vector.load %arg17[%c0_200, %c0_201] : memref<64x1xf32, #tpu.memory_space<vmem>>, vector<64x1xf32>
    %178 = arith.addf %176, %177 : vector<64x1xf32>
    %cst_202 = arith.constant 0.000000e+00 : f32
    %179 = vector.broadcast %cst_202 : f32 to vector<64x1xf32>
    %180 = arith.maximumf %178, %179 : vector<64x1xf32>
    %181 = tpu.transpose %180, [1, 0] : vector<64x1xf32> -> vector<1x64xf32>
    %c0_203 = arith.constant 0 : index
    %c0_204 = arith.constant 0 : index
    %182 = vector.load %arg18[%c0_203, %c0_204] : memref<64x32xf32, #tpu.memory_space<vmem>>, vector<64x32xf32>
    %cst_205 = arith.constant dense<0.000000e+00> : vector<1x32xf32>
    %183 = tpu.matmul %181, %182, %cst_205 {dimension_numbers = #tpu.dot_dimension_numbers<[1], [0], [0], [1], [0, 0, 1, 1], [], []>} : vector<1x64xf32>, vector<64x32xf32>, vector<1x32xf32> -> vector<1x32xf32>
    %c0_206 = arith.constant 0 : index
    %c0_207 = arith.constant 0 : index
    %184 = vector.load %arg19[%c0_206, %c0_207] : memref<1x32xf32, #tpu.memory_space<vmem>>, vector<1x32xf32>
    %185 = arith.addf %183, %184 : vector<1x32xf32>
    %cst_208 = arith.constant 0.000000e+00 : f32
    %186 = vector.broadcast %cst_208 : f32 to vector<1x32xf32>
    %187 = arith.maximumf %185, %186 : vector<1x32xf32>
    %c0_209 = arith.constant 0 : index
    %c0_210 = arith.constant 0 : index
    %c0_211 = arith.constant 0 : index
    %188 = vector.load %arg2[%c0_209, %c0_210, %c0_211] : memref<1x1x32xf32, #tpu.memory_space<vmem>>, vector<1x1x32xf32>
    %189 = vector.shape_cast %188 : vector<1x1x32xf32> to vector<1x32xf32>
    %c0_212 = arith.constant 0 : index
    %c0_213 = arith.constant 0 : index
    %190 = vector.load %arg20[%c0_212, %c0_213] : memref<32x96xf32, #tpu.memory_space<vmem>>, vector<32x96xf32>
    %cst_214 = arith.constant dense<0.000000e+00> : vector<1x96xf32>
    %191 = tpu.matmul %187, %190, %cst_214 {dimension_numbers = #tpu.dot_dimension_numbers<[1], [0], [0], [1], [0, 0, 1, 1], [], []>} : vector<1x32xf32>, vector<32x96xf32>, vector<1x96xf32> -> vector<1x96xf32>
    %c0_215 = arith.constant 0 : index
    %c0_216 = arith.constant 0 : index
    %192 = vector.load %arg21[%c0_215, %c0_216] : memref<1x96xf32, #tpu.memory_space<vmem>>, vector<1x96xf32>
    %193 = arith.addf %191, %192 : vector<1x96xf32>
    %c0_217 = arith.constant 0 : index
    %c0_218 = arith.constant 0 : index
    %194 = vector.load %arg22[%c0_217, %c0_218] : memref<32x96xf32, #tpu.memory_space<vmem>>, vector<32x96xf32>
    %cst_219 = arith.constant dense<0.000000e+00> : vector<1x96xf32>
    %195 = tpu.matmul %189, %194, %cst_219 {dimension_numbers = #tpu.dot_dimension_numbers<[1], [0], [0], [1], [0, 0, 1, 1], [], []>} : vector<1x32xf32>, vector<32x96xf32>, vector<1x96xf32> -> vector<1x96xf32>
    %c0_220 = arith.constant 0 : index
    %c0_221 = arith.constant 0 : index
    %196 = vector.load %arg23[%c0_220, %c0_221] : memref<1x96xf32, #tpu.memory_space<vmem>>, vector<1x96xf32>
    %197 = arith.addf %195, %196 : vector<1x96xf32>
    %198 = vector.extract_strided_slice %193 {offsets = [0, 0], sizes = [1, 32], strides = [1, 1]} : vector<1x96xf32> to vector<1x32xf32>
    %199 = vector.extract_strided_slice %197 {offsets = [0, 0], sizes = [1, 32], strides = [1, 1]} : vector<1x96xf32> to vector<1x32xf32>
    %200 = arith.addf %198, %199 : vector<1x32xf32>
    %201 = arith.negf %200 : vector<1x32xf32>
    %202 = math.exp %201 : vector<1x32xf32>
    %cst_222 = arith.constant 1.000000e+00 : f32
    %203 = vector.broadcast %cst_222 : f32 to vector<1x32xf32>
    %204 = arith.addf %203, %202 : vector<1x32xf32>
    %205 = arith.divf %203, %204 : vector<1x32xf32>
    %206 = vector.extract_strided_slice %193 {offsets = [0, 32], sizes = [1, 32], strides = [1, 1]} : vector<1x96xf32> to vector<1x32xf32>
    %207 = vector.extract_strided_slice %197 {offsets = [0, 32], sizes = [1, 32], strides = [1, 1]} : vector<1x96xf32> to vector<1x32xf32>
    %208 = arith.addf %206, %207 : vector<1x32xf32>
    %209 = arith.negf %208 : vector<1x32xf32>
    %210 = math.exp %209 : vector<1x32xf32>
    %cst_223 = arith.constant 1.000000e+00 : f32
    %211 = vector.broadcast %cst_223 : f32 to vector<1x32xf32>
    %212 = arith.addf %211, %210 : vector<1x32xf32>
    %213 = arith.divf %211, %212 : vector<1x32xf32>
    %214 = vector.extract_strided_slice %193 {offsets = [0, 64], sizes = [1, 32], strides = [1, 1]} : vector<1x96xf32> to vector<1x32xf32>
    %215 = vector.extract_strided_slice %197 {offsets = [0, 64], sizes = [1, 32], strides = [1, 1]} : vector<1x96xf32> to vector<1x32xf32>
    %216 = arith.mulf %205, %215 : vector<1x32xf32>
    %217 = arith.addf %214, %216 : vector<1x32xf32>
    %218 = math.tanh %217 : vector<1x32xf32>
    %cst_224 = arith.constant 1.000000e+00 : f32
    %219 = vector.broadcast %cst_224 : f32 to vector<1x32xf32>
    %220 = arith.subf %219, %213 : vector<1x32xf32>
    %221 = arith.mulf %220, %218 : vector<1x32xf32>
    %222 = arith.mulf %213, %189 : vector<1x32xf32>
    %223 = arith.addf %221, %222 : vector<1x32xf32>
    %c0_225 = arith.constant 0 : index
    %c0_226 = arith.constant 0 : index
    %224 = vector.load %arg24[%c0_225, %c0_226] : memref<32x6xf32, #tpu.memory_space<vmem>>, vector<32x6xf32>
    %cst_227 = arith.constant dense<0.000000e+00> : vector<1x6xf32>
    %225 = tpu.matmul %223, %224, %cst_227 {dimension_numbers = #tpu.dot_dimension_numbers<[1], [0], [0], [1], [0, 0, 1, 1], [], []>} : vector<1x32xf32>, vector<32x6xf32>, vector<1x6xf32> -> vector<1x6xf32>
    %c0_228 = arith.constant 0 : index
    %c0_229 = arith.constant 0 : index
    %226 = vector.load %arg25[%c0_228, %c0_229] : memref<1x6xf32, #tpu.memory_space<vmem>>, vector<1x6xf32>
    %227 = arith.addf %225, %226 : vector<1x6xf32>
    %c0_230 = arith.constant 0 : index
    %c0_231 = arith.constant 0 : index
    %228 = vector.load %arg26[%c0_230, %c0_231] : memref<32x1xf32, #tpu.memory_space<vmem>>, vector<32x1xf32>
    %cst_232 = arith.constant dense<0.000000e+00> : vector<1x1xf32>
    %229 = tpu.matmul %223, %228, %cst_232 {dimension_numbers = #tpu.dot_dimension_numbers<[1], [0], [0], [1], [0, 0, 1, 1], [], []>} : vector<1x32xf32>, vector<32x1xf32>, vector<1x1xf32> -> vector<1x1xf32>
    %c0_233 = arith.constant 0 : index
    %c0_234 = arith.constant 0 : index
    %230 = vector.load %arg27[%c0_233, %c0_234] : memref<1x1xf32, #tpu.memory_space<vmem>>, vector<1x1xf32>
    %231 = arith.addf %229, %230 : vector<1x1xf32>
    %cst_235 = arith.constant 0.000000e+00 : f32
    %232 = vector.broadcast %cst_235 : f32 to vector<1x89xf32>
    %233 = tpu.concatenate %231, %227, %223, %232 in 1 : vector<1x1xf32>, vector<1x6xf32>, vector<1x32xf32>, vector<1x89xf32> -> vector<1x128xf32>
    %c0_236 = arith.constant 0 : index
    %c0_237 = arith.constant 0 : index
    %c0_238 = arith.constant 0 : index
    %234 = vector.load %arg28[%c0_236, %c0_237, %c0_238] : memref<1x1x128xf32, #tpu.memory_space<vmem>>, vector<1x1x128xf32>
    %235 = vector.shape_cast %234 : vector<1x1x128xf32> to vector<1x128xf32>
    %236 = vector.shape_cast %233 : vector<1x128xf32> to vector<1x1x128xf32>
    tpu.vector_store %arg28[%c0_236, %c0_237, %c0_238], %236 {strides = array<i32>} : memref<1x1x128xf32, #tpu.memory_space<vmem>>, vector<1x1x128xf32>,
    return
  }
  func.func @transform_0(%arg0: i32) -> (i32, i32, i32) {
    %c0_i32 = arith.constant 0 : i32
    %c0_i32_0 = arith.constant 0 : i32
    %c0_i32_1 = arith.constant 0 : i32
    return %arg0, %c0_i32, %c0_i32_0 : i32, i32, i32
  }
  func.func @transform_1(%arg0: i32) -> (i32, i32, i32) {
    %c0_i32 = arith.constant 0 : i32
    %c0_i32_0 = arith.constant 0 : i32
    %c0_i32_1 = arith.constant 0 : i32
    return %arg0, %c0_i32, %c0_i32_0 : i32, i32, i32
  }
  func.func @transform_2(%arg0: i32) -> (i32, i32, i32) {
    %c0_i32 = arith.constant 0 : i32
    %c0_i32_0 = arith.constant 0 : i32
    %c0_i32_1 = arith.constant 0 : i32
    %c0_i32_2 = arith.constant 0 : i32
    return %c0_i32, %c0_i32_0, %c0_i32_1 : i32, i32, i32
  }
  func.func @transform_3(%arg0: i32) -> (i32, i32) {
    %c0_i32 = arith.constant 0 : i32
    %c0_i32_0 = arith.constant 0 : i32
    %c0_i32_1 = arith.constant 0 : i32
    return %c0_i32, %c0_i32_0 : i32, i32
  }
  func.func @transform_4(%arg0: i32) -> (i32, i32) {
    %c0_i32 = arith.constant 0 : i32
    %c0_i32_0 = arith.constant 0 : i32
    %c0_i32_1 = arith.constant 0 : i32
    return %c0_i32, %c0_i32_0 : i32, i32
  }
  func.func @transform_5(%arg0: i32) -> (i32, i32, i32) {
    %c0_i32 = arith.constant 0 : i32
    %c0_i32_0 = arith.constant 0 : i32
    %c0_i32_1 = arith.constant 0 : i32
    %c0_i32_2 = arith.constant 0 : i32
    return %c0_i32, %c0_i32_0, %c0_i32_1 : i32, i32, i32
  }
  func.func @transform_6(%arg0: i32) -> (i32, i32) {
    %c0_i32 = arith.constant 0 : i32
    %c0_i32_0 = arith.constant 0 : i32
    %c0_i32_1 = arith.constant 0 : i32
    return %c0_i32, %c0_i32_0 : i32, i32
  }
  func.func @transform_7(%arg0: i32) -> (i32, i32) {
    %c0_i32 = arith.constant 0 : i32
    %c0_i32_0 = arith.constant 0 : i32
    %c0_i32_1 = arith.constant 0 : i32
    return %c0_i32, %c0_i32_0 : i32, i32
  }
  func.func @transform_8(%arg0: i32) -> (i32, i32, i32) {
    %c0_i32 = arith.constant 0 : i32
    %c0_i32_0 = arith.constant 0 : i32
    %c0_i32_1 = arith.constant 0 : i32
    %c0_i32_2 = arith.constant 0 : i32
    return %c0_i32, %c0_i32_0, %c0_i32_1 : i32, i32, i32
  }
  func.func @transform_9(%arg0: i32) -> (i32, i32) {
    %c0_i32 = arith.constant 0 : i32
    %c0_i32_0 = arith.constant 0 : i32
    %c0_i32_1 = arith.constant 0 : i32
    return %c0_i32, %c0_i32_0 : i32, i32
  }
  func.func @transform_10(%arg0: i32) -> (i32, i32) {
    %c0_i32 = arith.constant 0 : i32
    %c0_i32_0 = arith.constant 0 : i32
    %c0_i32_1 = arith.constant 0 : i32
    return %c0_i32, %c0_i32_0 : i32, i32
  }
  func.func @transform_11(%arg0: i32) -> (i32, i32, i32) {
    %c0_i32 = arith.constant 0 : i32
    %c0_i32_0 = arith.constant 0 : i32
    %c0_i32_1 = arith.constant 0 : i32
    %c0_i32_2 = arith.constant 0 : i32
    return %c0_i32, %c0_i32_0, %c0_i32_1 : i32, i32, i32
  }
  func.func @transform_12(%arg0: i32) -> (i32, i32) {
    %c0_i32 = arith.constant 0 : i32
    %c0_i32_0 = arith.constant 0 : i32
    %c0_i32_1 = arith.constant 0 : i32
    return %c0_i32, %c0_i32_0 : i32, i32
  }
  func.func @transform_13(%arg0: i32) -> (i32, i32) {
    %c0_i32 = arith.constant 0 : i32
    %c0_i32_0 = arith.constant 0 : i32
    %c0_i32_1 = arith.constant 0 : i32
    return %c0_i32, %c0_i32_0 : i32, i32
  }
  func.func @transform_14(%arg0: i32) -> (i32, i32, i32) {
    %c0_i32 = arith.constant 0 : i32
    %c0_i32_0 = arith.constant 0 : i32
    %c0_i32_1 = arith.constant 0 : i32
    %c0_i32_2 = arith.constant 0 : i32
    return %c0_i32, %c0_i32_0, %c0_i32_1 : i32, i32, i32
  }
  func.func @transform_15(%arg0: i32) -> (i32, i32) {
    %c0_i32 = arith.constant 0 : i32
    %c0_i32_0 = arith.constant 0 : i32
    %c0_i32_1 = arith.constant 0 : i32
    return %c0_i32, %c0_i32_0 : i32, i32
  }
  func.func @transform_16(%arg0: i32) -> (i32, i32) {
    %c0_i32 = arith.constant 0 : i32
    %c0_i32_0 = arith.constant 0 : i32
    %c0_i32_1 = arith.constant 0 : i32
    return %c0_i32, %c0_i32_0 : i32, i32
  }
  func.func @transform_17(%arg0: i32) -> (i32, i32) {
    %c0_i32 = arith.constant 0 : i32
    %c0_i32_0 = arith.constant 0 : i32
    %c0_i32_1 = arith.constant 0 : i32
    return %c0_i32, %c0_i32_0 : i32, i32
  }
  func.func @transform_18(%arg0: i32) -> (i32, i32) {
    %c0_i32 = arith.constant 0 : i32
    %c0_i32_0 = arith.constant 0 : i32
    %c0_i32_1 = arith.constant 0 : i32
    return %c0_i32, %c0_i32_0 : i32, i32
  }
  func.func @transform_19(%arg0: i32) -> (i32, i32) {
    %c0_i32 = arith.constant 0 : i32
    %c0_i32_0 = arith.constant 0 : i32
    %c0_i32_1 = arith.constant 0 : i32
    return %c0_i32, %c0_i32_0 : i32, i32
  }
  func.func @transform_20(%arg0: i32) -> (i32, i32) {
    %c0_i32 = arith.constant 0 : i32
    %c0_i32_0 = arith.constant 0 : i32
    %c0_i32_1 = arith.constant 0 : i32
    return %c0_i32, %c0_i32_0 : i32, i32
  }
  func.func @transform_21(%arg0: i32) -> (i32, i32) {
    %c0_i32 = arith.constant 0 : i32
    %c0_i32_0 = arith.constant 0 : i32
    %c0_i32_1 = arith.constant 0 : i32
    return %c0_i32, %c0_i32_0 : i32, i32
  }
  func.func @transform_22(%arg0: i32) -> (i32, i32) {
    %c0_i32 = arith.constant 0 : i32
    %c0_i32_0 = arith.constant 0 : i32
    %c0_i32_1 = arith.constant 0 : i32
    return %c0_i32, %c0_i32_0 : i32, i32
  }
  func.func @transform_23(%arg0: i32) -> (i32, i32) {
    %c0_i32 = arith.constant 0 : i32
    %c0_i32_0 = arith.constant 0 : i32
    %c0_i32_1 = arith.constant 0 : i32
    return %c0_i32, %c0_i32_0 : i32, i32
  }
  func.func @transform_24(%arg0: i32) -> (i32, i32) {
    %c0_i32 = arith.constant 0 : i32
    %c0_i32_0 = arith.constant 0 : i32
    %c0_i32_1 = arith.constant 0 : i32
    return %c0_i32, %c0_i32_0 : i32, i32
  }
  func.func @transform_25(%arg0: i32) -> (i32, i32) {
    %c0_i32 = arith.constant 0 : i32
    %c0_i32_0 = arith.constant 0 : i32
    %c0_i32_1 = arith.constant 0 : i32
    return %c0_i32, %c0_i32_0 : i32, i32
  }
  func.func @transform_26(%arg0: i32) -> (i32, i32) {
    %c0_i32 = arith.constant 0 : i32
    %c0_i32_0 = arith.constant 0 : i32
    %c0_i32_1 = arith.constant 0 : i32
    return %c0_i32, %c0_i32_0 : i32, i32
  }
  func.func @transform_27(%arg0: i32) -> (i32, i32, i32) {
    %c0_i32 = arith.constant 0 : i32
    %c0_i32_0 = arith.constant 0 : i32
    %c0_i32_1 = arith.constant 0 : i32
    return %arg0, %c0_i32, %c0_i32_0 : i32, i32, i32
  }
}

</mosaic_0001>

<bundles_post_ra>
// kernel: gru_model_forward.1
= control target key start
LH: loop header
LB: loop body
LE: loop exit
PB: predicated region body
PF: predicated region fallthrough
CT: control target
= control target key end

     0   :  { %s13502_s0 = inlined_call_operand.vmem [shape: f32[2,8,256], index: 0, kind: input, shape index: {}]   ;;  %s13503_s1 = inlined_call_operand.vmem [shape: f32[2,1,32], index: 1, kind: input, shape index: {}]   ;;  %s13504_s2 = inlined_call_operand.vmem [shape: bf16[9,256,256], index: 2, kind: input, shape index: {}]   ;;  %s13505_s3 = inlined_call_operand.hbm [shape: f32[16,72], index: 3, kind: input, shape index: {}]   ;;  %s13506_s4 = inlined_call_operand.vmem [shape: f32[16,1], index: 4, kind: input, shape index: {}]   ;;  %s13507_s5 = inlined_call_operand.vmem [shape: bf16[9,256,64], index: 5, kind: input, shape index: {}]   ;;  %s13508_s6 = inlined_call_operand.hbm [shape: f32[24,144], index: 6, kind: input, shape index: {}]   ;;  %s13509_s7 = inlined_call_operand.vmem [shape: f32[24,1], index: 7, kind: input, shape index: {}]   ;;  %s13510_s8 = inlined_call_operand.vmem [shape: bf16[9,64,16], index: 8, kind: input, shape index: {}]   ;;  %s13511_s9 = inlined_call_operand.vmem [shape: f32[32,216], index: 9, kind: input, shape index: {}]   ;;  %s13512_s10 = inlined_call_operand.vmem [shape: f32[32,1], index: 10, kind: input, shape index: {}]   ;;  %s13513_s11 = inlined_call_operand.vmem [shape: bf16[9,16,4], index: 11, kind: input, shape index: {}]   ;;  %s13514_s12 = inlined_call_operand.vmem [shape: f32[48,288], index: 12, kind: input, shape index: {}]   ;;  %s13515_s13 = inlined_call_operand.vmem [shape: f32[48,1], index: 13, kind: input, shape index: {}]   ;;  %s13516_s14 = inlined_call_operand.vmem [shape: bf16[9,4,1], index: 14, kind: input, shape index: {}]   ;;  %s13517_s15 = inlined_call_operand.vmem [shape: f32[64,432], index: 15, kind: input, shape index: {}]   ;;  %s13518_s16 = inlined_call_operand.vmem [shape: f32[64,1], index: 16, kind: input, shape index: {}]   ;;  %s13519_s17 = inlined_call_operand.vmem [shape: f32[64,32], index: 17, kind: input, shape index: {}]   ;;  %s13520_s18 = inlined_call_operand.hbm [shape: f32[1,32], index: 18, kind: input, shape index: {}]   ;;  %s13521_s19 = inlined_call_operand.vmem [shape: f32[32,96], index: 19, kind: input, shape index: {}]   ;;  %s13522_s20 = inlined_call_operand.hbm [shape: f32[1,96], index: 20, kind: input, shape index: {}]   ;;  %s13523_s21 = inlined_call_operand.vmem [shape: f32[32,96], index: 21, kind: input, shape index: {}]   ;;  %s13524_s22 = inlined_call_operand.hbm [shape: f32[1,96], index: 22, kind: input, shape index: {}]   ;;  %s13525_s23 = inlined_call_operand.vmem [shape: f32[32,6], index: 23, kind: input, shape index: {}]   ;;  %s13526_s24 = inlined_call_operand.vmem [shape: f32[1,6], index: 24, kind: input, shape index: {}]   ;;  %s13527_s25 = inlined_call_operand.vmem [shape: f32[32,1], index: 25, kind: input, shape index: {}]   ;;  %s13528_s26 = inlined_call_operand.<no memory space> [shape: f32[1,1], index: 26, kind: input, shape index: {}]   ;;  %s13529_s27 = inlined_call_operand.vmem [shape: f32[2,1,128], index: 27, kind: output, shape index: {}]  }
   0x1   :  { %13547 = sst [smem:[#allocation15_spill]] %s13502_s0  ;;  %v32_v0 = vstv %s13528_s26 }
   0x2   :  { %13548 = sst [smem:[#allocation16_spill]] %s13503_s1  ;;  %33 = vst [vmem:[#allocation2] sm:$0x1] %v32_v0 }
   0x3   :  { %13549 = sst [smem:[#allocation17_spill]] %s13504_s2 }
   0x4   :  { %13550 = sst [smem:[#allocation18_spill]] %s13505_s3 }
   0x5   :  { %13551 = sst [smem:[#allocation19_spill]] %s13506_s4 }
   0x6   :  { %13552 = sst [smem:[#allocation20_spill]] %s13507_s5 }
   0x7   :  { %13553 = sst [smem:[#allocation21_spill]] %s13508_s6 }
   0x8   :  { %13554 = sst [smem:[#allocation22_spill]] %s13509_s7 }
   0x9   :  { %13555 = sst [smem:[#allocation23_spill]] %s13510_s8 }
   0xa   :  { %13556 = sst [smem:[#allocation24_spill]] %s13511_s9 }
   0xb   :  { %13557 = sst [smem:[#allocation25_spill]] %s13512_s10 }
   0xc   :  { %13558 = sst [smem:[#allocation26_spill]] %s13513_s11 }
   0xd   :  { %13559 = sst [smem:[#allocation27_spill]] %s13526_s24 }
   0xe   :  { %13560 = sst [smem:[#allocation28_spill]] %s13527_s25 }
   0xf   :  { %13561 = sst [smem:[#allocation29_spill]] %s13529_s27 }
  0x10   :  { %34 = vsyncpa [#allocation4], 0 }
  0x11   :  { %35 = vsyncpa [#allocation6], 0 }
  0x12   :  { %36 = vsyncpa [#allocation9], 0  ;;  %s11123_s8 = smov 0  }
  0x13 LB: > { %13562 = sst [smem:[#allocation14_spill]] %s10960_s8  ;;  %s10962_s30 = smov [#allocation5]   ;;  %s10960_s8 = sphi %s11123_s8, %s42_s8  }
  0x14   : > { %s684_s9 = sshll.u32 %s10962_s30, 4  ;;  %s11129_s5 = sadd.s32 4294967295, %s10960_s8   ;;  %s11134_s9 = int_to_ptr.vmem [resolvable:$true] %s684_s9 }
  0x15   : > { %p7863_p0 = scmp.ge.s32.totalorder %s10960_s8, 1  ;;  %p650_p1 = scmp.lt.s32.totalorder %s10960_s8, 3 }
  0x16   : > { %p13543_p2 = scmp.eq.s32.totalorder %s11129_s5, 0  ;;  %s10963_s28 = smov [#allocation8]  }
  0x17   : > { %p11136_p3 = pnand %p7863_p0, %p650_p1  ;;  %s745_s0 = sshll.u32 %s10963_s28, 4  ;;  %s11142_s0 = int_to_ptr.vmem [resolvable:$true] %s745_s0 }
  0x18   : > { %s10964_s29 = smov [#allocation3]   ;;  %s13565_s2 = sld [smem:[#allocation21_spill]] }
  0x19   : > { %s13563_s26 = scalar_select %p11136_p3, 1, 0 }
  0x1a   : > { %p10121_p4 = pneg %p11136_p3  ;;  %s665_s1 = sshll.u32 %s10964_s29, 4  ;;  %s11150_s1 = int_to_ptr.vmem [resolvable:$true] %s665_s1 }
  0x1c   : > { %p11146_p5 = pnand %p13543_p2, %p10121_p4 }
  0x1e   : > { %s10802_s3 = scalar_lea.hbm %s13565_s2, 768  ;;  %p11160_p7 = pneg %p11146_p5 }
  0x1f   : > { %p10803_p6 = scmp.ne.s32.totalorder %s13565_s2, %s10802_s3  ;;  %p10809_p10 = scmp.lt.u32.totalorder %s10802_s3, %s13565_s2 }
  0x21   : > { %p10805_p8 = pnand %p11160_p7, %p10803_p6 }
  0x23   : > { %p10806_p9 = pneg %p10805_p8 }
  0x25   : > { %p10811_p11 = pnand %p10809_p10, %p10806_p9 }
  0x27   : > { %10814 = shalt.err (!%p10811_p11)
}
  0x28   : > { %s10815_s6 = scalar_lea.vmem %s11134_s9, 768  ;;  %p10823_p1 = scmp.lt.s32.totalorder %s11134_s9, %s11134_s9 }
  0x29   : > { %p10816_p12 = scmp.ne.s32.totalorder %s11134_s9, %s10815_s6  ;;  %p10824_p4 = scmp.lt.s32.totalorder %s10815_s6, %s10815_s6 }
  0x2b   : > { %p10818_p13 = pnand %p10816_p12, %p11160_p7  ;;  %p10825_p6 = por %p10824_p4, %p10823_p1 }
  0x2d   : > { %p10819_p0 = pneg %p10818_p13 }
  0x2f   : > { %p10826_p8 = pnand %p10825_p6, %p10819_p0 }
  0x31   : > { %10829 = shalt.err (!%p10826_p8)
}
  0x32   : > { %s10965_s11 = smov 256   ;;  %s10966_s3 = smov 16  }
  0x33   : > { %10127 = dma.hbm_to_vmem [thread:$0]  (!%p11146_p5), %s13565_s2, 768, %s11134_s9, [#allocation6], %s10965_s11, %s10965_s11, %s10966_s3  }
  0x34   : > { %s10830_s8 = scalar_lea.hbm %s13522_s20, 16 }
  0x35   : > { %p10831_p9 = scmp.ne.s32.totalorder %s13522_s20, %s10830_s8  ;;  %p10837_p12 = scmp.lt.u32.totalorder %s10830_s8, %s13522_s20 }
  0x37   : > { %p10833_p10 = pnand %p10831_p9, %p11160_p7 }
  0x39   : > { %p10834_p11 = pneg %p10833_p10 }
  0x3b   : > { %p10839_p13 = pnand %p10837_p12, %p10834_p11 }
  0x3d   : > { %10842 = shalt.err (!%p10839_p13)
}
  0x3e   : > { %s10843_s9 = scalar_lea.vmem %s11142_s0, 16  ;;  %s10850_s24 = scalar_lea.vmem %s11142_s0, 32 }
  0x3f   : > { %p10844_p0 = scmp.ne.s32.totalorder %s11142_s0, %s10843_s9  ;;  %p10851_p6 = scmp.lt.s32.totalorder %s11142_s0, %s11142_s0 }
  0x40   : > { %p10852_p8 = scmp.lt.s32.totalorder %s10850_s24, %s10843_s9 }
  0x41   : > { %p10846_p1 = pnand %p10844_p0, %p11160_p7 }
  0x42   : > { %p10853_p9 = por %p10852_p8, %p10851_p6 }
  0x43   : > { %p10847_p4 = pneg %p10846_p1 }
  0x45   : > { %p10854_p10 = pnand %p10853_p9, %p10847_p4 }
  0x47   : > { %10857 = shalt.err (!%p10854_p10)
}
  0x48   : > { %10133 = dma.hbm_to_vmem [thread:$0]  (!%p11146_p5), %s13522_s20, 16, %s11142_s0, [#allocation9]  }
  0x49   : > { %s13567_s3 = sld [smem:[#allocation18_spill]] }
  0x4f   : > { %s10858_s7 = scalar_lea.hbm %s13567_s3, 256 }
  0x50   : > { %p10859_p11 = scmp.ne.s32.totalorder %s13567_s3, %s10858_s7  ;;  %p10865_p0 = scmp.lt.u32.totalorder %s10858_s7, %s13567_s3 }
  0x52   : > { %p10861_p12 = pnand %p10859_p11, %p11160_p7 }
  0x54   : > { %p10862_p13 = pneg %p10861_p12 }
  0x56   : > { %p10867_p1 = pnand %p10865_p0, %p10862_p13 }
  0x58   : > { %10870 = shalt.err (!%p10867_p1)
}
  0x59   : > { %s10871_s0 = scalar_lea.vmem %s11150_s1, 256  ;;  %p10879_p9 = scmp.lt.s32.totalorder %s11150_s1, %s11150_s1 }
  0x5a   : > { %p10872_p4 = scmp.ne.s32.totalorder %s11150_s1, %s10871_s0  ;;  %p10880_p10 = scmp.lt.s32.totalorder %s10871_s0, %s10871_s0 }
  0x5c   : > { %p10874_p6 = pnand %p10872_p4, %p11160_p7  ;;  %p10881_p11 = por %p10880_p10, %p10879_p9 }
  0x5e   : > { %p10875_p8 = pneg %p10874_p6 }
  0x60   : > { %p10882_p12 = pnand %p10881_p11, %p10875_p8 }
  0x62   : > { %10885 = shalt.err (!%p10882_p12)
}
  0x63   : > { %s10967_s9 = smov 128   ;;  %s10968_s24 = smov 8  }
  0x64   : > { %10124 = dma.hbm_to_vmem [thread:$0]  (!%p11146_p5), %s13567_s3, 256, %s11150_s1, [#allocation4], %s10967_s9, %s10967_s9, %s10968_s24  }
  0x65   : > { %s10969_s8 = smov [#allocation7]   ;;  %s10970_s7 = smov [#allocation10]  }
  0x66   : > { %s731_s11 = sshll.u32 %s10969_s8, 4  ;;  %s759_s4 = sshll.u32 %s10970_s7, 4  ;;  %s732_s11 = int_to_ptr.vmem [resolvable:$true] %s731_s11  ;;  %s11228_s4 = int_to_ptr.vmem [resolvable:$true] %s759_s4 }
  0x67   : > { %s10886_s6 = scalar_lea.hbm %s13520_s18, 16 }
  0x68   : > { %p10887_p13 = scmp.ne.s32.totalorder %s13520_s18, %s10886_s6  ;;  %p10893_p4 = scmp.lt.u32.totalorder %s10886_s6, %s13520_s18 }
  0x6a   : > { %p10889_p0 = pnand %p10887_p13, %p11160_p7 }
  0x6c   : > { %p10890_p1 = pneg %p10889_p0 }
  0x6e   : > { %p10895_p6 = pnand %p10893_p4, %p10890_p1 }
  0x70   : > { %10898 = shalt.err (!%p10895_p6)
}
  0x71   : > { %s10899_s9 = scalar_lea.vmem %s732_s11, 16  ;;  %s10906_s24 = scalar_lea.vmem %s732_s11, 32 }
  0x72   : > { %p10900_p8 = scmp.ne.s32.totalorder %s732_s11, %s10899_s9  ;;  %p10907_p11 = scmp.lt.s32.totalorder %s732_s11, %s732_s11 }
  0x73   : > { %p10908_p12 = scmp.lt.s32.totalorder %s10906_s24, %s10899_s9 }
  0x74   : > { %p10902_p9 = pnand %p10900_p8, %p11160_p7 }
  0x75   : > { %p10909_p2 = por %p10908_p12, %p10907_p11 }
  0x76   : > { %p10903_p10 = pneg %p10902_p9 }
  0x78   : > { %p10910_p3 = pnand %p10909_p2, %p10903_p10 }
  0x7a   : > { %10913 = shalt.err (!%p10910_p3)
}
  0x7b   : > { %10130 = dma.hbm_to_vmem [thread:$0]  (!%p11146_p5), %s13520_s18, 16, %s732_s11, [#allocation6]  }
  0x7c   : > { %s10914_s28 = scalar_lea.hbm %s13524_s22, 16 }
  0x7d   : > { %p10915_p13 = scmp.ne.s32.totalorder %s13524_s22, %s10914_s28  ;;  %p10921_p2 = scmp.lt.u32.totalorder %s10914_s28, %s13524_s22 }
  0x7f   : > { %p10917_p0 = pnand %p10915_p13, %p11160_p7 }
  0x81   : > { %p10918_p1 = pneg %p10917_p0 }
  0x83   : > { %p10923_p3 = pnand %p10921_p2, %p10918_p1 }
  0x85   : > { %10926 = shalt.err (!%p10923_p3)
}
  0x86   : > { %s10927_s11 = scalar_lea.vmem %s11228_s4, 16  ;;  %s10934_s1 = scalar_lea.vmem %s11228_s4, 32 }
  0x87   : > { %p10928_p4 = scmp.ne.s32.totalorder %s11228_s4, %s10927_s11  ;;  %p10935_p9 = scmp.lt.s32.totalorder %s11228_s4, %s11228_s4 }
  0x88   : > { %p10936_p10 = scmp.lt.s32.totalorder %s10934_s1, %s10927_s11 }
  0x89   : > { %p10930_p6 = pnand %p10928_p4, %p11160_p7 }
  0x8a   : > { %p10937_p11 = por %p10936_p10, %p10935_p9 }
  0x8b   : > { %p10931_p8 = pneg %p10930_p6 }
  0x8d   : > { %p10938_p12 = pnand %p10937_p11, %p10931_p8 }
  0x8f   : > { %10941 = shalt.err (!%p10938_p12)
}
  0x90   : > { %10136 = dma.hbm_to_vmem [thread:$0]  (!%p11146_p5), %s13524_s22, 16, %s11228_s4, [#allocation9]  }
  0x91   : > { %p13568_p13 = scmp.ne.s32.totalorder %s13563_s26, 0 }
  0x92   : > { %p13569_p7 = scmp.eq.s32.totalorder (!%p13568_p13), %s11129_s5, 0 }
  0x93   : > { %798 = sbr.rel (%p13568_p13) target bundleno = 4483 (0x1183), region = 128 }
  0x9a   : > { %10947 = dma.done.wait (%p13569_p7), [#allocation4], 256   ;;  %p13570_p0 = pmov %p13569_p7 }
  0x9c   : > { %10949 = vsyncadd (%p13570_p0), [#allocation4], 4294967040  ;;  %p13571_p1 = pmov %p13570_p0 }
  0x9d   : > { %p13572_p2 = pmov %p13570_p0 }
  0x9e   : > { %10951 = dma.done.wait (%p13571_p1), [#allocation6], 784  }
  0x9f   : > { %10953 = vsyncadd (%p13572_p2), [#allocation6], 4294966512  ;;  %p13573_p3 = pmov %p13570_p0 }
  0xa0   : > { %p13574_p5 = pmov %p13570_p0 }
  0xa1   : > { %10955 = dma.done.wait (%p13573_p3), [#allocation9], 32  }
  0xa2   : > { %10957 = vsyncadd (%p13574_p5), [#allocation9], 4294967264  ;;  %s13575_s30 = sld [smem:[#allocation17_spill]]  ;;  %p887_p4 = scmp.lt.s32.totalorder %s11129_s5, 1  ;;  %vm3022_vm0 = vcmask 588800   ;;  %vm4665_vm1 = vcmask 130048  }
  0xa3   : > { %s13576_s25 = sld [smem:[#allocation15_spill]]  ;;  %s13577_s6 = sld [smem:[#allocation19_spill]]  ;;  %vm4792_vm2 = vcmask 523264   ;;  %vm5527_vm3 = vcmask 719872   ;;  %vm6212_vm4 = vcmask 261120   ;;  %vm6441_vm5 = vcmask 1041408  }
  0xa4   : > { %s13591_s5 = smov (!%p887_p4, %s11129_s5), 1  ;;  %s13579_s10 = sld [smem:[#allocation22_spill]]  ;;  %vm10974_vm6 = vmmov 0   ;;  %vm6431_vm7 = vcmask 31744   ;;  %vm7038_vm8 = vcmask 392192   ;;  %vm7748_vm9 = vcmask 7168  }
  0xa5   : > { %s9049_s4 = sshll.u32 %s13591_s5, 4  ;;  %s13580_s29 = sld [smem:[#allocation25_spill]]  ;;  %vm7750_vm10 = vcmask 56320   ;;  %vm7752_vm11 = vcmask 318464  }
  0xa6   : > { %s13581_s1 = sld [smem:[#allocation23_spill]]  ;;  %s13583_s8 = sld [smem:[#allocation26_spill]] }
  0xa7   : > { %s13586_s3 = sld [smem:[#allocation28_spill]]  ;;  %s10976_s27 = smov 96  }
  0xa8   : > { %v10175_v1 = vld [vmem:[%s13575_s30 + $0x4] ss:$8 sps:$4 sm:$0xff]   ;;  %v10179_v3 = vld [vmem:[%s13575_s30] ss:$8 sps:$4 sm:$0xff]   ;;  %v10181_v5 = vld [vmem:[%s13575_s30 + $0x14] ss:$8 sps:$4 sm:$0xff]  }
  0xa9   : > { %v10177_v2 = vld [vmem:[%s13575_s30 + $0x104] ss:$8 sps:$4 sm:$0xff]   ;;  %1095 = vmatprep.subr.bf16.mxu0 %v10175_v1  ;;  %v10180_v4 = vld [vmem:[%s13575_s30 + $0x100] ss:$8 sps:$4 sm:$0xff]   ;;  %v10183_v6 = vld [vmem:[%s13575_s30 + $0x114] ss:$8 sps:$4 sm:$0xff]   ;;  %s11426_s11 = scalar_lea.vmem %s13576_s25, %s9049_s4 }
  0xaa   : > { %1329 = vmatprep.subr.bf16.mxu1 %v10177_v2  ;;  %1096 = vmatpush1.bf16.msra.mxu0 %v10179_v3  ;;  %v10185_v7 = vld [vmem:[%s13575_s30 + $0x10] ss:$8 sps:$4 sm:$0xff]   ;;  %v10187_v9 = vld [vmem:[%s13575_s30 + $0x24] ss:$8 sps:$4 sm:$0xff]   ;;  %v10191_v11 = vld [vmem:[%s13575_s30 + $0x20] ss:$8 sps:$4 sm:$0xff]  }
  0xab   : > { %1330 = vmatpush1.bf16.msra.mxu1 %v10180_v4  ;;  %1097 = vmatprep.subr.bf16.mxu0 %v10181_v5  ;;  %v10186_v8 = vld [vmem:[%s13575_s30 + $0x110] ss:$8 sps:$4 sm:$0xff]   ;;  %v10189_v10 = vld [vmem:[%s13575_s30 + $0x124] ss:$8 sps:$4 sm:$0xff]   ;;  %v10192_v12 = vld [vmem:[%s13575_s30 + $0x120] ss:$8 sps:$4 sm:$0xff]  }
  0xac   : > { %1331 = vmatprep.subr.bf16.mxu1 %v10183_v6  ;;  %v10193_v13 = vld [vmem:[%s13575_s30 + $0x34] ss:$8 sps:$4 sm:$0xff]   ;;  %v10197_v15 = vld [vmem:[%s13575_s30 + $0x30] ss:$8 sps:$4 sm:$0xff]   ;;  %v10199_v17 = vld [vmem:[%s13575_s30 + $0x44] ss:$8 sps:$4 sm:$0xff]   ;;  %s13584_s7 = smov %s13583_s8 }
  0xad   : > { %v10195_v14 = vld [vmem:[%s13575_s30 + $0x134] ss:$8 sps:$4 sm:$0xff]   ;;  %v10198_v16 = vld [vmem:[%s13575_s30 + $0x130] ss:$8 sps:$4 sm:$0xff]   ;;  %v10201_v18 = vld [vmem:[%s13575_s30 + $0x144] ss:$8 sps:$4 sm:$0xff]  }
  0xae   : > { %1098 = vmatpush1.bf16.msra.mxu0 %v10185_v7  ;;  %v10203_v19 = vld [vmem:[%s13575_s30 + $0x40] ss:$8 sps:$4 sm:$0xff]   ;;  %v10205_v21 = vld [vmem:[%s13575_s30 + $0x54] ss:$8 sps:$4 sm:$0xff]   ;;  %v10209_v23 = vld [vmem:[%s13575_s30 + $0x50] ss:$8 sps:$4 sm:$0xff]  }
  0xaf   : > { %1332 = vmatpush1.bf16.msra.mxu1 %v10186_v8  ;;  %1099 = vmatprep.subr.bf16.mxu0 %v10187_v9  ;;  %v10204_v20 = vld [vmem:[%s13575_s30 + $0x140] ss:$8 sps:$4 sm:$0xff]   ;;  %v10207_v22 = vld [vmem:[%s13575_s30 + $0x154] ss:$8 sps:$4 sm:$0xff]   ;;  %v10210_v24 = vld [vmem:[%s13575_s30 + $0x150] ss:$8 sps:$4 sm:$0xff]  }
  0xb0   : > { %1333 = vmatprep.subr.bf16.mxu1 %v10189_v10  ;;  %v10211_v25 = vld [vmem:[%s13575_s30 + $0x64] ss:$8 sps:$4 sm:$0xff]   ;;  %v10215_v27 = vld [vmem:[%s13575_s30 + $0x60] ss:$8 sps:$4 sm:$0xff]   ;;  %v10217_v29 = vld [vmem:[%s13575_s30 + $0x74] ss:$8 sps:$4 sm:$0xff]  }
  0xb1   : > { %v10213_v26 = vld [vmem:[%s13575_s30 + $0x164] ss:$8 sps:$4 sm:$0xff]   ;;  %v10216_v28 = vld [vmem:[%s13575_s30 + $0x160] ss:$8 sps:$4 sm:$0xff]   ;;  %v10219_v30 = vld [vmem:[%s13575_s30 + $0x174] ss:$8 sps:$4 sm:$0xff]  }
  0xb2   : > { %1100 = vmatpush1.bf16.msra.mxu0 %v10191_v11  ;;  %v10221_v31 = vld [vmem:[%s13575_s30 + $0x70] ss:$8 sps:$4 sm:$0xff]   ;;  %v10223_v33 = vld [vmem:[%s13575_s30 + $0x84] ss:$8 sps:$4 sm:$0xff]   ;;  %v10227_v35 = vld [vmem:[%s13575_s30 + $0x80] ss:$8 sps:$4 sm:$0xff]  }
  0xb3   : > { %1334 = vmatpush1.bf16.msra.mxu1 %v10192_v12  ;;  %1101 = vmatprep.subr.bf16.mxu0 %v10193_v13  ;;  %v10222_v32 = vld [vmem:[%s13575_s30 + $0x170] ss:$8 sps:$4 sm:$0xff]   ;;  %v10225_v34 = vld [vmem:[%s13575_s30 + $0x184] ss:$8 sps:$4 sm:$0xff]   ;;  %v10228_v36 = vld [vmem:[%s13575_s30 + $0x180] ss:$8 sps:$4 sm:$0xff]  }
  0xb4   : > { %1335 = vmatprep.subr.bf16.mxu1 %v10195_v14  ;;  %v10229_v37 = vld [vmem:[%s13575_s30 + $0x94] ss:$8 sps:$4 sm:$0xff]   ;;  %v10233_v39 = vld [vmem:[%s13575_s30 + $0x90] ss:$8 sps:$4 sm:$0xff]   ;;  %v10235_v41 = vld [vmem:[%s13575_s30 + $0xa4] ss:$8 sps:$4 sm:$0xff]  }
  0xb5   : > { %v10231_v38 = vld [vmem:[%s13575_s30 + $0x194] ss:$8 sps:$4 sm:$0xff]   ;;  %v10234_v40 = vld [vmem:[%s13575_s30 + $0x190] ss:$8 sps:$4 sm:$0xff]   ;;  %v10237_v42 = vld [vmem:[%s13575_s30 + $0x1a4] ss:$8 sps:$4 sm:$0xff]  }
  0xb6   : > { %1102 = vmatpush1.bf16.msra.mxu0 %v10197_v15  ;;  %v10239_v43 = vld [vmem:[%s13575_s30 + $0xa0] ss:$8 sps:$4 sm:$0xff]   ;;  %v10241_v45 = vld [vmem:[%s13575_s30 + $0xb4] ss:$8 sps:$4 sm:$0xff]   ;;  %v10245_v49 = vld [vmem:[%s13575_s30 + $0xb0] ss:$8 sps:$4 sm:$0xff]  }
  0xb7   : > { %1336 = vmatpush1.bf16.msra.mxu1 %v10198_v16  ;;  %1103 = vmatprep.subr.bf16.mxu0 %v10199_v17  ;;  %v10240_v44 = vld [vmem:[%s13575_s30 + $0x1a0] ss:$8 sps:$4 sm:$0xff]   ;;  %v10243_v46 = vld [vmem:[%s13575_s30 + $0x1b4] ss:$8 sps:$4 sm:$0xff]   ;;  %v10246_v50 = vld [vmem:[%s13575_s30 + $0x1b0] ss:$8 sps:$4 sm:$0xff]  }
  0xb8   : > { %1337 = vmatprep.subr.bf16.mxu1 %v10201_v18  ;;  %v900_v47 = vld [vmem:[%s11426_s11 + $0x8] sm:$0xff]  ;;  %v10253_v55 = vld [vmem:[%s13575_s30 + $0xd4] ss:$8 sps:$4 sm:$0xff]   ;;  %v10257_v57 = vld [vmem:[%s13575_s30 + $0xd0] ss:$8 sps:$4 sm:$0xff]   ;;  %s13582_s25 = sld [smem:[#allocation24_spill]] }
  0xb9   : > { %v11435_v48 = vpack.c.bf16 %v900_v47, %v900_v47  ;;  %v10247_v51 = vld [vmem:[%s13575_s30 + $0xc4] ss:$8 sps:$4 sm:$0xff]   ;;  %v10251_v53 = vld [vmem:[%s13575_s30 + $0xc0] ss:$8 sps:$4 sm:$0xff]   ;;  %v10255_v56 = vld [vmem:[%s13575_s30 + $0x1d4] ss:$8 sps:$4 sm:$0xff]  }
  0xba   : > { %1104 = vmatpush1.bf16.msra.mxu0 %v10203_v19  ;;  %v10249_v52 = vld [vmem:[%s13575_s30 + $0x1c4] ss:$8 sps:$4 sm:$0xff]   ;;  %v10252_v54 = vld [vmem:[%s13575_s30 + $0x1c0] ss:$8 sps:$4 sm:$0xff]   ;;  %v10258_v58 = vld [vmem:[%s13575_s30 + $0x1d0] ss:$8 sps:$4 sm:$0xff]  }
  0xbb   : > { %1338 = vmatpush1.bf16.msra.mxu1 %v10204_v20  ;;  %1105 = vmatprep.subr.bf16.mxu0 %v10205_v21  ;;  %v10259_v59 = vld [vmem:[%s13575_s30 + $0xe4] ss:$8 sps:$4 sm:$0xff]   ;;  %v10263_v61 = vld [vmem:[%s13575_s30 + $0xe0] ss:$8 sps:$4 sm:$0xff]   ;;  %v10265_v63 = vld [vmem:[%s13575_s30 + $0xf4] ss:$8 sps:$4 sm:$0xff]  }
  0xbc   : > { %1339 = vmatprep.subr.bf16.mxu1 %v10207_v22  ;;  %1127 = vmatprep.mubr.bf16.mxu0 %v11435_v48  ;;  %v10261_v60 = vld [vmem:[%s13575_s30 + $0x1e4] ss:$8 sps:$4 sm:$0xff]   ;;  %v10264_v62 = vld [vmem:[%s13575_s30 + $0x1e0] ss:$8 sps:$4 sm:$0xff]   ;;  %v10267_v0 = vld [vmem:[%s13575_s30 + $0x1f4] ss:$8 sps:$4 sm:$0xff]  }
  0xbd   : > { %1361 = vmatprep.mubr.bf16.mxu1 %v11435_v48  ;;  %v10269_v1 = vld [vmem:[%s13575_s30 + $0xf0] ss:$8 sps:$4 sm:$0xff]   ;;  %v899_v3 = vld [vmem:[%s11426_s11] sm:$0xff]  ;;  %v10279_v9 = vld [vmem:[%s13575_s30 + $0x214] ss:$8 sps:$4 sm:$0xff]   ;;  %s13578_s11 = sld [smem:[#allocation20_spill]] }
  0xbe   : > { %1106 = vmatpush1.bf16.msra.mxu0 %v10209_v23  ;;  %v10270_v2 = vld [vmem:[%s13575_s30 + $0x1f0] ss:$8 sps:$4 sm:$0xff]   ;;  %v10273_v4 = vld [vmem:[%s13575_s30 + $0x204] ss:$8 sps:$4 sm:$0xff]   ;;  %v11500_v6 = vpack.c.bf16 %v899_v3, %v899_v3  ;;  %v10271_v7 = vld [vmem:[%s13575_s30 + $0x200] ss:$8 sps:$4 sm:$0xff]  }
  0xbf   : > { %1340 = vmatpush1.bf16.msra.mxu1 %v10210_v24  ;;  %1107 = vmatprep.subr.bf16.mxu0 %v10211_v25  ;;  %v10276_v5 = vld [vmem:[%s13575_s30 + $0x304] ss:$8 sps:$4 sm:$0xff]   ;;  %v10274_v8 = vld [vmem:[%s13575_s30 + $0x300] ss:$8 sps:$4 sm:$0xff]   ;;  %v10282_v10 = vld [vmem:[%s13575_s30 + $0x314] ss:$8 sps:$4 sm:$0xff]  }
  0xc0   : > { %1341 = vmatprep.subr.bf16.mxu1 %v10213_v26  ;;  %v10277_v11 = vld [vmem:[%s13575_s30 + $0x210] ss:$8 sps:$4 sm:$0xff]   ;;  %v10285_v13 = vld [vmem:[%s13575_s30 + $0x224] ss:$8 sps:$4 sm:$0xff]   ;;  %v10283_v15 = vld [vmem:[%s13575_s30 + $0x220] ss:$8 sps:$4 sm:$0xff]  }
  0xc1   : > { %v10280_v12 = vld [vmem:[%s13575_s30 + $0x310] ss:$8 sps:$4 sm:$0xff]   ;;  %v10288_v14 = vld [vmem:[%s13575_s30 + $0x324] ss:$8 sps:$4 sm:$0xff]   ;;  %v10286_v16 = vld [vmem:[%s13575_s30 + $0x320] ss:$8 sps:$4 sm:$0xff]  }
  0xc2   : > { %1108 = vmatpush1.bf16.msra.mxu0 %v10215_v27  ;;  %v10291_v17 = vld [vmem:[%s13575_s30 + $0x234] ss:$8 sps:$4 sm:$0xff]   ;;  %v10289_v19 = vld [vmem:[%s13575_s30 + $0x230] ss:$8 sps:$4 sm:$0xff]   ;;  %v10297_v21 = vld [vmem:[%s13575_s30 + $0x244] ss:$8 sps:$4 sm:$0xff]  }
  0xc3   : > { %1342 = vmatpush1.bf16.msra.mxu1 %v10216_v28  ;;  %1109 = vmatprep.subr.bf16.mxu0 %v10217_v29  ;;  %v10294_v18 = vld [vmem:[%s13575_s30 + $0x334] ss:$8 sps:$4 sm:$0xff]   ;;  %v10292_v20 = vld [vmem:[%s13575_s30 + $0x330] ss:$8 sps:$4 sm:$0xff]   ;;  %v10300_v22 = vld [vmem:[%s13575_s30 + $0x344] ss:$8 sps:$4 sm:$0xff]  }
  0xc4   : > { %1343 = vmatprep.subr.bf16.mxu1 %v10219_v30  ;;  %v10295_v23 = vld [vmem:[%s13575_s30 + $0x240] ss:$8 sps:$4 sm:$0xff]   ;;  %v10303_v25 = vld [vmem:[%s13575_s30 + $0x254] ss:$8 sps:$4 sm:$0xff]   ;;  %v10301_v27 = vld [vmem:[%s13575_s30 + $0x250] ss:$8 sps:$4 sm:$0xff]  }
  0xc5   : > { %v10298_v24 = vld [vmem:[%s13575_s30 + $0x340] ss:$8 sps:$4 sm:$0xff]   ;;  %v10306_v26 = vld [vmem:[%s13575_s30 + $0x354] ss:$8 sps:$4 sm:$0xff]   ;;  %v10304_v28 = vld [vmem:[%s13575_s30 + $0x350] ss:$8 sps:$4 sm:$0xff]  }
  0xc6   : > { %1110 = vmatpush1.bf16.msra.mxu0 %v10221_v31  ;;  %v10309_v29 = vld [vmem:[%s13575_s30 + $0x264] ss:$8 sps:$4 sm:$0xff]   ;;  %v10307_v31 = vld [vmem:[%s13575_s30 + $0x260] ss:$8 sps:$4 sm:$0xff]   ;;  %v10366_v3 = vld [vmem:[%s13575_s30 + $0x3f4] ss:$8 sps:$4 sm:$0xff]  }
  0xc7   : > { %1344 = vmatpush1.bf16.msra.mxu1 %v10222_v32  ;;  %1111 = vmatprep.subr.bf16.mxu0 %v10223_v33  ;;  %v10312_v30 = vld [vmem:[%s13575_s30 + $0x364] ss:$8 sps:$4 sm:$0xff]   ;;  %v10310_v32 = vld [vmem:[%s13575_s30 + $0x360] ss:$8 sps:$4 sm:$0xff]   ;;  %v10315_v33 = vld [vmem:[%s13575_s30 + $0x274] ss:$8 sps:$4 sm:$0xff]  }
  0xc8   : > { %1345 = vmatprep.subr.bf16.mxu1 %v10225_v34  ;;  %v10318_v34 = vld [vmem:[%s13575_s30 + $0x374] ss:$8 sps:$4 sm:$0xff]   ;;  %v10331_v47 = vld [vmem:[%s13575_s30 + $0x2a0] ss:$8 sps:$4 sm:$0xff]   ;;  %s13587_s0 = sld [smem:[#allocation27_spill]]  ;;  %s10978_s9 = smov 1  }
  0xc9   : > { %s10979_s24 = smov 103   ;;  %s13588_s2 = sld [smem:[#allocation29_spill]] }
  0xca   : > { %1112 = vmatpush1.bf16.msra.mxu0 %v10227_v35  ;;  %v10313_v35 = vld [vmem:[%s13575_s30 + $0x270] ss:$8 sps:$4 sm:$0xff]  }
  0xcb   : > { %1346 = vmatpush1.bf16.msra.mxu1 %v10228_v36  ;;  %1113 = vmatprep.subr.bf16.mxu0 %v10229_v37  ;;  %v10316_v36 = vld [vmem:[%s13575_s30 + $0x370] ss:$8 sps:$4 sm:$0xff]   ;;  %v10321_v37 = vld [vmem:[%s13575_s30 + $0x284] ss:$8 sps:$4 sm:$0xff]  }
  0xcc   : > { %1347 = vmatprep.subr.bf16.mxu1 %v10231_v38  ;;  %v10324_v38 = vld [vmem:[%s13575_s30 + $0x384] ss:$8 sps:$4 sm:$0xff]  }
  0xce   : > { %1114 = vmatpush1.bf16.msra.mxu0 %v10233_v39  ;;  %v10319_v39 = vld [vmem:[%s13575_s30 + $0x280] ss:$8 sps:$4 sm:$0xff]  }
  0xcf   : > { %1348 = vmatpush1.bf16.msra.mxu1 %v10234_v40  ;;  %1115 = vmatprep.subr.bf16.mxu0 %v10235_v41  ;;  %v10322_v40 = vld [vmem:[%s13575_s30 + $0x380] ss:$8 sps:$4 sm:$0xff]   ;;  %v10327_v41 = vld [vmem:[%s13575_s30 + $0x294] ss:$8 sps:$4 sm:$0xff]  }
  0xd0   : > { %1349 = vmatprep.subr.bf16.mxu1 %v10237_v42  ;;  %v10330_v42 = vld [vmem:[%s13575_s30 + $0x394] ss:$8 sps:$4 sm:$0xff]  }
  0xd2   : > { %1116 = vmatpush1.bf16.msra.mxu0 %v10239_v43  ;;  %v10325_v43 = vld [vmem:[%s13575_s30 + $0x290] ss:$8 sps:$4 sm:$0xff]  }
  0xd3   : > { %1350 = vmatpush1.bf16.msra.mxu1 %v10240_v44  ;;  %1117 = vmatprep.subr.bf16.mxu0 %v10241_v45  ;;  %v10328_v44 = vld [vmem:[%s13575_s30 + $0x390] ss:$8 sps:$4 sm:$0xff]   ;;  %v10333_v45 = vld [vmem:[%s13575_s30 + $0x2a4] ss:$8 sps:$4 sm:$0xff]  }
  0xd4   : > { %1351 = vmatprep.subr.bf16.mxu1 %v10243_v46  ;;  %v10336_v46 = vld [vmem:[%s13575_s30 + $0x3a4] ss:$8 sps:$4 sm:$0xff]  }
  0xd6   : > { %1118 = vmatpush1.bf16.msra.mxu0 %v10245_v49  ;;  %v10334_v49 = vld [vmem:[%s13575_s30 + $0x3a0] ss:$8 sps:$4 sm:$0xff]  }
  0xd7   : > { %1352 = vmatpush1.bf16.msra.mxu1 %v10246_v50  ;;  %1119 = vmatprep.subr.bf16.mxu0 %v10247_v51  ;;  %v10339_v50 = vld [vmem:[%s13575_s30 + $0x2b4] ss:$8 sps:$4 sm:$0xff]  }
  0xd8   : > { %1353 = vmatprep.subr.bf16.mxu1 %v10249_v52  ;;  %v10342_v51 = vld [vmem:[%s13575_s30 + $0x3b4] ss:$8 sps:$4 sm:$0xff]   ;;  %v10337_v52 = vld [vmem:[%s13575_s30 + $0x2b0] ss:$8 sps:$4 sm:$0xff]  }
  0xda   : > { %1120 = vmatpush1.bf16.msra.mxu0 %v10251_v53  ;;  %v10340_v53 = vld [vmem:[%s13575_s30 + $0x3b0] ss:$8 sps:$4 sm:$0xff]  }
  0xdb   : > { %1354 = vmatpush1.bf16.msra.mxu1 %v10252_v54  ;;  %1121 = vmatprep.subr.bf16.mxu0 %v10253_v55  ;;  %v10345_v54 = vld [vmem:[%s13575_s30 + $0x2c4] ss:$8 sps:$4 sm:$0xff]  }
  0xdc   : > { %1355 = vmatprep.subr.bf16.mxu1 %v10255_v56  ;;  %v10348_v55 = vld [vmem:[%s13575_s30 + $0x3c4] ss:$8 sps:$4 sm:$0xff]   ;;  %v10343_v56 = vld [vmem:[%s13575_s30 + $0x2c0] ss:$8 sps:$4 sm:$0xff]  }
  0xde   : > { %1122 = vmatpush1.bf16.msra.mxu0 %v10257_v57  ;;  %v10346_v57 = vld [vmem:[%s13575_s30 + $0x3c0] ss:$8 sps:$4 sm:$0xff]  }
  0xdf   : > { %1356 = vmatpush1.bf16.msra.mxu1 %v10258_v58  ;;  %1123 = vmatprep.subr.bf16.mxu0 %v10259_v59  ;;  %v10351_v58 = vld [vmem:[%s13575_s30 + $0x2d4] ss:$8 sps:$4 sm:$0xff]  }
  0xe0   : > { %1357 = vmatprep.subr.bf16.mxu1 %v10261_v60  ;;  %v10354_v59 = vld [vmem:[%s13575_s30 + $0x3d4] ss:$8 sps:$4 sm:$0xff]   ;;  %v10349_v60 = vld [vmem:[%s13575_s30 + $0x2d0] ss:$8 sps:$4 sm:$0xff]  }
  0xe2   : > { %1124 = vmatpush1.bf16.msra.mxu0 %v10263_v61  ;;  %v10352_v61 = vld [vmem:[%s13575_s30 + $0x3d0] ss:$8 sps:$4 sm:$0xff]  }
  0xe3   : > { %1358 = vmatpush1.bf16.msra.mxu1 %v10264_v62  ;;  %1125 = vmatprep.subr.bf16.mxu0 %v10265_v63  ;;  %v10357_v62 = vld [vmem:[%s13575_s30 + $0x2e4] ss:$8 sps:$4 sm:$0xff]  }
  0xe4   : > { %1359 = vmatprep.subr.bf16.mxu1 %v10267_v0  ;;  %v10360_v63 = vld [vmem:[%s13575_s30 + $0x3e4] ss:$8 sps:$4 sm:$0xff]   ;;  %v10355_v0 = vld [vmem:[%s13575_s30 + $0x2e0] ss:$8 sps:$4 sm:$0xff]  }
  0xe6   : > { %1126 = vmatpush1.bf16.msra.mxu0 %v10269_v1  ;;  %v10358_v1 = vld [vmem:[%s13575_s30 + $0x3e0] ss:$8 sps:$4 sm:$0xff]  }
  0xe7   : > { %1360 = vmatpush1.bf16.msra.mxu1 %v10270_v2  ;;  %1563 = vmatprep.subr.bf16.mxu0 %v10273_v4  ;;  %v10363_v2 = vld [vmem:[%s13575_s30 + $0x2f4] ss:$8 sps:$4 sm:$0xff]   ;;  %v10361_v4 = vld [vmem:[%s13575_s30 + $0x2f0] ss:$8 sps:$4 sm:$0xff]  }
  0xe8   : > { %1797 = vmatprep.subr.bf16.mxu1 %v10276_v5  ;;  %v10364_v5 = vld [vmem:[%s13575_s30 + $0x3f0] ss:$8 sps:$4 sm:$0xff]  }
  0xe9   : > { %1128 = vmatmul.mubr.bf16.vlgmr.msra.gmra.mrb[0].mxu0 %v11500_v6 }
  0xea   : > { %1362 = vmatmul.mubr.bf16.vlgmr.msra.gmra.mrb[0].mxu1 %v11500_v6  ;;  %1564 = vmatpush1.bf16.msra.mxu0 %v10271_v7  ;;  %v10369_v7 = vld [vmem:[%s13575_s30 + $0x404] ss:$8 sps:$4 sm:$0xff]  }
  0xeb   : > { %1798 = vmatpush1.bf16.msra.mxu1 %v10274_v8  ;;  %1565 = vmatprep.subr.bf16.mxu0 %v10279_v9  ;;  %v10372_v8 = vld [vmem:[%s13575_s30 + $0x504] ss:$8 sps:$4 sm:$0xff]   ;;  %v10367_v9 = vld [vmem:[%s13575_s30 + $0x400] ss:$8 sps:$4 sm:$0xff]  }
  0xec   : > { %1799 = vmatprep.subr.bf16.mxu1 %v10282_v10  ;;  %1595 = vmatprep.mubr.bf16.mxu0 %v11435_v48  ;;  %v10370_v10 = vld [vmem:[%s13575_s30 + $0x500] ss:$8 sps:$4 sm:$0xff]  }
  0xed   : > { %1829 = vmatprep.mubr.bf16.mxu1 %v11435_v48 }
  0xee   : > { %1566 = vmatpush1.bf16.msra.mxu0 %v10277_v11  ;;  %v10375_v11 = vld [vmem:[%s13575_s30 + $0x414] ss:$8 sps:$4 sm:$0xff]  }
  0xef   : > { %1800 = vmatpush1.bf16.msra.mxu1 %v10280_v12  ;;  %1567 = vmatprep.subr.bf16.mxu0 %v10285_v13  ;;  %v10378_v12 = vld [vmem:[%s13575_s30 + $0x514] ss:$8 sps:$4 sm:$0xff]   ;;  %v10373_v13 = vld [vmem:[%s13575_s30 + $0x410] ss:$8 sps:$4 sm:$0xff]  }
  0xf0   : > { %1801 = vmatprep.subr.bf16.mxu1 %v10288_v14  ;;  %v10376_v14 = vld [vmem:[%s13575_s30 + $0x510] ss:$8 sps:$4 sm:$0xff]  }
  0xf2   : > { %1568 = vmatpush1.bf16.msra.mxu0 %v10283_v15  ;;  %v10381_v15 = vld [vmem:[%s13575_s30 + $0x424] ss:$8 sps:$4 sm:$0xff]  }
  0xf3   : > { %1802 = vmatpush1.bf16.msra.mxu1 %v10286_v16  ;;  %1569 = vmatprep.subr.bf16.mxu0 %v10291_v17  ;;  %v10384_v16 = vld [vmem:[%s13575_s30 + $0x524] ss:$8 sps:$4 sm:$0xff]   ;;  %v10379_v17 = vld [vmem:[%s13575_s30 + $0x420] ss:$8 sps:$4 sm:$0xff]  }
  0xf4   : > { %1803 = vmatprep.subr.bf16.mxu1 %v10294_v18  ;;  %v10382_v18 = vld [vmem:[%s13575_s30 + $0x520] ss:$8 sps:$4 sm:$0xff]  }
  0xf6   : > { %1570 = vmatpush1.bf16.msra.mxu0 %v10289_v19  ;;  %v10387_v19 = vld [vmem:[%s13575_s30 + $0x434] ss:$8 sps:$4 sm:$0xff]  }
  0xf7   : > { %1804 = vmatpush1.bf16.msra.mxu1 %v10292_v20  ;;  %1571 = vmatprep.subr.bf16.mxu0 %v10297_v21  ;;  %v10390_v20 = vld [vmem:[%s13575_s30 + $0x534] ss:$8 sps:$4 sm:$0xff]   ;;  %v10385_v21 = vld [vmem:[%s13575_s30 + $0x430] ss:$8 sps:$4 sm:$0xff]  }
  0xf8   : > { %1805 = vmatprep.subr.bf16.mxu1 %v10300_v22  ;;  %v10388_v22 = vld [vmem:[%s13575_s30 + $0x530] ss:$8 sps:$4 sm:$0xff]  }
  0xfa   : > { %1572 = vmatpush1.bf16.msra.mxu0 %v10295_v23  ;;  %v10393_v23 = vld [vmem:[%s13575_s30 + $0x444] ss:$8 sps:$4 sm:$0xff]  }
  0xfb   : > { %1806 = vmatpush1.bf16.msra.mxu1 %v10298_v24  ;;  %1573 = vmatprep.subr.bf16.mxu0 %v10303_v25  ;;  %v10396_v24 = vld [vmem:[%s13575_s30 + $0x544] ss:$8 sps:$4 sm:$0xff]   ;;  %v10391_v25 = vld [vmem:[%s13575_s30 + $0x440] ss:$8 sps:$4 sm:$0xff]  }
  0xfc   : > { %1807 = vmatprep.subr.bf16.mxu1 %v10306_v26  ;;  %v10394_v26 = vld [vmem:[%s13575_s30 + $0x540] ss:$8 sps:$4 sm:$0xff]  }
  0xfe   : > { %1574 = vmatpush1.bf16.msra.mxu0 %v10301_v27  ;;  %v10399_v27 = vld [vmem:[%s13575_s30 + $0x454] ss:$8 sps:$4 sm:$0xff]  }
  0xff   : > { %1808 = vmatpush1.bf16.msra.mxu1 %v10304_v28  ;;  %1575 = vmatprep.subr.bf16.mxu0 %v10309_v29  ;;  %v10402_v28 = vld [vmem:[%s13575_s30 + $0x554] ss:$8 sps:$4 sm:$0xff]   ;;  %v10397_v29 = vld [vmem:[%s13575_s30 + $0x450] ss:$8 sps:$4 sm:$0xff]  }
 0x100   : > { %1809 = vmatprep.subr.bf16.mxu1 %v10312_v30  ;;  %v10400_v30 = vld [vmem:[%s13575_s30 + $0x550] ss:$8 sps:$4 sm:$0xff]  }
 0x102   : > { %1576 = vmatpush1.bf16.msra.mxu0 %v10307_v31  ;;  %v10405_v31 = vld [vmem:[%s13575_s30 + $0x464] ss:$8 sps:$4 sm:$0xff]  }
 0x103   : > { %1810 = vmatpush1.bf16.msra.mxu1 %v10310_v32  ;;  %1577 = vmatprep.subr.bf16.mxu0 %v10315_v33  ;;  %v10408_v32 = vld [vmem:[%s13575_s30 + $0x564] ss:$8 sps:$4 sm:$0xff]   ;;  %v10403_v33 = vld [vmem:[%s13575_s30 + $0x460] ss:$8 sps:$4 sm:$0xff]  }
 0x104   : > { %1811 = vmatprep.subr.bf16.mxu1 %v10318_v34  ;;  %v10406_v34 = vld [vmem:[%s13575_s30 + $0x560] ss:$8 sps:$4 sm:$0xff]  }
 0x106   : > { %1578 = vmatpush1.bf16.msra.mxu0 %v10313_v35  ;;  %v10411_v35 = vld [vmem:[%s13575_s30 + $0x474] ss:$8 sps:$4 sm:$0xff]  }
 0x107   : > { %1812 = vmatpush1.bf16.msra.mxu1 %v10316_v36  ;;  %1579 = vmatprep.subr.bf16.mxu0 %v10321_v37  ;;  %v10414_v36 = vld [vmem:[%s13575_s30 + $0x574] ss:$8 sps:$4 sm:$0xff]   ;;  %v10409_v37 = vld [vmem:[%s13575_s30 + $0x470] ss:$8 sps:$4 sm:$0xff]  }
 0x108   : > { %1813 = vmatprep.subr.bf16.mxu1 %v10324_v38  ;;  %v10412_v38 = vld [vmem:[%s13575_s30 + $0x570] ss:$8 sps:$4 sm:$0xff]  }
 0x10a   : > { %1580 = vmatpush1.bf16.msra.mxu0 %v10319_v39  ;;  %v10417_v39 = vld [vmem:[%s13575_s30 + $0x484] ss:$8 sps:$4 sm:$0xff]  }
 0x10b   : > { %1814 = vmatpush1.bf16.msra.mxu1 %v10322_v40  ;;  %1581 = vmatprep.subr.bf16.mxu0 %v10327_v41  ;;  %v10420_v40 = vld [vmem:[%s13575_s30 + $0x584] ss:$8 sps:$4 sm:$0xff]   ;;  %v10415_v41 = vld [vmem:[%s13575_s30 + $0x480] ss:$8 sps:$4 sm:$0xff]  }
 0x10c   : > { %1815 = vmatprep.subr.bf16.mxu1 %v10330_v42  ;;  %v10418_v42 = vld [vmem:[%s13575_s30 + $0x580] ss:$8 sps:$4 sm:$0xff]  }
 0x10e   : > { %1582 = vmatpush1.bf16.msra.mxu0 %v10325_v43  ;;  %v10423_v43 = vld [vmem:[%s13575_s30 + $0x494] ss:$8 sps:$4 sm:$0xff]  }
 0x10f   : > { %1816 = vmatpush1.bf16.msra.mxu1 %v10328_v44  ;;  %1583 = vmatprep.subr.bf16.mxu0 %v10333_v45  ;;  %v10426_v44 = vld [vmem:[%s13575_s30 + $0x594] ss:$8 sps:$4 sm:$0xff]   ;;  %v10421_v45 = vld [vmem:[%s13575_s30 + $0x490] ss:$8 sps:$4 sm:$0xff]  }
 0x110   : > { %1817 = vmatprep.subr.bf16.mxu1 %v10336_v46  ;;  %v10424_v46 = vld [vmem:[%s13575_s30 + $0x590] ss:$8 sps:$4 sm:$0xff]  }
 0x112   : > { %1584 = vmatpush1.bf16.msra.mxu0 %v10331_v47  ;;  %v10429_v47 = vld [vmem:[%s13575_s30 + $0x4a4] ss:$8 sps:$4 sm:$0xff]  }
 0x113   : > { %1818 = vmatpush1.bf16.msra.mxu1 %v10334_v49  ;;  %1585 = vmatprep.subr.bf16.mxu0 %v10339_v50  ;;  %v10432_v49 = vld [vmem:[%s13575_s30 + $0x5a4] ss:$8 sps:$4 sm:$0xff]   ;;  %v10427_v50 = vld [vmem:[%s13575_s30 + $0x4a0] ss:$8 sps:$4 sm:$0xff]  }
 0x114   : > { %1819 = vmatprep.subr.bf16.mxu1 %v10342_v51  ;;  %v10430_v51 = vld [vmem:[%s13575_s30 + $0x5a0] ss:$8 sps:$4 sm:$0xff]  }
 0x116   : > { %1586 = vmatpush1.bf16.msra.mxu0 %v10337_v52  ;;  %v10435_v52 = vld [vmem:[%s13575_s30 + $0x4b4] ss:$8 sps:$4 sm:$0xff]  }
 0x117   : > { %1820 = vmatpush1.bf16.msra.mxu1 %v10340_v53  ;;  %1587 = vmatprep.subr.bf16.mxu0 %v10345_v54  ;;  %v10438_v53 = vld [vmem:[%s13575_s30 + $0x5b4] ss:$8 sps:$4 sm:$0xff]   ;;  %v10433_v54 = vld [vmem:[%s13575_s30 + $0x4b0] ss:$8 sps:$4 sm:$0xff]  }
 0x118   : > { %1821 = vmatprep.subr.bf16.mxu1 %v10348_v55  ;;  %v10436_v55 = vld [vmem:[%s13575_s30 + $0x5b0] ss:$8 sps:$4 sm:$0xff]  }
 0x11a   : > { %1588 = vmatpush1.bf16.msra.mxu0 %v10343_v56  ;;  %v10441_v56 = vld [vmem:[%s13575_s30 + $0x4c4] ss:$8 sps:$4 sm:$0xff]  }
 0x11b   : > { %1822 = vmatpush1.bf16.msra.mxu1 %v10346_v57  ;;  %1589 = vmatprep.subr.bf16.mxu0 %v10351_v58  ;;  %v10444_v57 = vld [vmem:[%s13575_s30 + $0x5c4] ss:$8 sps:$4 sm:$0xff]   ;;  %v10439_v58 = vld [vmem:[%s13575_s30 + $0x4c0] ss:$8 sps:$4 sm:$0xff]  }
 0x11c   : > { %1823 = vmatprep.subr.bf16.mxu1 %v10354_v59  ;;  %v10442_v59 = vld [vmem:[%s13575_s30 + $0x5c0] ss:$8 sps:$4 sm:$0xff]  }
 0x11e   : > { %1590 = vmatpush1.bf16.msra.mxu0 %v10349_v60  ;;  %v10447_v60 = vld [vmem:[%s13575_s30 + $0x4d4] ss:$8 sps:$4 sm:$0xff]  }
 0x11f   : > { %1824 = vmatpush1.bf16.msra.mxu1 %v10352_v61  ;;  %1591 = vmatprep.subr.bf16.mxu0 %v10357_v62  ;;  %v10450_v61 = vld [vmem:[%s13575_s30 + $0x5d4] ss:$8 sps:$4 sm:$0xff]   ;;  %v10445_v62 = vld [vmem:[%s13575_s30 + $0x4d0] ss:$8 sps:$4 sm:$0xff]  }
 0x120   : > { %1825 = vmatprep.subr.bf16.mxu1 %v10360_v63  ;;  %v10448_v63 = vld [vmem:[%s13575_s30 + $0x5d0] ss:$8 sps:$4 sm:$0xff]  }
 0x122   : > { %1592 = vmatpush1.bf16.msra.mxu0 %v10355_v0  ;;  %v10453_v0 = vld [vmem:[%s13575_s30 + $0x4e4] ss:$8 sps:$4 sm:$0xff]  }
 0x123   : > { %1826 = vmatpush1.bf16.msra.mxu1 %v10358_v1  ;;  %1593 = vmatprep.subr.bf16.mxu0 %v10363_v2  ;;  %v10456_v1 = vld [vmem:[%s13575_s30 + $0x5e4] ss:$8 sps:$4 sm:$0xff]   ;;  %v10451_v2 = vld [vmem:[%s13575_s30 + $0x4e0] ss:$8 sps:$4 sm:$0xff]  }
 0x124   : > { %1827 = vmatprep.subr.bf16.mxu1 %v10366_v3  ;;  %v10454_v3 = vld [vmem:[%s13575_s30 + $0x5e0] ss:$8 sps:$4 sm:$0xff]  }
 0x126   : > { %1594 = vmatpush1.bf16.msra.mxu0 %v10361_v4  ;;  %v10459_v4 = vld [vmem:[%s13575_s30 + $0x4f4] ss:$8 sps:$4 sm:$0xff]  }
 0x127   : > { %1828 = vmatpush1.bf16.msra.mxu1 %v10364_v5  ;;  %2031 = vmatprep.subr.bf16.mxu0 %v10369_v7  ;;  %v10462_v5 = vld [vmem:[%s13575_s30 + $0x5f4] ss:$8 sps:$4 sm:$0xff]   ;;  %v10457_v7 = vld [vmem:[%s13575_s30 + $0x4f0] ss:$8 sps:$4 sm:$0xff]  }
 0x128   : > { %2265 = vmatprep.subr.bf16.mxu1 %v10372_v8  ;;  %v10460_v8 = vld [vmem:[%s13575_s30 + $0x5f0] ss:$8 sps:$4 sm:$0xff]  }
 0x129   : > { %1596 = vmatmul.mubr.bf16.vlgmr.msra.gmra.mrb[4].mxu0 %v11500_v6 }
 0x12a   : > { %1830 = vmatmul.mubr.bf16.vlgmr.msra.gmra.mrb[4].mxu1 %v11500_v6  ;;  %2032 = vmatpush1.bf16.msra.mxu0 %v10367_v9  ;;  %v10465_v9 = vld [vmem:[%s13575_s30 + $0x604] ss:$8 sps:$4 sm:$0xff]  }
 0x12b   : > { %2266 = vmatpush1.bf16.msra.mxu1 %v10370_v10  ;;  %2033 = vmatprep.subr.bf16.mxu0 %v10375_v11  ;;  %v10468_v10 = vld [vmem:[%s13575_s30 + $0x704] ss:$8 sps:$4 sm:$0xff]   ;;  %v10463_v11 = vld [vmem:[%s13575_s30 + $0x600] ss:$8 sps:$4 sm:$0xff]  }
 0x12c   : > { %2267 = vmatprep.subr.bf16.mxu1 %v10378_v12  ;;  %2063 = vmatprep.mubr.bf16.mxu0 %v11435_v48  ;;  %v10466_v12 = vld [vmem:[%s13575_s30 + $0x700] ss:$8 sps:$4 sm:$0xff]  }
 0x12d   : > { %2297 = vmatprep.mubr.bf16.mxu1 %v11435_v48 }
 0x12e   : > { %2034 = vmatpush1.bf16.msra.mxu0 %v10373_v13  ;;  %v10471_v13 = vld [vmem:[%s13575_s30 + $0x614] ss:$8 sps:$4 sm:$0xff]  }
 0x12f   : > { %2268 = vmatpush1.bf16.msra.mxu1 %v10376_v14  ;;  %2035 = vmatprep.subr.bf16.mxu0 %v10381_v15  ;;  %v10474_v14 = vld [vmem:[%s13575_s30 + $0x714] ss:$8 sps:$4 sm:$0xff]   ;;  %v10469_v15 = vld [vmem:[%s13575_s30 + $0x610] ss:$8 sps:$4 sm:$0xff]  }
 0x130   : > { %2269 = vmatprep.subr.bf16.mxu1 %v10384_v16  ;;  %v10472_v16 = vld [vmem:[%s13575_s30 + $0x710] ss:$8 sps:$4 sm:$0xff]  }
 0x132   : > { %2036 = vmatpush1.bf16.msra.mxu0 %v10379_v17  ;;  %v10477_v17 = vld [vmem:[%s13575_s30 + $0x624] ss:$8 sps:$4 sm:$0xff]  }
 0x133   : > { %2270 = vmatpush1.bf16.msra.mxu1 %v10382_v18  ;;  %2037 = vmatprep.subr.bf16.mxu0 %v10387_v19  ;;  %v10480_v18 = vld [vmem:[%s13575_s30 + $0x724] ss:$8 sps:$4 sm:$0xff]   ;;  %v10475_v19 = vld [vmem:[%s13575_s30 + $0x620] ss:$8 sps:$4 sm:$0xff]  }
 0x134   : > { %2271 = vmatprep.subr.bf16.mxu1 %v10390_v20  ;;  %v10478_v20 = vld [vmem:[%s13575_s30 + $0x720] ss:$8 sps:$4 sm:$0xff]  }
 0x136   : > { %2038 = vmatpush1.bf16.msra.mxu0 %v10385_v21  ;;  %v10483_v21 = vld [vmem:[%s13575_s30 + $0x634] ss:$8 sps:$4 sm:$0xff]  }
 0x137   : > { %2272 = vmatpush1.bf16.msra.mxu1 %v10388_v22  ;;  %2039 = vmatprep.subr.bf16.mxu0 %v10393_v23  ;;  %v10486_v22 = vld [vmem:[%s13575_s30 + $0x734] ss:$8 sps:$4 sm:$0xff]   ;;  %v10481_v23 = vld [vmem:[%s13575_s30 + $0x630] ss:$8 sps:$4 sm:$0xff]  }
 0x138   : > { %2273 = vmatprep.subr.bf16.mxu1 %v10396_v24  ;;  %v10484_v24 = vld [vmem:[%s13575_s30 + $0x730] ss:$8 sps:$4 sm:$0xff]  }
 0x13a   : > { %2040 = vmatpush1.bf16.msra.mxu0 %v10391_v25  ;;  %v10489_v25 = vld [vmem:[%s13575_s30 + $0x644] ss:$8 sps:$4 sm:$0xff]  }
 0x13b   : > { %2274 = vmatpush1.bf16.msra.mxu1 %v10394_v26  ;;  %2041 = vmatprep.subr.bf16.mxu0 %v10399_v27  ;;  %v10492_v26 = vld [vmem:[%s13575_s30 + $0x744] ss:$8 sps:$4 sm:$0xff]   ;;  %v10487_v27 = vld [vmem:[%s13575_s30 + $0x640] ss:$8 sps:$4 sm:$0xff]  }
 0x13c   : > { %2275 = vmatprep.subr.bf16.mxu1 %v10402_v28  ;;  %v10490_v28 = vld [vmem:[%s13575_s30 + $0x740] ss:$8 sps:$4 sm:$0xff]  }
 0x13e   : > { %2042 = vmatpush1.bf16.msra.mxu0 %v10397_v29  ;;  %v10495_v29 = vld [vmem:[%s13575_s30 + $0x654] ss:$8 sps:$4 sm:$0xff]  }
 0x13f   : > { %2276 = vmatpush1.bf16.msra.mxu1 %v10400_v30  ;;  %2043 = vmatprep.subr.bf16.mxu0 %v10405_v31  ;;  %v10498_v30 = vld [vmem:[%s13575_s30 + $0x754] ss:$8 sps:$4 sm:$0xff]   ;;  %v10493_v31 = vld [vmem:[%s13575_s30 + $0x650] ss:$8 sps:$4 sm:$0xff]  }
 0x140   : > { %2277 = vmatprep.subr.bf16.mxu1 %v10408_v32  ;;  %v10496_v32 = vld [vmem:[%s13575_s30 + $0x750] ss:$8 sps:$4 sm:$0xff]  }
 0x142   : > { %2044 = vmatpush1.bf16.msra.mxu0 %v10403_v33  ;;  %v10501_v33 = vld [vmem:[%s13575_s30 + $0x664] ss:$8 sps:$4 sm:$0xff]  }
 0x143   : > { %2278 = vmatpush1.bf16.msra.mxu1 %v10406_v34  ;;  %2045 = vmatprep.subr.bf16.mxu0 %v10411_v35  ;;  %v10504_v34 = vld [vmem:[%s13575_s30 + $0x764] ss:$8 sps:$4 sm:$0xff]   ;;  %v10499_v35 = vld [vmem:[%s13575_s30 + $0x660] ss:$8 sps:$4 sm:$0xff]  }
 0x144   : > { %2279 = vmatprep.subr.bf16.mxu1 %v10414_v36  ;;  %v10502_v36 = vld [vmem:[%s13575_s30 + $0x760] ss:$8 sps:$4 sm:$0xff]  }
 0x146   : > { %2046 = vmatpush1.bf16.msra.mxu0 %v10409_v37  ;;  %v10507_v37 = vld [vmem:[%s13575_s30 + $0x674] ss:$8 sps:$4 sm:$0xff]  }
 0x147   : > { %2280 = vmatpush1.bf16.msra.mxu1 %v10412_v38  ;;  %2047 = vmatprep.subr.bf16.mxu0 %v10417_v39  ;;  %v10510_v38 = vld [vmem:[%s13575_s30 + $0x774] ss:$8 sps:$4 sm:$0xff]   ;;  %v10505_v39 = vld [vmem:[%s13575_s30 + $0x670] ss:$8 sps:$4 sm:$0xff]  }
 0x148   : > { %2281 = vmatprep.subr.bf16.mxu1 %v10420_v40  ;;  %v10508_v40 = vld [vmem:[%s13575_s30 + $0x770] ss:$8 sps:$4 sm:$0xff]  }
 0x14a   : > { %2048 = vmatpush1.bf16.msra.mxu0 %v10415_v41  ;;  %v10513_v41 = vld [vmem:[%s13575_s30 + $0x684] ss:$8 sps:$4 sm:$0xff]  }
 0x14b   : > { %2282 = vmatpush1.bf16.msra.mxu1 %v10418_v42  ;;  %2049 = vmatprep.subr.bf16.mxu0 %v10423_v43  ;;  %v10516_v42 = vld [vmem:[%s13575_s30 + $0x784] ss:$8 sps:$4 sm:$0xff]   ;;  %v10511_v43 = vld [vmem:[%s13575_s30 + $0x680] ss:$8 sps:$4 sm:$0xff]  }
 0x14c   : > { %2283 = vmatprep.subr.bf16.mxu1 %v10426_v44  ;;  %v10514_v44 = vld [vmem:[%s13575_s30 + $0x780] ss:$8 sps:$4 sm:$0xff]  }
 0x14e   : > { %2050 = vmatpush1.bf16.msra.mxu0 %v10421_v45  ;;  %v10519_v45 = vld [vmem:[%s13575_s30 + $0x694] ss:$8 sps:$4 sm:$0xff]  }
 0x14f   : > { %2284 = vmatpush1.bf16.msra.mxu1 %v10424_v46  ;;  %2051 = vmatprep.subr.bf16.mxu0 %v10429_v47  ;;  %v10522_v46 = vld [vmem:[%s13575_s30 + $0x794] ss:$8 sps:$4 sm:$0xff]   ;;  %v10517_v47 = vld [vmem:[%s13575_s30 + $0x690] ss:$8 sps:$4 sm:$0xff]  }
 0x150   : > { %2285 = vmatprep.subr.bf16.mxu1 %v10432_v49  ;;  %v10520_v49 = vld [vmem:[%s13575_s30 + $0x790] ss:$8 sps:$4 sm:$0xff]  }
 0x152   : > { %2052 = vmatpush1.bf16.msra.mxu0 %v10427_v50  ;;  %v10525_v50 = vld [vmem:[%s13575_s30 + $0x6a4] ss:$8 sps:$4 sm:$0xff]  }
 0x153   : > { %2286 = vmatpush1.bf16.msra.mxu1 %v10430_v51  ;;  %2053 = vmatprep.subr.bf16.mxu0 %v10435_v52  ;;  %v10528_v51 = vld [vmem:[%s13575_s30 + $0x7a4] ss:$8 sps:$4 sm:$0xff]   ;;  %v10523_v52 = vld [vmem:[%s13575_s30 + $0x6a0] ss:$8 sps:$4 sm:$0xff]  }
 0x154   : > { %2287 = vmatprep.subr.bf16.mxu1 %v10438_v53  ;;  %v10526_v53 = vld [vmem:[%s13575_s30 + $0x7a0] ss:$8 sps:$4 sm:$0xff]  }
 0x156   : > { %2054 = vmatpush1.bf16.msra.mxu0 %v10433_v54  ;;  %v10531_v54 = vld [vmem:[%s13575_s30 + $0x6b4] ss:$8 sps:$4 sm:$0xff]  }
 0x157   : > { %2288 = vmatpush1.bf16.msra.mxu1 %v10436_v55  ;;  %2055 = vmatprep.subr.bf16.mxu0 %v10441_v56  ;;  %v10534_v55 = vld [vmem:[%s13575_s30 + $0x7b4] ss:$8 sps:$4 sm:$0xff]   ;;  %v10529_v56 = vld [vmem:[%s13575_s30 + $0x6b0] ss:$8 sps:$4 sm:$0xff]  }
 0x158   : > { %2289 = vmatprep.subr.bf16.mxu1 %v10444_v57  ;;  %v10532_v57 = vld [vmem:[%s13575_s30 + $0x7b0] ss:$8 sps:$4 sm:$0xff]  }
 0x15a   : > { %2056 = vmatpush1.bf16.msra.mxu0 %v10439_v58  ;;  %v10537_v58 = vld [vmem:[%s13575_s30 + $0x6c4] ss:$8 sps:$4 sm:$0xff]  }
 0x15b   : > { %2290 = vmatpush1.bf16.msra.mxu1 %v10442_v59  ;;  %2057 = vmatprep.subr.bf16.mxu0 %v10447_v60  ;;  %v10540_v59 = vld [vmem:[%s13575_s30 + $0x7c4] ss:$8 sps:$4 sm:$0xff]   ;;  %v10535_v60 = vld [vmem:[%s13575_s30 + $0x6c0] ss:$8 sps:$4 sm:$0xff]  }
 0x15c   : > { %2291 = vmatprep.subr.bf16.mxu1 %v10450_v61  ;;  %v10538_v61 = vld [vmem:[%s13575_s30 + $0x7c0] ss:$8 sps:$4 sm:$0xff]  }
 0x15e   : > { %2058 = vmatpush1.bf16.msra.mxu0 %v10445_v62  ;;  %v10543_v62 = vld [vmem:[%s13575_s30 + $0x6d4] ss:$8 sps:$4 sm:$0xff]  }
 0x15f   : > { %2292 = vmatpush1.bf16.msra.mxu1 %v10448_v63  ;;  %2059 = vmatprep.subr.bf16.mxu0 %v10453_v0  ;;  %v10546_v63 = vld [vmem:[%s13575_s30 + $0x7d4] ss:$8 sps:$4 sm:$0xff]   ;;  %v10541_v0 = vld [vmem:[%s13575_s30 + $0x6d0] ss:$8 sps:$4 sm:$0xff]  }
 0x160   : > { %2293 = vmatprep.subr.bf16.mxu1 %v10456_v1  ;;  %v10544_v1 = vld [vmem:[%s13575_s30 + $0x7d0] ss:$8 sps:$4 sm:$0xff]  }
 0x162   : > { %2060 = vmatpush1.bf16.msra.mxu0 %v10451_v2  ;;  %v10549_v2 = vld [vmem:[%s13575_s30 + $0x6e4] ss:$8 sps:$4 sm:$0xff]  }
 0x163   : > { %2294 = vmatpush1.bf16.msra.mxu1 %v10454_v3  ;;  %2061 = vmatprep.subr.bf16.mxu0 %v10459_v4  ;;  %v10552_v3 = vld [vmem:[%s13575_s30 + $0x7e4] ss:$8 sps:$4 sm:$0xff]   ;;  %v10547_v4 = vld [vmem:[%s13575_s30 + $0x6e0] ss:$8 sps:$4 sm:$0xff]  }
 0x164   : > { %2295 = vmatprep.subr.bf16.mxu1 %v10462_v5  ;;  %v10550_v5 = vld [vmem:[%s13575_s30 + $0x7e0] ss:$8 sps:$4 sm:$0xff]  }
 0x166   : > { %2062 = vmatpush1.bf16.msra.mxu0 %v10457_v7  ;;  %v10555_v7 = vld [vmem:[%s13575_s30 + $0x6f4] ss:$8 sps:$4 sm:$0xff]  }
 0x167   : > { %2296 = vmatpush1.bf16.msra.mxu1 %v10460_v8  ;;  %2499 = vmatprep.subr.bf16.mxu0 %v10465_v9  ;;  %v10558_v8 = vld [vmem:[%s13575_s30 + $0x7f4] ss:$8 sps:$4 sm:$0xff]   ;;  %v10553_v9 = vld [vmem:[%s13575_s30 + $0x6f0] ss:$8 sps:$4 sm:$0xff]  }
 0x168   : > { %2733 = vmatprep.subr.bf16.mxu1 %v10468_v10  ;;  %v10556_v10 = vld [vmem:[%s13575_s30 + $0x7f0] ss:$8 sps:$4 sm:$0xff]  }
 0x169   : > { %2064 = vmatmul.mubr.bf16.vlgmr.msra.gmra.mrb[8].mxu0 %v11500_v6 }
 0x16a   : > { %2298 = vmatmul.mubr.bf16.vlgmr.msra.gmra.mrb[8].mxu1 %v11500_v6  ;;  %2500 = vmatpush1.bf16.msra.mxu0 %v10463_v11  ;;  %v10561_v11 = vld [vmem:[%s13575_s30 + $0x804] ss:$8 sps:$4 sm:$0xff]  }
 0x16b   : > { %2734 = vmatpush1.bf16.msra.mxu1 %v10466_v12  ;;  %2501 = vmatprep.subr.bf16.mxu0 %v10471_v13  ;;  %v10559_v12 = vld [vmem:[%s13575_s30 + $0x800] ss:$8 sps:$4 sm:$0xff]   ;;  %v10564_v13 = vld [vmem:[%s13575_s30 + $0x814] ss:$8 sps:$4 sm:$0xff]  }
 0x16c   : > { %2735 = vmatprep.subr.bf16.mxu1 %v10474_v14  ;;  %2531 = vmatprep.mubr.bf16.mxu0 %v11435_v48  ;;  %v10562_v14 = vld [vmem:[%s13575_s30 + $0x810] ss:$8 sps:$4 sm:$0xff]  }
 0x16d   : > { %2765 = vmatprep.mubr.bf16.mxu1 %v11435_v48 }
 0x16e   : > { %2502 = vmatpush1.bf16.msra.mxu0 %v10469_v15  ;;  %v10567_v15 = vld [vmem:[%s13575_s30 + $0x824] ss:$8 sps:$4 sm:$0xff]  }
 0x16f   : > { %2736 = vmatpush1.bf16.msra.mxu1 %v10472_v16  ;;  %2503 = vmatprep.subr.bf16.mxu0 %v10477_v17  ;;  %v10565_v16 = vld [vmem:[%s13575_s30 + $0x820] ss:$8 sps:$4 sm:$0xff]   ;;  %v10570_v17 = vld [vmem:[%s13575_s30 + $0x834] ss:$8 sps:$4 sm:$0xff]  }
 0x170   : > { %2737 = vmatprep.subr.bf16.mxu1 %v10480_v18  ;;  %v10568_v18 = vld [vmem:[%s13575_s30 + $0x830] ss:$8 sps:$4 sm:$0xff]  }
 0x172   : > { %2504 = vmatpush1.bf16.msra.mxu0 %v10475_v19  ;;  %v10573_v19 = vld [vmem:[%s13575_s30 + $0x844] ss:$8 sps:$4 sm:$0xff]  }
 0x173   : > { %2738 = vmatpush1.bf16.msra.mxu1 %v10478_v20  ;;  %2505 = vmatprep.subr.bf16.mxu0 %v10483_v21  ;;  %v10576_v20 = vld [vmem:[%s13575_s30 + $0x854] ss:$8 sps:$4 sm:$0xff]   ;;  %v10574_v21 = vld [vmem:[%s13575_s30 + $0x850] ss:$8 sps:$4 sm:$0xff]  }
 0x174   : > { %2739 = vmatprep.subr.bf16.mxu1 %v10486_v22  ;;  %v10579_v22 = vld [vmem:[%s13575_s30 + $0x864] ss:$8 sps:$4 sm:$0xff]  }
 0x176   : > { %2506 = vmatpush1.bf16.msra.mxu0 %v10481_v23 }
 0x177   : > { %2740 = vmatpush1.bf16.msra.mxu1 %v10484_v24  ;;  %2507 = vmatprep.subr.bf16.mxu0 %v10489_v25  ;;  %v10577_v25 = vld [vmem:[%s13575_s30 + $0x860] ss:$8 sps:$4 sm:$0xff]  }
 0x178   : > { %2741 = vmatprep.subr.bf16.mxu1 %v10492_v26 }
 0x17a   : > { %2508 = vmatpush1.bf16.msra.mxu0 %v10487_v27 }
 0x17b   : > { %2742 = vmatpush1.bf16.msra.mxu1 %v10490_v28  ;;  %2509 = vmatprep.subr.bf16.mxu0 %v10495_v29  ;;  %v10582_v29 = vld [vmem:[%s13575_s30 + $0x874] ss:$8 sps:$4 sm:$0xff]  }
 0x17c   : > { %2743 = vmatprep.subr.bf16.mxu1 %v10498_v30 }
 0x17e   : > { %2510 = vmatpush1.bf16.msra.mxu0 %v10493_v31 }
 0x17f   : > { %2744 = vmatpush1.bf16.msra.mxu1 %v10496_v32  ;;  %2511 = vmatprep.subr.bf16.mxu0 %v10501_v33 }
 0x180   : > { %2745 = vmatprep.subr.bf16.mxu1 %v10504_v34 }
 0x182   : > { %2512 = vmatpush1.bf16.msra.mxu0 %v10499_v35  ;;  %v10580_v35 = vld [vmem:[%s13575_s30 + $0x870] ss:$8 sps:$4 sm:$0xff]  }
 0x183   : > { %2746 = vmatpush1.bf16.msra.mxu1 %v10502_v36  ;;  %2513 = vmatprep.subr.bf16.mxu0 %v10507_v37  ;;  %v10585_v36 = vld [vmem:[%s13575_s30 + $0x884] ss:$8 sps:$4 sm:$0xff]   ;;  %v10583_v37 = vld [vmem:[%s13575_s30 + $0x880] ss:$8 sps:$4 sm:$0xff]  }
 0x184   : > { %2747 = vmatprep.subr.bf16.mxu1 %v10510_v38  ;;  %v10588_v38 = vld [vmem:[%s13575_s30 + $0x894] ss:$8 sps:$4 sm:$0xff]  }
 0x186   : > { %2514 = vmatpush1.bf16.msra.mxu0 %v10505_v39  ;;  %v10586_v39 = vld [vmem:[%s13575_s30 + $0x890] ss:$8 sps:$4 sm:$0xff]  }
 0x187   : > { %2748 = vmatpush1.bf16.msra.mxu1 %v10508_v40  ;;  %2515 = vmatprep.subr.bf16.mxu0 %v10513_v41  ;;  %v10591_v40 = vld [vmem:[%s13575_s30 + $0x8a4] ss:$8 sps:$4 sm:$0xff]   ;;  %v10589_v41 = vld [vmem:[%s13575_s30 + $0x8a0] ss:$8 sps:$4 sm:$0xff]  }
 0x188   : > { %2749 = vmatprep.subr.bf16.mxu1 %v10516_v42  ;;  %v10594_v42 = vld [vmem:[%s13575_s30 + $0x8b4] ss:$8 sps:$4 sm:$0xff]  }
 0x18a   : > { %2516 = vmatpush1.bf16.msra.mxu0 %v10511_v43  ;;  %v10592_v43 = vld [vmem:[%s13575_s30 + $0x8b0] ss:$8 sps:$4 sm:$0xff]  }
 0x18b   : > { %2750 = vmatpush1.bf16.msra.mxu1 %v10514_v44  ;;  %2517 = vmatprep.subr.bf16.mxu0 %v10519_v45  ;;  %v10597_v44 = vld [vmem:[%s13575_s30 + $0x8c4] ss:$8 sps:$4 sm:$0xff]   ;;  %v10595_v45 = vld [vmem:[%s13575_s30 + $0x8c0] ss:$8 sps:$4 sm:$0xff]  }
 0x18c   : > { %2751 = vmatprep.subr.bf16.mxu1 %v10522_v46  ;;  %v10600_v46 = vld [vmem:[%s13575_s30 + $0x8d4] ss:$8 sps:$4 sm:$0xff]  }
 0x18e   : > { %2518 = vmatpush1.bf16.msra.mxu0 %v10517_v47  ;;  %v10598_v47 = vld [vmem:[%s13575_s30 + $0x8d0] ss:$8 sps:$4 sm:$0xff]  }
 0x18f   : > { %2752 = vmatpush1.bf16.msra.mxu1 %v10520_v49  ;;  %2519 = vmatprep.subr.bf16.mxu0 %v10525_v50  ;;  %v10603_v49 = vld [vmem:[%s13575_s30 + $0x8e4] ss:$8 sps:$4 sm:$0xff]   ;;  %v10601_v50 = vld [vmem:[%s13575_s30 + $0x8e0] ss:$8 sps:$4 sm:$0xff]  }
 0x190   : > { %2753 = vmatprep.subr.bf16.mxu1 %v10528_v51  ;;  %v10606_v51 = vld [vmem:[%s13575_s30 + $0x8f4] ss:$8 sps:$4 sm:$0xff]  }
 0x192   : > { %2520 = vmatpush1.bf16.msra.mxu0 %v10523_v52  ;;  %v10604_v52 = vld [vmem:[%s13575_s30 + $0x8f0] ss:$8 sps:$4 sm:$0xff]  }
 0x193   : > { %2754 = vmatpush1.bf16.msra.mxu1 %v10526_v53  ;;  %2521 = vmatprep.subr.bf16.mxu0 %v10531_v54 }
 0x194   : > { %2755 = vmatprep.subr.bf16.mxu1 %v10534_v55 }
 0x196   : > { %2522 = vmatpush1.bf16.msra.mxu0 %v10529_v56 }
 0x197   : > { %2756 = vmatpush1.bf16.msra.mxu1 %v10532_v57  ;;  %2523 = vmatprep.subr.bf16.mxu0 %v10537_v58 }
 0x198   : > { %2757 = vmatprep.subr.bf16.mxu1 %v10540_v59 }
 0x19a   : > { %2524 = vmatpush1.bf16.msra.mxu0 %v10535_v60 }
 0x19b   : > { %2758 = vmatpush1.bf16.msra.mxu1 %v10538_v61  ;;  %2525 = vmatprep.subr.bf16.mxu0 %v10543_v62 }
 0x19c   : > { %2759 = vmatprep.subr.bf16.mxu1 %v10546_v63 }
 0x19e   : > { %2526 = vmatpush1.bf16.msra.mxu0 %v10541_v0 }
 0x19f   : > { %2760 = vmatpush1.bf16.msra.mxu1 %v10544_v1  ;;  %2527 = vmatprep.subr.bf16.mxu0 %v10549_v2 }
 0x1a0   : > { %2761 = vmatprep.subr.bf16.mxu1 %v10552_v3 }
 0x1a2   : > { %2528 = vmatpush1.bf16.msra.mxu0 %v10547_v4 }
 0x1a3   : > { %2762 = vmatpush1.bf16.msra.mxu1 %v10550_v5  ;;  %2529 = vmatprep.subr.bf16.mxu0 %v10555_v7 }
 0x1a4   : > { %2763 = vmatprep.subr.bf16.mxu1 %v10558_v8 }
 0x1a6   : > { %2530 = vmatpush1.bf16.msra.mxu0 %v10553_v9  ;;  %v10971_v9 = vmov 0.0  }
 0x1a7   : > { %2764 = vmatpush1.bf16.msra.mxu1 %v10556_v10  ;;  %2967 = vmatprep.subr.bf16.mxu0 %v10561_v11  ;;  %v3010_v10 = vld [vmem:[%s13577_s6] sm:$0xff]  ;;  %v10972_v11 = vmov 0  }
 0x1a8   : > { %10173 = vset.pattern.permute.xlu0 %v10972_v11  ;;  %10174 = vset.pattern.permute.xlu1 %v10972_v11 }
 0x1a9   : > { %2532 = vmatmul.mubr.bf16.vlgmr.msra.gmra.mrb[12].mxu0 %v11500_v6  ;;  %3014 = vperm.xlu0 %10173, %v3010_v10  }
 0x1aa   : > { %2766 = vmatmul.mubr.bf16.vlgmr.msra.gmra.mrb[12].mxu1 %v11500_v6  ;;  %2968 = vmatpush1.bf16.msra.mxu0 %v10559_v12  ;;  %v3011_v12 = vld [vmem:[%s13577_s6 + $0x8] sm:$0xff] }
 0x1ab   : > { %2999 = vmatprep.mubr.bf16.mxu0 %v11435_v48  ;;  %2969 = vmatprep.subr.bf16.mxu0 %v10564_v13  ;;  %v10571_v48 = vld [vmem:[%s13575_s30 + $0x840] ss:$8 sps:$4 sm:$0xff]  }
 0x1ac   : > { %3093 = vmatprep.mubr.f32.mxu1 %v10971_v9  ;;  %v10608_v13 = vld [vmem:[%s13578_s11 + $0x140] sm:$0xff]  }
 0x1ad   : > { %3019 = vperm.xlu0 %10173, %v3011_v12  }
 0x1ae   : > { %2970 = vmatpush1.bf16.msra.mxu0 %v10562_v14  ;;  %v4649_v14 = vld [vmem:[%s13579_s10 + $0x10] sm:$0xff] }
 0x1af   : > { %2971 = vmatprep.subr.bf16.mxu0 %v10567_v15  ;;  %v10610_v15 = vld [vmem:[%s13578_s11 + $0x100] sm:$0xff]  }
 0x1b1   : > { %4662 = vperm.xlu0 %10173, %v4649_v14  }
 0x1b2   : > { %2972 = vmatpush1.bf16.msra.mxu0 %v10565_v16  ;;  %v10612_v16 = vld [vmem:[%s13578_s11 + $0x148] sm:$0xff]  }
 0x1b3   : > { %2973 = vmatprep.subr.bf16.mxu0 %v10570_v17  ;;  %v5504_v17 = vld [vmem:[%s13580_s29 + $0x8] sm:$0xff] }
 0x1b5   : > { %5514 = vperm.xlu0 %10173, %v5504_v17  }
 0x1b6   : > { %2974 = vmatpush1.bf16.msra.mxu0 %v10568_v18  ;;  %v10614_v18 = vld [vmem:[%s13578_s11 + $0x108] sm:$0xff]  }
 0x1b7   : > { %2975 = vmatprep.subr.bf16.mxu0 %v10573_v19  ;;  %v10616_v19 = vld [vmem:[%s13578_s11 + $0x150] sm:$0xff]  }
 0x1ba   : > { %2976 = vmatpush1.bf16.msra.mxu0 %v10571_v48  ;;  %v5506_v48 = vld [vmem:[%s13580_s29 + $0x18] sm:$0xff] }
 0x1bb   : > { %2977 = vmatprep.subr.bf16.mxu0 %v10576_v20  ;;  %v10618_v20 = vld [vmem:[%s13578_s11 + $0x110] sm:$0xff]   ;;  %5524 = vperm.xlu0 %10173, %v5506_v48  }
 0x1bc   : > { %v1129_v23 = vpop.f32.mrb[0].mxu0 }
 0x1bd   : > { %v1363_v24 = vpop.f32.mrb[0].mxu1  ;;  %v1131_v27 = vpop.f32.mrb[1].mxu0 }
 0x1be   : > { %v9880_v26 = vpack.c.bf16 %v1363_v24, %v1129_v23  ;;  %v1365_v28 = vpop.f32.mrb[1].mxu1  ;;  %v1133_v31 = vpop.f32.mrb[2].mxu0  ;;  %2978 = vmatpush1.bf16.msra.mxu0 %v10574_v21  ;;  %v10620_v21 = vld [vmem:[%s13578_s11 + $0x158] sm:$0xff]   ;;  %v10624_v24 = vld [vmem:[%s13578_s11 + $0x160] sm:$0xff]  }
 0x1bf   : > { %v9878_v30 = vpack.c.bf16 %v1365_v28, %v1131_v27  ;;  %v1367_v32 = vpop.f32.mrb[2].mxu1  ;;  %v1134_v33 = vpop.f32.mrb[3].mxu0  ;;  %2979 = vmatprep.subr.bf16.mxu0 %v10579_v22  ;;  %v6177_v22 = vld [vmem:[%s13515_s13 + $0x8] sm:$0xff]  ;;  %v10622_v23 = vld [vmem:[%s13578_s11 + $0x118] sm:$0xff]  }
 0x1c0   : > { %v1368_v34 = vpop.f32.mrb[3].mxu1  ;;  %6189 = vperm.xlu0 %10173, %v6177_v22   ;;  %v6181_v27 = vld [vmem:[%s13515_s13 + $0x28] sm:$0xff]  ;;  %v10642_v22 = vld [vmem:[%s13578_s11 + $0x200] sm:$0xff]  }
 0x1c1   : > { %9879 = vmatprep.subr.bf16.mxu1 %v9878_v30 }
 0x1c2   : > { %9881 = vmatpush1.bf16.msra.mxu1 %v9880_v26  ;;  %2980 = vmatpush1.bf16.msra.mxu0 %v10577_v25  ;;  %v6179_v25 = vld [vmem:[%s13515_s13 + $0x18] sm:$0xff]  ;;  %v10626_v26 = vld [vmem:[%s13578_s11 + $0x120] sm:$0xff]  }
 0x1c3   : > { %2981 = vmatprep.subr.bf16.mxu0 %v10582_v29 }
 0x1c4   : > { %6199 = vperm.xlu0 %10173, %v6179_v25   ;;  %v10645_v25 = vld [vmem:[%s13578_s11 + $0x88] sm:$0xff]  }
 0x1c6   : > { %2982 = vmatpush1.bf16.msra.mxu0 %v10580_v35 }
 0x1c7   : > { %2983 = vmatprep.subr.bf16.mxu0 %v10585_v36 }
 0x1c8   : > { %6209 = vperm.xlu0 %10173, %v6181_v27   ;;  %v10647_v27 = vld [vmem:[%s13578_s11 + $0xd0] sm:$0xff]  }
 0x1ca   : > { %2984 = vmatpush1.bf16.msra.mxu0 %v10583_v37 }
 0x1cb   : > { %2985 = vmatprep.subr.bf16.mxu0 %v10588_v38 }
 0x1ce   : > { %2986 = vmatpush1.bf16.msra.mxu0 %v10586_v39  ;;  %v10607_v39 = vld [vmem:[%s13578_s11 + $0x40] sm:$0xff]  }
 0x1cf   : > { %2987 = vmatprep.subr.bf16.mxu0 %v10591_v40 }
 0x1d2   : > { %2988 = vmatpush1.bf16.msra.mxu0 %v10589_v41  ;;  %v3008_v41 = vld [vmem:[#allocation3] sm:$0xff] }
 0x1d3   : > { %2989 = vmatprep.subr.bf16.mxu0 %v10594_v42  ;;  %v10609_v42 = vld [vmem:[%s13578_s11] sm:$0xff]  }
 0x1d6   : > { %2990 = vmatpush1.bf16.msra.mxu0 %v10592_v43 }
 0x1d7   : > { %2991 = vmatprep.subr.bf16.mxu0 %v10597_v44  ;;  %v10611_v44 = vld [vmem:[%s13578_s11 + $0x48] sm:$0xff]  }
 0x1da   : > { %2992 = vmatpush1.bf16.msra.mxu0 %v10595_v45 }
 0x1db   : > { %2993 = vmatprep.subr.bf16.mxu0 %v10600_v46  ;;  %v3009_v46 = vld [vmem:[#allocation3 + $0x8] sm:$0xff] }
 0x1de   : > { %2994 = vmatpush1.bf16.msra.mxu0 %v10598_v47  ;;  %v10613_v47 = vld [vmem:[%s13578_s11 + $0x8] sm:$0xff]  }
 0x1df   : > { %2995 = vmatprep.subr.bf16.mxu0 %v10603_v49  ;;  %v10615_v49 = vld [vmem:[%s13578_s11 + $0x50] sm:$0xff]  }
 0x1e2   : > { %2996 = vmatpush1.bf16.msra.mxu0 %v10601_v50  ;;  %v10617_v50 = vld [vmem:[%s13578_s11 + $0x10] sm:$0xff]  }
 0x1e3   : > { %2997 = vmatprep.subr.bf16.mxu0 %v10606_v51  ;;  %v10619_v51 = vld [vmem:[%s13578_s11 + $0x58] sm:$0xff]  }
 0x1e6   : > { %2998 = vmatpush1.bf16.msra.mxu0 %v10604_v52  ;;  %v10621_v52 = vld [vmem:[%s13578_s11 + $0x18] sm:$0xff]  }
 0x1e7   : > { %9094 = vmatprep.subr.bf16.mxu0 %v10608_v13 }
 0x1e9   : > { %3000 = vmatmul.mubr.bf16.vlgmr.msra.gmra.mrb[16].mxu0 %v11500_v6 }
 0x1ea   : > { %9095 = vmatpush3.bf16.msra.mxu0 %v10610_v15 }
 0x1eb   : > { %9096 = vmatprep.subr.bf16.mxu0 %v10612_v16 }
 0x1ee   : > { %9097 = vmatpush3.bf16.msra.mxu0 %v10614_v18 }
 0x1ef   : > { %9098 = vmatprep.subr.bf16.mxu0 %v10616_v19 }
 0x1f2   : > { %9099 = vmatpush3.bf16.msra.mxu0 %v10618_v20 }
 0x1f3   : > { %9100 = vmatprep.subr.bf16.mxu0 %v10620_v21  ;;  %v10641_v21 = vld [vmem:[%s13578_s11 + $0x80] sm:$0xff]  }
 0x1f6   : > { %9101 = vmatpush3.bf16.msra.mxu0 %v10622_v23  ;;  %v10643_v23 = vld [vmem:[%s13578_s11 + $0xc8] sm:$0xff]  }
 0x1f7   : > { %9102 = vmatprep.subr.bf16.mxu0 %v10624_v24  ;;  %v10644_v24 = vld [vmem:[%s13578_s11 + $0x248] sm:$0xff]  }
 0x1fa   : > { %9103 = vmatpush3.bf16.msra.mxu0 %v10626_v26  ;;  %v10646_v26 = vld [vmem:[%s13578_s11 + $0x208] sm:$0xff]  }
 0x1fc   : > { %v1597_v53 = vpop.f32.mrb[4].mxu0 }
 0x1fd   : > { %v1831_v54 = vpop.f32.mrb[4].mxu1  ;;  %v1599_v56 = vpop.f32.mrb[5].mxu0 }
 0x1fe   : > { %v9884_v55 = vpack.c.bf16 %v1831_v54, %v1597_v53  ;;  %v1833_v57 = vpop.f32.mrb[5].mxu1  ;;  %v1601_v59 = vpop.f32.mrb[6].mxu0  ;;  %v10623_v53 = vld [vmem:[%s13578_s11 + $0x60] sm:$0xff]  }
 0x1ff   : > { %v9882_v58 = vpack.c.bf16 %v1833_v57, %v1599_v56  ;;  %v1835_v60 = vpop.f32.mrb[6].mxu1  ;;  %v1602_v61 = vpop.f32.mrb[7].mxu0  ;;  %v10625_v54 = vld [vmem:[%s13578_s11 + $0x20] sm:$0xff]   ;;  %v10628_v56 = vld [vmem:[%s13578_s11 + $0x168] sm:$0xff]   ;;  %v10631_v59 = vld [vmem:[%s13578_s11 + $0x70] sm:$0xff]  }
 0x200   : > { %v1836_v62 = vpop.f32.mrb[7].mxu1  ;;  %v10629_v57 = vld [vmem:[%s13578_s11 + $0x28] sm:$0xff]   ;;  %9104 = vmatprep.subr.bf16.mxu0 %v10628_v56  ;;  %v10632_v60 = vld [vmem:[%s13578_s11 + $0x170] sm:$0xff]  }
 0x201   : > { %9883 = vmatprep.subr.bf16.mxu1 %v9882_v58  ;;  %v10630_v58 = vld [vmem:[%s13578_s11 + $0x128] sm:$0xff]   ;;  %v10633_v61 = vld [vmem:[%s13578_s11 + $0x30] sm:$0xff]  }
 0x202   : > { %9885 = vmatpush1.bf16.msra.mxu1 %v9884_v55  ;;  %v10627_v55 = vld [vmem:[%s13578_s11 + $0x68] sm:$0xff]   ;;  %9105 = vmatpush3.bf16.msra.mxu0 %v10630_v58  ;;  %v10634_v62 = vld [vmem:[%s13578_s11 + $0x130] sm:$0xff]  }
 0x203   : > { %9106 = vmatprep.subr.bf16.mxu0 %v10632_v60  ;;  %v10675_v56 = vld [vmem:[%s13578_s11 + $0x1c8] sm:$0xff]   ;;  %v10679_v60 = vld [vmem:[%s13578_s11 + $0x1d0] sm:$0xff]  }
 0x204   : > { %v10677_v58 = vld [vmem:[%s13578_s11 + $0x188] sm:$0xff]  }
 0x206   : > { %9107 = vmatpush3.bf16.msra.mxu0 %v10634_v62  ;;  %v10681_v62 = vld [vmem:[%s13578_s11 + $0x190] sm:$0xff]  }
 0x23c   : > { %v2065_v63 = vpop.f32.mrb[8].mxu0 }
 0x23d   : > { %v2299_v0 = vpop.f32.mrb[8].mxu1  ;;  %v2067_v2 = vpop.f32.mrb[9].mxu0 }
 0x23e   : > { %v9888_v1 = vpack.c.bf16 %v2299_v0, %v2065_v63  ;;  %v2301_v3 = vpop.f32.mrb[9].mxu1  ;;  %v2069_v5 = vpop.f32.mrb[10].mxu0  ;;  %v10635_v63 = vld [vmem:[%s13578_s11 + $0x78] sm:$0xff]  }
 0x23f   : > { %v9886_v4 = vpack.c.bf16 %v2301_v3, %v2067_v2  ;;  %v2303_v6 = vpop.f32.mrb[10].mxu1  ;;  %v2070_v7 = vpop.f32.mrb[11].mxu0  ;;  %v10636_v0 = vld [vmem:[%s13578_s11 + $0x178] sm:$0xff]   ;;  %v10639_v3 = vld [vmem:[%s13578_s11 + $0xc0] sm:$0xff]  }
 0x240   : > { %v2304_v8 = vpop.f32.mrb[11].mxu1  ;;  %v10638_v2 = vld [vmem:[%s13578_s11 + $0x138] sm:$0xff]   ;;  %9108 = vmatprep.subr.bf16.mxu0 %v10636_v0  ;;  %v3015_v5 = vpop.permute.xlu0 %3014 }
 0x241   : > { %9887 = vmatprep.subr.bf16.mxu1 %v9886_v4  ;;  %9109 = vmatpush3.bf16.msra.mxu0 %v10638_v2  ;;  %v10640_v4 = vld [vmem:[%s13578_s11 + $0x240] sm:$0xff]   ;;  %v10683_v0 = vld [vmem:[%s13578_s11 + $0x1d8] sm:$0xff]  }
 0x242   : > { %9889 = vmatpush1.bf16.msra.mxu1 %v9888_v1  ;;  %v10637_v1 = vld [vmem:[%s13578_s11 + $0x38] sm:$0xff]   ;;  %9138 = vmatprep.subr.bf16.mxu0 %v10640_v4  ;;  %v10687_v4 = vld [vmem:[%s13578_s11 + $0x1e0] sm:$0xff]  }
 0x243   : > { %v10685_v2 = vld [vmem:[%s13578_s11 + $0x198] sm:$0xff]  }
 0x244   : > { %v3020_v10 = vpop.permute.xlu0 %3019 }
 0x27c   : > { %v2533_v28 = vpop.f32.mrb[12].mxu0 }
 0x27d   : > { %v2767_v29 = vpop.f32.mrb[12].mxu1  ;;  %v2535_v31 = vpop.f32.mrb[13].mxu0 }
 0x27e   : > { %v9892_v30 = vpack.c.bf16 %v2767_v29, %v2533_v28  ;;  %v2769_v32 = vpop.f32.mrb[13].mxu1  ;;  %v2537_v34 = vpop.f32.mrb[14].mxu0  ;;  %v10648_v28 = vld [vmem:[%s13578_s11 + $0x250] sm:$0xff]  }
 0x27f   : > { %v9890_v33 = vpack.c.bf16 %v2769_v32, %v2535_v31  ;;  %v2771_v35 = vpop.f32.mrb[14].mxu1  ;;  %v2538_v36 = vpop.f32.mrb[15].mxu0  ;;  %v10649_v29 = vld [vmem:[%s13578_s11 + $0x90] sm:$0xff]   ;;  %v10651_v31 = vld [vmem:[%s13578_s11 + $0xd8] sm:$0xff]  }
 0x280   : > { %v2772_v37 = vpop.f32.mrb[15].mxu1  ;;  %v10652_v32 = vld [vmem:[%s13578_s11 + $0x258] sm:$0xff]   ;;  %v10655_v35 = vld [vmem:[%s13578_s11 + $0xe0] sm:$0xff]  }
 0x281   : > { %9891 = vmatprep.subr.bf16.mxu1 %v9890_v33  ;;  %v10653_v33 = vld [vmem:[%s13578_s11 + $0x98] sm:$0xff]   ;;  %v10656_v36 = vld [vmem:[%s13578_s11 + $0x260] sm:$0xff]  }
 0x282   : > { %9893 = vmatpush1.bf16.msra.mxu1 %v9892_v30  ;;  %v10650_v30 = vld [vmem:[%s13578_s11 + $0x210] sm:$0xff]   ;;  %v10654_v34 = vld [vmem:[%s13578_s11 + $0x218] sm:$0xff]   ;;  %v10657_v37 = vld [vmem:[%s13578_s11 + $0xa0] sm:$0xff]  }
 0x2bc   : > { %v3001_v38 = vpop.f32.mrb[16].mxu0 }
 0x2bd   : > { %v3003_v40 = vpop.f32.mrb[17].mxu0 }
 0x2be   : > { %v3005_v43 = vpop.f32.mrb[18].mxu0  ;;  %3045 = vmatprep.subr.mxu1 %v3003_v40  ;;  %v10660_v40 = vld [vmem:[%s13578_s11 + $0x268] sm:$0xff]  }
 0x2bf   : > { %v3006_v45 = vpop.f32.mrb[19].mxu0  ;;  %3046 = vmatpush1.msra.mxu1 %v3001_v38  ;;  %v10658_v38 = vld [vmem:[%s13578_s11 + $0x220] sm:$0xff]   ;;  %v10663_v43 = vld [vmem:[%s13578_s11 + $0xf0] sm:$0xff]  }
 0x2c0   : > { %8422 = vmatmul.mubr.msk.f32.vlgmr.msra.gmra.mrb[16].mxu1 %vm3022_vm0, %v3008_v41  ;;  %9050 = vmatprep.subr.bf16.mxu1 %v10607_v39  ;;  %v10659_v39 = vld [vmem:[%s13578_s11 + $0xe8] sm:$0xff]   ;;  %v10665_v45 = vld [vmem:[%s13578_s11 + $0xb0] sm:$0xff]  }
 0x2c1   : > { %3099 = vmatprep.mubr.f32.mxu1 %v10971_v9  ;;  %9051 = vmatpush3.bf16.msra.mxu1 %v10609_v42  ;;  %v10661_v41 = vld [vmem:[%s13578_s11 + $0xa8] sm:$0xff]  }
 0x2c2   : > { %9052 = vmatprep.subr.bf16.mxu1 %v10611_v44  ;;  %v10662_v42 = vld [vmem:[%s13578_s11 + $0x228] sm:$0xff]   ;;  %v10664_v44 = vld [vmem:[%s13578_s11 + $0x270] sm:$0xff]  }
 0x2c4   : > { %8423 = vmatmul.mubr.msk.f32.gmra.mrb[18].mxu1 %vm3022_vm0, %v3009_v46  ;;  %v10666_v46 = vld [vmem:[%s13578_s11 + $0x230] sm:$0xff]  }
 0x2c5   : > { %9053 = vmatpush3.bf16.msra.mxu1 %v10613_v47  ;;  %v10667_v47 = vld [vmem:[%s13578_s11 + $0xf8] sm:$0xff]  }
 0x2c6   : > { %9054 = vmatprep.subr.bf16.mxu1 %v10615_v49  ;;  %v10668_v49 = vld [vmem:[%s13578_s11 + $0x278] sm:$0xff]  }
 0x2c9   : > { %9055 = vmatpush3.bf16.msra.mxu1 %v10617_v50  ;;  %v10669_v50 = vld [vmem:[%s13578_s11 + $0xb8] sm:$0xff]  }
 0x2ca   : > { %9056 = vmatprep.subr.bf16.mxu1 %v10619_v51  ;;  %v10670_v51 = vld [vmem:[%s13578_s11 + $0x238] sm:$0xff]  }
 0x2cd   : > { %9057 = vmatpush3.bf16.msra.mxu1 %v10621_v52  ;;  %v10671_v52 = vld [vmem:[%s13578_s11 + $0x1c0] sm:$0xff]  }
 0x2ce   : > { %9058 = vmatprep.subr.bf16.mxu1 %v10623_v53  ;;  %v10672_v53 = vld [vmem:[%s13578_s11 + $0x340] sm:$0xff]  }
 0x2d1   : > { %9059 = vmatpush3.bf16.msra.mxu1 %v10625_v54  ;;  %v10673_v54 = vld [vmem:[%s13578_s11 + $0x180] sm:$0xff]  }
 0x2d2   : > { %9060 = vmatprep.subr.bf16.mxu1 %v10627_v55  ;;  %v10674_v55 = vld [vmem:[%s13578_s11 + $0x300] sm:$0xff]  }
 0x2d5   : > { %9061 = vmatpush3.bf16.msra.mxu1 %v10629_v57  ;;  %v10676_v57 = vld [vmem:[%s13578_s11 + $0x348] sm:$0xff]  }
 0x2d6   : > { %9062 = vmatprep.subr.bf16.mxu1 %v10631_v59  ;;  %v10678_v59 = vld [vmem:[%s13578_s11 + $0x308] sm:$0xff]  }
 0x2d9   : > { %9063 = vmatpush3.bf16.msra.mxu1 %v10633_v61  ;;  %v10680_v61 = vld [vmem:[%s13578_s11 + $0x350] sm:$0xff]  }
 0x2da   : > { %9064 = vmatprep.subr.bf16.mxu1 %v10635_v63  ;;  %v10682_v63 = vld [vmem:[%s13578_s11 + $0x310] sm:$0xff]  }
 0x2dd   : > { %9065 = vmatpush3.bf16.msra.mxu1 %v10637_v1  ;;  %v10684_v1 = vld [vmem:[%s13578_s11 + $0x358] sm:$0xff]  }
 0x2de   : > { %9072 = vmatprep.subr.bf16.mxu1 %v10639_v3  ;;  %v10686_v3 = vld [vmem:[%s13578_s11 + $0x318] sm:$0xff]  }
 0x393   : > { %v3095_v6 = vpop.f32.mrb[16].mxu1 }
 0x394   : > { %v3097_v7 = vpop.f32.mrb[17].mxu1  ;;  %v3096_v8 = vadd.f32 %v3095_v6, %v3015_v5  ;;  %v10689_v6 = vld [vmem:[%s13578_s11 + $0x1a0] sm:$0xff]  }
 0x395   : > { %v3098_v11 = vadd.f32 %v3097_v7, %v3015_v5  ;;  %v10688_v5 = vld [vmem:[%s13578_s11 + $0x360] sm:$0xff]  }
 0x396   : > { %v3106_v16 = vmax.f32 %v3096_v8, 0.0  ;;  %v10690_v7 = vld [vmem:[%s13578_s11 + $0x320] sm:$0xff]   ;;  %v10691_v8 = vld [vmem:[%s13578_s11 + $0x1e8] sm:$0xff]  }
 0x397   : > { %v3101_v12 = vpop.f32.mrb[18].mxu1  ;;  %v3107_v18 = vmax.f32 %v3098_v11, 0.0  ;;  %v10693_v11 = vld [vmem:[%s13578_s11 + $0x1a8] sm:$0xff]  }
 0x398   : > { %v3102_v13 = vadd.f32 %v3101_v12, %v3020_v10  ;;  %v3103_v14 = vpop.f32.mrb[19].mxu1  ;;  %v10694_v12 = vld [vmem:[%s13578_s11 + $0x328] sm:$0xff]  }
 0x399   : > { %v3104_v15 = vadd.f32 %v3103_v14, %v3020_v10  ;;  %v10692_v10 = vld [vmem:[%s13578_s11 + $0x368] sm:$0xff]   ;;  %v10696_v14 = vld [vmem:[%s13578_s11 + $0x370] sm:$0xff]  }
 0x39a   : > { %v3108_v17 = vmax.f32 %v3102_v13, 0.0  ;;  %v10695_v13 = vld [vmem:[%s13578_s11 + $0x1f0] sm:$0xff]  }
 0x39b   : > { %v3109_v19 = vmax.f32 %v3104_v15, 0.0  ;;  %v10697_v15 = vld [vmem:[%s13578_s11 + $0x1b0] sm:$0xff]  }
 0x39c   : > { %v12312_v48 = vpack.c.bf16 %v3108_v17, %v3106_v16  ;;  %v10698_v16 = vld [vmem:[%s13578_s11 + $0x330] sm:$0xff]   ;;  %v10699_v17 = vld [vmem:[%s13578_s11 + $0x1f8] sm:$0xff]  }
 0x39d   : > { %v12314_v20 = vpack.c.bf16 %v3109_v19, %v3107_v18  ;;  %v10700_v18 = vld [vmem:[%s13578_s11 + $0x378] sm:$0xff]  }
 0x39e   : > { %v10701_v19 = vld [vmem:[%s13578_s11 + $0x1b8] sm:$0xff]  }
 0x39f   : > { %3272 = vmatprep.mubr.bf16.mxu1 %v12314_v20  ;;  %3612 = vmatprep.mubr.bf16.mxu0 %v12314_v20 }
 0x3a0   : > { %3273 = vmatmul.mubr.bf16.vlgmr.msra.gmra.mrb[20].mxu1 %v12312_v48  ;;  %3613 = vmatmul.mubr.bf16.vlgmr.msra.gmra.mrb[20].mxu0 %v12312_v48 }
 0x3a1   : > { %9073 = vmatpush3.bf16.msra.mxu1 %v10641_v21  ;;  %9139 = vmatpush3.bf16.msra.mxu0 %v10642_v22  ;;  %v10702_v21 = vld [vmem:[%s13578_s11 + $0x338] sm:$0xff]   ;;  %v10703_v22 = vld [vmem:[%s13578_s11 + $0x2c0] sm:$0xff]  }
 0x3a2   : > { %3442 = vmatprep.mubr.bf16.mxu1 %v12314_v20  ;;  %3952 = vmatprep.mubr.bf16.mxu0 %v12314_v20 }
 0x3a3   : > { %9074 = vmatprep.subr.bf16.mxu1 %v10643_v23  ;;  %9140 = vmatprep.subr.bf16.mxu0 %v10644_v24  ;;  %v10704_v23 = vld [vmem:[%s13578_s11 + $0x440] sm:$0xff]  }
 0x3a4   : > { %v10705_v24 = vld [vmem:[%s13578_s11 + $0x280] sm:$0xff]  }
 0x3a5   : > { %9075 = vmatpush3.bf16.msra.mxu1 %v10645_v25  ;;  %9141 = vmatpush3.bf16.msra.mxu0 %v10646_v26  ;;  %v10706_v25 = vld [vmem:[%s13578_s11 + $0x400] sm:$0xff]   ;;  %v10707_v26 = vld [vmem:[%s13578_s11 + $0x2c8] sm:$0xff]  }
 0x3a6   : > { %9076 = vmatprep.subr.bf16.mxu1 %v10647_v27  ;;  %9142 = vmatprep.subr.bf16.mxu0 %v10648_v28  ;;  %v10708_v27 = vld [vmem:[%s13578_s11 + $0x448] sm:$0xff]  }
 0x3a7   : > { %v10709_v28 = vld [vmem:[%s13578_s11 + $0x288] sm:$0xff]  }
 0x3a9   : > { %9077 = vmatpush3.bf16.msra.mxu1 %v10649_v29  ;;  %9143 = vmatpush3.bf16.msra.mxu0 %v10650_v30  ;;  %v10710_v29 = vld [vmem:[%s13578_s11 + $0x408] sm:$0xff]   ;;  %v10711_v30 = vld [vmem:[%s13578_s11 + $0x2d0] sm:$0xff]  }
 0x3aa   : > { %9078 = vmatprep.subr.bf16.mxu1 %v10651_v31  ;;  %9144 = vmatprep.subr.bf16.mxu0 %v10652_v32  ;;  %v10712_v31 = vld [vmem:[%s13578_s11 + $0x450] sm:$0xff]  }
 0x3ab   : > { %v10713_v32 = vld [vmem:[%s13578_s11 + $0x290] sm:$0xff]  }
 0x3ad   : > { %9079 = vmatpush3.bf16.msra.mxu1 %v10653_v33  ;;  %9145 = vmatpush3.bf16.msra.mxu0 %v10654_v34  ;;  %v10714_v33 = vld [vmem:[%s13578_s11 + $0x410] sm:$0xff]   ;;  %v10715_v34 = vld [vmem:[%s13578_s11 + $0x2d8] sm:$0xff]  }
 0x3ae   : > { %9080 = vmatprep.subr.bf16.mxu1 %v10655_v35  ;;  %9146 = vmatprep.subr.bf16.mxu0 %v10656_v36  ;;  %v10716_v35 = vld [vmem:[%s13578_s11 + $0x458] sm:$0xff]  }
 0x3af   : > { %v10717_v36 = vld [vmem:[%s13578_s11 + $0x298] sm:$0xff]  }
 0x3b1   : > { %9081 = vmatpush3.bf16.msra.mxu1 %v10657_v37  ;;  %9147 = vmatpush3.bf16.msra.mxu0 %v10658_v38  ;;  %v10718_v37 = vld [vmem:[%s13578_s11 + $0x418] sm:$0xff]   ;;  %v10719_v38 = vld [vmem:[%s13578_s11 + $0x2e0] sm:$0xff]  }
 0x3b2   : > { %9082 = vmatprep.subr.bf16.mxu1 %v10659_v39  ;;  %9148 = vmatprep.subr.bf16.mxu0 %v10660_v40  ;;  %v10720_v39 = vld [vmem:[%s13578_s11 + $0x460] sm:$0xff]  }
 0x3b3   : > { %v10721_v40 = vld [vmem:[%s13578_s11 + $0x2a0] sm:$0xff]  }
 0x3b5   : > { %9083 = vmatpush3.bf16.msra.mxu1 %v10661_v41  ;;  %9149 = vmatpush3.bf16.msra.mxu0 %v10662_v42  ;;  %v10722_v41 = vld [vmem:[%s13578_s11 + $0x420] sm:$0xff]   ;;  %v10723_v42 = vld [vmem:[%s13578_s11 + $0x2e8] sm:$0xff]  }
 0x3b6   : > { %9084 = vmatprep.subr.bf16.mxu1 %v10663_v43  ;;  %9150 = vmatprep.subr.bf16.mxu0 %v10664_v44  ;;  %v10724_v43 = vld [vmem:[%s13578_s11 + $0x468] sm:$0xff]  }
 0x3b7   : > { %v10725_v44 = vld [vmem:[%s13578_s11 + $0x2a8] sm:$0xff]  }
 0x3b9   : > { %9085 = vmatpush3.bf16.msra.mxu1 %v10665_v45  ;;  %9151 = vmatpush3.bf16.msra.mxu0 %v10666_v46  ;;  %v10726_v45 = vld [vmem:[%s13578_s11 + $0x428] sm:$0xff]   ;;  %v10727_v46 = vld [vmem:[%s13578_s11 + $0x2f0] sm:$0xff]  }
 0x3ba   : > { %9086 = vmatprep.subr.bf16.mxu1 %v10667_v47  ;;  %9152 = vmatprep.subr.bf16.mxu0 %v10668_v49  ;;  %v10728_v47 = vld [vmem:[%s13578_s11 + $0x470] sm:$0xff]  }
 0x3bb   : > { %v10729_v49 = vld [vmem:[%s13578_s11 + $0x2b0] sm:$0xff]  }
 0x3bd   : > { %9087 = vmatpush3.bf16.msra.mxu1 %v10669_v50  ;;  %9153 = vmatpush3.bf16.msra.mxu0 %v10670_v51  ;;  %v10730_v50 = vld [vmem:[%s13578_s11 + $0x430] sm:$0xff]   ;;  %v10731_v51 = vld [vmem:[%s13578_s11 + $0x2f8] sm:$0xff]  }
 0x3be   : > { %9116 = vmatprep.subr.bf16.mxu1 %v10671_v52  ;;  %9182 = vmatprep.subr.bf16.mxu0 %v10672_v53  ;;  %v10732_v52 = vld [vmem:[%s13578_s11 + $0x478] sm:$0xff]  }
 0x3bf   : > { %v10733_v53 = vld [vmem:[%s13578_s11 + $0x2b8] sm:$0xff]  }
 0x3c0   : > { %3443 = vmatmul.mubr.bf16.vlgmr.msra.gmra.mrb[24].mxu1 %v12312_v48  ;;  %3953 = vmatmul.mubr.bf16.vlgmr.msra.gmra.mrb[24].mxu0 %v12312_v48 }
 0x3c1   : > { %9117 = vmatpush3.bf16.msra.mxu1 %v10673_v54  ;;  %3782 = vmatprep.mubr.bf16.mxu1 %v12314_v20  ;;  %v10734_v54 = vld [vmem:[%s13578_s11 + $0x438] sm:$0xff]  }
 0x3c2   : > { %9183 = vmatpush3.bf16.msra.mxu0 %v10674_v55  ;;  %4292 = vmatprep.mubr.bf16.mxu0 %v12314_v20  ;;  %v10735_v55 = vld [vmem:[%s13578_s11 + $0x3c0] sm:$0xff]  }
 0x3c3   : > { %9118 = vmatprep.subr.bf16.mxu1 %v10675_v56  ;;  %9184 = vmatprep.subr.bf16.mxu0 %v10676_v57  ;;  %v10736_v56 = vld [vmem:[%s13578_s11 + $0x380] sm:$0xff]   ;;  %v10737_v57 = vld [vmem:[%s13578_s11 + $0x3c8] sm:$0xff]  }
 0x3c5   : > { %9119 = vmatpush3.bf16.msra.mxu1 %v10677_v58  ;;  %v10738_v58 = vld [vmem:[%s13578_s11 + $0x388] sm:$0xff]  }
 0x3c6   : > { %9185 = vmatpush3.bf16.msra.mxu0 %v10678_v59  ;;  %9120 = vmatprep.subr.bf16.mxu1 %v10679_v60  ;;  %v10739_v59 = vld [vmem:[%s13578_s11 + $0x3d0] sm:$0xff]  }
 0x3c7   : > { %9186 = vmatprep.subr.bf16.mxu0 %v10680_v61  ;;  %v10740_v60 = vld [vmem:[%s13578_s11 + $0x390] sm:$0xff]   ;;  %v10741_v61 = vld [vmem:[%s13578_s11 + $0x3d8] sm:$0xff]  }
 0x3c9   : > { %9121 = vmatpush3.bf16.msra.mxu1 %v10681_v62  ;;  %v10743_v62 = vld [vmem:[%s13578_s11 + $0x3e0] sm:$0xff]  }
 0x3ca   : > { %9187 = vmatpush3.bf16.msra.mxu0 %v10682_v63  ;;  %9122 = vmatprep.subr.bf16.mxu1 %v10683_v0  ;;  %v10744_v63 = vld [vmem:[%s13578_s11 + $0x3a0] sm:$0xff]   ;;  %v10745_v0 = vld [vmem:[%s13578_s11 + $0x3e8] sm:$0xff]  }
 0x3cb   : > { %9188 = vmatprep.subr.bf16.mxu0 %v10684_v1  ;;  %v10746_v1 = vld [vmem:[%s13578_s11 + $0x3a8] sm:$0xff]  }
 0x3cd   : > { %9123 = vmatpush3.bf16.msra.mxu1 %v10685_v2  ;;  %v10747_v2 = vld [vmem:[%s13578_s11 + $0x3f0] sm:$0xff]  }
 0x3ce   : > { %9189 = vmatpush3.bf16.msra.mxu0 %v10686_v3  ;;  %9124 = vmatprep.subr.bf16.mxu1 %v10687_v4  ;;  %v10748_v3 = vld [vmem:[%s13578_s11 + $0x3b0] sm:$0xff]   ;;  %v10749_v4 = vld [vmem:[%s13578_s11 + $0x3f8] sm:$0xff]  }
 0x3cf   : > { %9190 = vmatprep.subr.bf16.mxu0 %v10688_v5  ;;  %v10750_v5 = vld [vmem:[%s13578_s11 + $0x3b8] sm:$0xff]  }
 0x3d1   : > { %9125 = vmatpush3.bf16.msra.mxu1 %v10689_v6  ;;  %v10973_v6 = vmov 0.0|0.0  }
 0x3d2   : > { %9191 = vmatpush3.bf16.msra.mxu0 %v10690_v7  ;;  %9126 = vmatprep.subr.bf16.mxu1 %v10691_v8 }
 0x3d3   : > { %9192 = vmatprep.subr.bf16.mxu0 %v10692_v10 }
 0x3d5   : > { %9127 = vmatpush3.bf16.msra.mxu1 %v10693_v11 }
 0x3d6   : > { %9193 = vmatpush3.bf16.msra.mxu0 %v10694_v12  ;;  %9128 = vmatprep.subr.bf16.mxu1 %v10695_v13 }
 0x3d7   : > { %9194 = vmatprep.subr.bf16.mxu0 %v10696_v14 }
 0x3d9   : > { %9129 = vmatpush3.bf16.msra.mxu1 %v10697_v15 }
 0x3da   : > { %9195 = vmatpush3.bf16.msra.mxu0 %v10698_v16  ;;  %9130 = vmatprep.subr.bf16.mxu1 %v10699_v17 }
 0x3db   : > { %9196 = vmatprep.subr.bf16.mxu0 %v10700_v18 }
 0x3dd   : > { %9131 = vmatpush3.bf16.msra.mxu1 %v10701_v19 }
 0x3de   : > { %9197 = vmatpush3.bf16.msra.mxu0 %v10702_v21  ;;  %9160 = vmatprep.subr.bf16.mxu1 %v10703_v22 }
 0x3df   : > { %9226 = vmatprep.subr.bf16.mxu0 %v10704_v23  ;;  %v4642_v23 = vld [vmem:[#allocation5 + $0x8] sm:$0xff] }
 0x3e0   : > { %3783 = vmatmul.mubr.bf16.vlgmr.msra.gmra.mrb[28].mxu1 %v12312_v48 }
 0x3e1   : > { %4293 = vmatmul.mubr.bf16.vlgmr.msra.gmra.mrb[28].mxu0 %v12312_v48  ;;  %9161 = vmatpush3.bf16.msra.mxu1 %v10705_v24  ;;  %v4648_v24 = vld [vmem:[%s13579_s10 + $0x8] sm:$0xff] }
 0x3e2   : > { %4122 = vmatprep.mubr.bf16.mxu1 %v12314_v20  ;;  %9227 = vmatpush3.bf16.msra.mxu0 %v10706_v25  ;;  %v5503_v25 = vld [vmem:[%s13580_s29] sm:$0xff] }
 0x3e3   : > { %4632 = vmatprep.mubr.bf16.mxu0 %v12314_v20  ;;  %9162 = vmatprep.subr.bf16.mxu1 %v10707_v26 }
 0x3e4   : > { %9228 = vmatprep.subr.bf16.mxu0 %v10708_v27 }
 0x3e5   : > { %9163 = vmatpush3.bf16.msra.mxu1 %v10709_v28 }
 0x3e6   : > { %9229 = vmatpush3.bf16.msra.mxu0 %v10710_v29  ;;  %9164 = vmatprep.subr.bf16.mxu1 %v10711_v30  ;;  %v5505_v30 = vld [vmem:[%s13580_s29 + $0x10] sm:$0xff] }
 0x3e7   : > { %9230 = vmatprep.subr.bf16.mxu0 %v10712_v31 }
 0x3e9   : > { %9165 = vmatpush3.bf16.msra.mxu1 %v10713_v32 }
 0x3ea   : > { %9231 = vmatpush3.bf16.msra.mxu0 %v10714_v33  ;;  %9166 = vmatprep.subr.bf16.mxu1 %v10715_v34 }
 0x3eb   : > { %9232 = vmatprep.subr.bf16.mxu0 %v10716_v35 }
 0x3ed   : > { %9167 = vmatpush3.bf16.msra.mxu1 %v10717_v36 }
 0x3ee   : > { %9233 = vmatpush3.bf16.msra.mxu0 %v10718_v37  ;;  %9168 = vmatprep.subr.bf16.mxu1 %v10719_v38 }
 0x3ef   : > { %9234 = vmatprep.subr.bf16.mxu0 %v10720_v39  ;;  %v6176_v39 = vld [vmem:[%s13515_s13] sm:$0xff] }
 0x3f1   : > { %9169 = vmatpush3.bf16.msra.mxu1 %v10721_v40 }
 0x3f2   : > { %9235 = vmatpush3.bf16.msra.mxu0 %v10722_v41  ;;  %9170 = vmatprep.subr.bf16.mxu1 %v10723_v42  ;;  %v10751_v42 = vld [vmem:[%s13581_s1] sm:$0xff]  }
 0x3f3   : > { %9236 = vmatprep.subr.bf16.mxu0 %v10724_v43  ;;  %v6178_v43 = vld [vmem:[%s13515_s13 + $0x10] sm:$0xff] }
 0x3f5   : > { %9171 = vmatpush3.bf16.msra.mxu1 %v10725_v44  ;;  %v6180_v44 = vld [vmem:[%s13515_s13 + $0x20] sm:$0xff] }
 0x3f6   : > { %9237 = vmatpush3.bf16.msra.mxu0 %v10726_v45  ;;  %9172 = vmatprep.subr.bf16.mxu1 %v10727_v46 }
 0x3f7   : > { %9238 = vmatprep.subr.bf16.mxu0 %v10728_v47 }
 0x3f9   : > { %9173 = vmatpush3.bf16.msra.mxu1 %v10729_v49 }
 0x3fa   : > { %9239 = vmatpush3.bf16.msra.mxu0 %v10730_v50  ;;  %9174 = vmatprep.subr.bf16.mxu1 %v10731_v51 }
 0x3fb   : > { %9240 = vmatprep.subr.bf16.mxu0 %v10732_v52 }
 0x3fd   : > { %9175 = vmatpush3.bf16.msra.mxu1 %v10733_v53 }
 0x3fe   : > { %9241 = vmatpush3.bf16.msra.mxu0 %v10734_v54  ;;  %9204 = vmatprep.subr.bf16.mxu1 %v10735_v55 }
 0x3ff   : > { %9510 = vmatprep.subr.bf16.mxu0 %v10751_v42 }
 0x400   : > { %4123 = vmatmul.mubr.bf16.vlgmr.msra.gmra.mrb[32].mxu1 %v12312_v48 }
 0x401   : > { %4633 = vmatmul.mubr.bf16.vlgmr.msra.gmra.mrb[32].mxu0 %v12312_v48  ;;  %9205 = vmatpush3.bf16.msra.mxu1 %v10736_v56 }
 0x402   : > { %4462 = vmatprep.mubr.bf16.mxu1 %v12314_v20  ;;  %9206 = vmatprep.subr.bf16.mxu1 %v10737_v57  ;;  %v10742_v20 = vld [vmem:[%s13578_s11 + $0x398] sm:$0xff]  }
 0x403   : > { %9511 = vmatpush3.bf16.msra.mxu0 %v10751_v42  ;;  %v4663_v42 = vpop.permute.xlu0 %4662 }
 0x405   : > { %9207 = vmatpush3.bf16.msra.mxu1 %v10738_v58 }
 0x406   : > { %9208 = vmatprep.subr.bf16.mxu1 %v10739_v59 }
 0x409   : > { %9209 = vmatpush3.bf16.msra.mxu1 %v10740_v60 }
 0x40a   : > { %9210 = vmatprep.subr.bf16.mxu1 %v10741_v61 }
 0x40d   : > { %9211 = vmatpush3.bf16.msra.mxu1 %v10742_v20 }
 0x40e   : > { %9212 = vmatprep.subr.bf16.mxu1 %v10743_v62 }
 0x411   : > { %9213 = vmatpush3.bf16.msra.mxu1 %v10744_v63 }
 0x412   : > { %9214 = vmatprep.subr.bf16.mxu1 %v10745_v0 }
 0x415   : > { %9215 = vmatpush3.bf16.msra.mxu1 %v10746_v1 }
 0x416   : > { %9216 = vmatprep.subr.bf16.mxu1 %v10747_v2 }
 0x419   : > { %9217 = vmatpush3.bf16.msra.mxu1 %v10748_v3 }
 0x41a   : > { %9218 = vmatprep.subr.bf16.mxu1 %v10749_v4 }
 0x41d   : > { %9219 = vmatpush3.bf16.msra.mxu1 %v10750_v5 }
 0x41e   : > { %9894 = vmatprep.subr.bf16.mxu1 %v10973_v6 }
 0x420   : > { %4463 = vmatmul.mubr.bf16.vlgmr.msra.gmra.mrb[36].mxu1 %v12312_v48  ;;  %v4647_v48 = vld [vmem:[%s13579_s10] sm:$0xff] }
 0x421   : > { %8824 = vmatprep.mubr.msk.f32.mxu1 %vm4665_vm1, %v4642_v23  ;;  %4652 = vperm.xlu1 %10174, %v4647_v48   ;;  %v4646_v23 = vld [vmem:[#allocation5 + $0x28] sm:$0xff]  ;;  %v4645_v48 = vld [vmem:[#allocation5 + $0x20] sm:$0xff] }
 0x425   : > { %4657 = vperm.xlu1 %10174, %v4648_v24   ;;  %v10753_v24 = vld [vmem:[%s13581_s1 + $0x8] sm:$0xff]  }
 0x426   : > { %9512 = vmatprep.subr.bf16.mxu0 %v10753_v24 }
 0x427   : > { %9513 = vmatpush3.bf16.msra.mxu0 %v10753_v24 }
 0x429   : > { %5509 = vperm.xlu1 %10174, %v5503_v25   ;;  %v10754_v25 = vld [vmem:[%s13581_s1 + $0x48] sm:$0xff]  }
 0x42d   : > { %5519 = vperm.xlu1 %10174, %v5505_v30   ;;  %v10759_v30 = vld [vmem:[%s13581_s1 + $0x20] sm:$0xff]  }
 0x431   : > { %6184 = vperm.xlu1 %10174, %v6176_v39  }
 0x435   : > { %6194 = vperm.xlu1 %10174, %v6178_v43  }
 0x439   : > { %6204 = vperm.xlu1 %10174, %v6180_v44  }
 0x473   : > { %v9066_v7 = vpop.f32.mrb[20].mxu1  ;;  %v9110_v8 = vpop.f32.mrb[20].mxu0 }
 0x474   : > { %v9067_v10 = vpop.f32.mrb[21].mxu1  ;;  %v9111_v11 = vpop.f32.mrb[21].mxu0 }
 0x475   : > { %v9068_v12 = vadd.f32 %v9067_v10, %v9066_v7  ;;  %v9112_v13 = vadd.f32 %v9111_v11, %v9110_v8  ;;  %v9069_v14 = vpop.f32.mrb[22].mxu1  ;;  %v9113_v15 = vpop.f32.mrb[22].mxu0 }
 0x476   : > { %v9070_v16 = vpop.f32.mrb[23].mxu1  ;;  %v9114_v17 = vpop.f32.mrb[23].mxu0 }
 0x477   : > { %v9071_v18 = vadd.f32 %v9070_v16, %v9069_v14  ;;  %v9115_v19 = vadd.f32 %v9114_v17, %v9113_v15 }
 0x479   : > { %v9895_v21 = vpack.c.bf16 %v9071_v18, %v9068_v12  ;;  %v9901_v22 = vpack.c.bf16 %v9115_v19, %v9112_v13  ;;  %v10752_v18 = vld [vmem:[%s13581_s1 + $0x40] sm:$0xff]   ;;  %v4641_v19 = vld [vmem:[#allocation5] sm:$0xff] }
 0x47b   : > { %9896 = vmatpush1.bf16.msra.mxu1 %v9895_v21  ;;  %v4644_v21 = vld [vmem:[#allocation5 + $0x18] sm:$0xff] }
 0x47c   : > { %9897 = vmatprep.subr.bf16.mxu1 %v10973_v6 }
 0x493   : > { %v9088_v26 = vpop.f32.mrb[24].mxu1  ;;  %v9154_v27 = vpop.f32.mrb[24].mxu0 }
 0x494   : > { %v9089_v28 = vpop.f32.mrb[25].mxu1  ;;  %v9155_v29 = vpop.f32.mrb[25].mxu0 }
 0x495   : > { %v9090_v31 = vadd.f32 %v9089_v28, %v9088_v26  ;;  %v9156_v32 = vadd.f32 %v9155_v29, %v9154_v27  ;;  %v9091_v33 = vpop.f32.mrb[26].mxu1  ;;  %v9157_v34 = vpop.f32.mrb[26].mxu0  ;;  %v10755_v26 = vld [vmem:[%s13581_s1 + $0x10] sm:$0xff]   ;;  %v10757_v28 = vld [vmem:[%s13581_s1 + $0x18] sm:$0xff]  }
 0x496   : > { %v9092_v35 = vpop.f32.mrb[27].mxu1  ;;  %v9158_v36 = vpop.f32.mrb[27].mxu0  ;;  %v10756_v27 = vld [vmem:[%s13581_s1 + $0x50] sm:$0xff]   ;;  %9514 = vmatprep.subr.bf16.mxu0 %v10755_v26  ;;  %v10758_v29 = vld [vmem:[%s13581_s1 + $0x58] sm:$0xff]  }
 0x497   : > { %v9093_v37 = vadd.f32 %v9092_v35, %v9091_v33  ;;  %v9159_v38 = vadd.f32 %v9158_v36, %v9157_v34  ;;  %9515 = vmatpush3.bf16.msra.mxu0 %v10755_v26 }
 0x498   : > { %9516 = vmatprep.subr.bf16.mxu0 %v10757_v28 }
 0x499   : > { %v9898_v40 = vpack.c.bf16 %v9093_v37, %v9090_v31  ;;  %v9907_v41 = vpack.c.bf16 %v9159_v38, %v9156_v32  ;;  %v10760_v31 = vld [vmem:[%s13581_s1 + $0x80] sm:$0xff]  }
 0x49b   : > { %9899 = vmatpush1.bf16.msra.mxu1 %v9898_v40  ;;  %9517 = vmatpush3.bf16.msra.mxu0 %v10757_v28 }
 0x49c   : > { %9900 = vmatprep.subr.bf16.mxu1 %v10973_v6  ;;  %9522 = vmatprep.subr.bf16.mxu0 %v10759_v30 }
 0x49f   : > { %9902 = vmatpush1.bf16.msra.mxu1 %v9901_v22  ;;  %v4643_v22 = vld [vmem:[#allocation5 + $0x10] sm:$0xff] }
 0x4a0   : > { %9903 = vmatprep.subr.bf16.mxu1 %v10973_v6  ;;  %v4653_v32 = vpop.permute.xlu1 %4652 }
 0x4a4   : > { %v4658_v36 = vpop.permute.xlu1 %4657 }
 0x4b3   : > { %v9132_v45 = vpop.f32.mrb[28].mxu1 }
 0x4b4   : > { %v9198_v46 = vpop.f32.mrb[28].mxu0  ;;  %v9133_v47 = vpop.f32.mrb[29].mxu1 }
 0x4b5   : > { %v9134_v49 = vadd.f32 %v9133_v47, %v9132_v45  ;;  %v9199_v50 = vpop.f32.mrb[29].mxu0  ;;  %v9135_v51 = vpop.f32.mrb[30].mxu1 }
 0x4b6   : > { %v9200_v52 = vadd.f32 %v9199_v50, %v9198_v46  ;;  %v9201_v53 = vpop.f32.mrb[30].mxu0  ;;  %v9136_v54 = vpop.f32.mrb[31].mxu1  ;;  %v10761_v50 = vld [vmem:[%s13581_s1 + $0x28] sm:$0xff]  }
 0x4b7   : > { %v9137_v55 = vadd.f32 %v9136_v54, %v9135_v51  ;;  %v9202_v56 = vpop.f32.mrb[31].mxu0  ;;  %v10762_v51 = vld [vmem:[%s13581_s1 + $0x88] sm:$0xff]   ;;  %v10765_v54 = vld [vmem:[%s13581_s1 + $0x38] sm:$0xff]  }
 0x4b8   : > { %v9203_v57 = vadd.f32 %v9202_v56, %v9201_v53  ;;  %v10764_v53 = vld [vmem:[%s13581_s1 + $0x90] sm:$0xff]   ;;  %v10767_v56 = vld [vmem:[%s13581_s1 + $0x60] sm:$0xff]  }
 0x4b9   : > { %v9904_v58 = vpack.c.bf16 %v9137_v55, %v9134_v49  ;;  %v10766_v55 = vld [vmem:[%s13581_s1 + $0x98] sm:$0xff]  }
 0x4ba   : > { %v9913_v59 = vpack.c.bf16 %v9203_v57, %v9200_v52  ;;  %v10763_v52 = vld [vmem:[%s13581_s1 + $0x30] sm:$0xff]   ;;  %v10768_v57 = vld [vmem:[%s13581_s1 + $0xc0] sm:$0xff]  }
 0x4bb   : > { %9905 = vmatpush1.bf16.msra.mxu1 %v9904_v58  ;;  %v10769_v58 = vld [vmem:[%s13581_s1 + $0x68] sm:$0xff]  }
 0x4bc   : > { %9906 = vmatprep.subr.bf16.mxu1 %v10973_v6 }
 0x4bf   : > { %9908 = vmatpush1.bf16.msra.mxu1 %v9907_v41 }
 0x4c0   : > { %9909 = vmatprep.subr.bf16.mxu1 %v10973_v6 }
 0x4d3   : > { %v9176_v60 = vpop.f32.mrb[32].mxu1 }
 0x4d4   : > { %v9242_v61 = vpop.f32.mrb[32].mxu0  ;;  %v9177_v20 = vpop.f32.mrb[33].mxu1 }
 0x4d5   : > { %v9178_v62 = vadd.f32 %v9177_v20, %v9176_v60  ;;  %v9243_v63 = vpop.f32.mrb[33].mxu0  ;;  %v9179_v0 = vpop.f32.mrb[34].mxu1  ;;  %v10771_v60 = vld [vmem:[%s13581_s1 + $0x70] sm:$0xff]   ;;  %v10773_v20 = vld [vmem:[%s13581_s1 + $0x78] sm:$0xff]  }
 0x4d6   : > { %v9244_v1 = vadd.f32 %v9243_v63, %v9242_v61  ;;  %v9245_v2 = vpop.f32.mrb[34].mxu0  ;;  %v9180_v3 = vpop.f32.mrb[35].mxu1  ;;  %v10772_v61 = vld [vmem:[%s13581_s1 + $0xd0] sm:$0xff]   ;;  %v10775_v63 = vld [vmem:[%s13581_s1 + $0xa0] sm:$0xff]  }
 0x4d7   : > { %v9181_v4 = vadd.f32 %v9180_v3, %v9179_v0  ;;  %v9246_v5 = vpop.f32.mrb[35].mxu0  ;;  %v10776_v0 = vld [vmem:[%s13581_s1 + $0x100] sm:$0xff]   ;;  %v10779_v3 = vld [vmem:[%s13581_s1 + $0xb0] sm:$0xff]  }
 0x4d8   : > { %v9247_v7 = vadd.f32 %v9246_v5, %v9245_v2  ;;  %v10778_v2 = vld [vmem:[%s13581_s1 + $0x108] sm:$0xff]   ;;  %v10781_v5 = vld [vmem:[%s13581_s1 + $0xb8] sm:$0xff]  }
 0x4d9   : > { %v9910_v8 = vpack.c.bf16 %v9181_v4, %v9178_v62  ;;  %v10774_v62 = vld [vmem:[%s13581_s1 + $0xd8] sm:$0xff]   ;;  %v10780_v4 = vld [vmem:[%s13581_s1 + $0x110] sm:$0xff]  }
 0x4da   : > { %v9919_v10 = vpack.c.bf16 %v9247_v7, %v9244_v1  ;;  %v10777_v1 = vld [vmem:[%s13581_s1 + $0xa8] sm:$0xff]   ;;  %v10782_v7 = vld [vmem:[%s13581_s1 + $0x118] sm:$0xff]  }
 0x4db   : > { %9911 = vmatpush1.bf16.msra.mxu1 %v9910_v8  ;;  %v10783_v8 = vld [vmem:[%s13581_s1 + $0xe0] sm:$0xff]  }
 0x4dc   : > { %9912 = vmatprep.subr.bf16.mxu1 %v10973_v6 }
 0x4df   : > { %9914 = vmatpush1.bf16.msra.mxu1 %v9913_v59  ;;  %v10770_v59 = vld [vmem:[%s13581_s1 + $0xc8] sm:$0xff]  }
 0x4e0   : > { %9915 = vmatprep.subr.bf16.mxu1 %v10973_v6 }
 0x4f3   : > { %v9220_v11 = vpop.f32.mrb[36].mxu1 }
 0x4f4   : > { %v9221_v12 = vpop.f32.mrb[37].mxu1 }
 0x4f5   : > { %v9222_v13 = vadd.f32 %v9221_v12, %v9220_v11  ;;  %v9223_v14 = vpop.f32.mrb[38].mxu1  ;;  %v10785_v11 = vld [vmem:[%s13581_s1 + $0xf0] sm:$0xff]   ;;  %v10786_v12 = vld [vmem:[%s13581_s1 + $0xf8] sm:$0xff]  }
 0x4f6   : > { %v9224_v15 = vpop.f32.mrb[39].mxu1 }
 0x4f7   : > { %v9225_v16 = vadd.f32 %v9224_v15, %v9223_v14 }
 0x4f9   : > { %v9916_v17 = vpack.c.bf16 %v9225_v16, %v9222_v13  ;;  %v5496_v13 = vld [vmem:[%s13582_s25 + $0x8] sm:$0xff] }
 0x4fb   : > { %9917 = vmatpush1.bf16.msra.mxu1 %v9916_v17 }
 0x4fc   : > { %9918 = vmatprep.subr.bf16.mxu1 %v10973_v6 }
 0x4ff   : > { %9920 = vmatpush1.bf16.msra.mxu1 %v9919_v10  ;;  %v10784_v10 = vld [vmem:[%s13581_s1 + $0xe8] sm:$0xff]   ;;  %s10975_s1 = smov 64  }
 0x500   : > { %9534 = vmatprep.subr.bf16.mxu1 %v10752_v18 }
 0x502   : > { %4740 = vmatmul.mubr.f32.vlgmr.msra.gmra.mrb[40].mxu1 %v4641_v19 }
 0x503   : > { %8825 = vmatprep.mubr.msk.f32.mxu1 %vm4665_vm1, %v4644_v21  ;;  %9535 = vmatpush3.bf16.msra.mxu1 %v10752_v18 }
 0x504   : > { %9536 = vmatprep.subr.bf16.mxu1 %v10754_v25 }
 0x506   : > { %4745 = vmatmul.mubr.f32.gmra.mrb[42].mxu1 %v4643_v22 }
 0x507   : > { %8826 = vmatprep.mubr.msk.f32.mxu1 %vm4665_vm1, %v4646_v23  ;;  %9537 = vmatpush3.bf16.msra.mxu1 %v10754_v25 }
 0x508   : > { %9538 = vmatprep.subr.bf16.mxu1 %v10756_v27 }
 0x50a   : > { %4750 = vmatmul.mubr.f32.gmra.mrb[44].mxu1 %v4645_v48 }
 0x50b   : > { %9539 = vmatpush3.bf16.msra.mxu1 %v10756_v27 }
 0x50c   : > { %9540 = vmatprep.subr.bf16.mxu1 %v10758_v29 }
 0x50f   : > { %9541 = vmatpush3.bf16.msra.mxu1 %v10758_v29 }
 0x510   : > { %9558 = vmatprep.subr.bf16.mxu1 %v10760_v31 }
 0x5d5   : > { %v4741_v33 = vpop.f32.mrb[40].mxu1 }
 0x5d6   : > { %v4743_v34 = vpop.f32.mrb[41].mxu1  ;;  %v4742_v35 = vadd.f32 %v4741_v33, %v4653_v32 }
 0x5d8   : > { %v4755_v40 = vmax.f32 %v4742_v35, 0.0 }
 0x5d9   : > { %v4746_v37 = vpop.f32.mrb[42].mxu1 }
 0x5da   : > { %v4747_v38 = vadd.f32 %v4746_v37, %v4658_v36  ;;  %v4748_v39 = vpop.f32.mrb[43].mxu1 }
 0x5dc   : > { %v4756_v41 = vmax.f32 %v4747_v38, 0.0 }
 0x5dd   : > { %v4751_v43 = vpop.f32.mrb[44].mxu1 }
 0x5de   : > { %v12727_v44 = vpack.c.bf16 %v4756_v41, %v4755_v40  ;;  %v4752_v45 = vadd.f32 %v4751_v43, %v4663_v42  ;;  %v4753_v46 = vpop.f32.mrb[45].mxu1 }
 0x5e0   : > { %v4757_v47 = vmax.f32 %v4752_v45, 0.0  ;;  %9518 = vmatprep.mubr.msk.bf16.mxu0 %vm4792_vm2, %v12727_v44  ;;  %9542 = vmatprep.mubr.msk.bf16.mxu1 %vm4792_vm2, %v12727_v44 }
 0x5e2   : > { %v12733_v49 = vpack.c.bf16 %v4757_v47, %v4757_v47 }
 0x5e4   : > { %9519 = vmatmul.mubr.msk.bf16.vlgmr.msra.gmra.mrb[36].mxu0 %vm4792_vm2, %v12733_v49  ;;  %9543 = vmatmul.mubr.msk.bf16.vlgmr.msra.gmra.mrb[48].mxu1 %vm4792_vm2, %v12733_v49 }
 0x5e5   : > { %9523 = vmatpush3.bf16.msra.mxu0 %v10759_v30  ;;  %9559 = vmatpush3.bf16.msra.mxu1 %v10760_v31 }
 0x5e6   : > { %9530 = vmatprep.mubr.msk.bf16.mxu0 %vm4792_vm2, %v12727_v44  ;;  %9566 = vmatprep.mubr.msk.bf16.mxu1 %vm4792_vm2, %v12727_v44 }
 0x5e7   : > { %9524 = vmatprep.subr.bf16.mxu0 %v10761_v50  ;;  %9560 = vmatprep.subr.bf16.mxu1 %v10762_v51 }
 0x5e9   : > { %9525 = vmatpush3.bf16.msra.mxu0 %v10761_v50  ;;  %9561 = vmatpush3.bf16.msra.mxu1 %v10762_v51 }
 0x5ea   : > { %9526 = vmatprep.subr.bf16.mxu0 %v10763_v52  ;;  %9562 = vmatprep.subr.bf16.mxu1 %v10764_v53 }
 0x5ed   : > { %9527 = vmatpush3.bf16.msra.mxu0 %v10763_v52  ;;  %9563 = vmatpush3.bf16.msra.mxu1 %v10764_v53 }
 0x5ee   : > { %9528 = vmatprep.subr.bf16.mxu0 %v10765_v54  ;;  %9564 = vmatprep.subr.bf16.mxu1 %v10766_v55 }
 0x5f1   : > { %9529 = vmatpush3.bf16.msra.mxu0 %v10765_v54  ;;  %9565 = vmatpush3.bf16.msra.mxu1 %v10766_v55 }
 0x5f2   : > { %9546 = vmatprep.subr.bf16.mxu0 %v10767_v56  ;;  %9582 = vmatprep.subr.bf16.mxu1 %v10768_v57 }
 0x5f4   : > { %9531 = vmatmul.mubr.msk.bf16.vlgmr.msra.gmra.mrb[40].mxu0 %vm4792_vm2, %v12733_v49  ;;  %9567 = vmatmul.mubr.msk.bf16.vlgmr.msra.gmra.mrb[52].mxu1 %vm4792_vm2, %v12733_v49 }
 0x5f5   : > { %9547 = vmatpush3.bf16.msra.mxu0 %v10767_v56  ;;  %9554 = vmatprep.mubr.msk.bf16.mxu0 %vm4792_vm2, %v12727_v44 }
 0x5f6   : > { %9583 = vmatpush3.bf16.msra.mxu1 %v10768_v57  ;;  %9590 = vmatprep.mubr.msk.bf16.mxu1 %vm4792_vm2, %v12727_v44 }
 0x5f7   : > { %9548 = vmatprep.subr.bf16.mxu0 %v10769_v58  ;;  %9584 = vmatprep.subr.bf16.mxu1 %v10770_v59 }
 0x5f9   : > { %9549 = vmatpush3.bf16.msra.mxu0 %v10769_v58 }
 0x5fa   : > { %9585 = vmatpush3.bf16.msra.mxu1 %v10770_v59  ;;  %9550 = vmatprep.subr.bf16.mxu0 %v10771_v60 }
 0x5fb   : > { %9586 = vmatprep.subr.bf16.mxu1 %v10772_v61 }
 0x5fd   : > { %9551 = vmatpush3.bf16.msra.mxu0 %v10771_v60 }
 0x5fe   : > { %9587 = vmatpush3.bf16.msra.mxu1 %v10772_v61  ;;  %9552 = vmatprep.subr.bf16.mxu0 %v10773_v20 }
 0x5ff   : > { %9588 = vmatprep.subr.bf16.mxu1 %v10774_v62 }
 0x601   : > { %9553 = vmatpush3.bf16.msra.mxu0 %v10773_v20 }
 0x602   : > { %9589 = vmatpush3.bf16.msra.mxu1 %v10774_v62  ;;  %9570 = vmatprep.subr.bf16.mxu0 %v10775_v63 }
 0x603   : > { %9606 = vmatprep.subr.bf16.mxu1 %v10776_v0 }
 0x604   : > { %9555 = vmatmul.mubr.msk.bf16.vlgmr.msra.gmra.mrb[44].mxu0 %vm4792_vm2, %v12733_v49 }
 0x605   : > { %9591 = vmatmul.mubr.msk.bf16.vlgmr.msra.gmra.mrb[56].mxu1 %vm4792_vm2, %v12733_v49  ;;  %9571 = vmatpush3.bf16.msra.mxu0 %v10775_v63  ;;  %v5495_v63 = vld [vmem:[%s13582_s25] sm:$0xff] }
 0x606   : > { %9578 = vmatprep.mubr.msk.bf16.mxu0 %vm4792_vm2, %v12727_v44  ;;  %9607 = vmatpush3.bf16.msra.mxu1 %v10776_v0  ;;  %v5498_v0 = vld [vmem:[%s13582_s25 + $0x18] sm:$0xff] }
 0x607   : > { %9614 = vmatprep.mubr.msk.bf16.mxu1 %vm4792_vm2, %v12727_v44  ;;  %9572 = vmatprep.subr.bf16.mxu0 %v10777_v1 }
 0x608   : > { %9608 = vmatprep.subr.bf16.mxu1 %v10778_v2 }
 0x609   : > { %9573 = vmatpush3.bf16.msra.mxu0 %v10777_v1  ;;  %v5497_v1 = vld [vmem:[%s13582_s25 + $0x10] sm:$0xff] }
 0x60a   : > { %9609 = vmatpush3.bf16.msra.mxu1 %v10778_v2  ;;  %9574 = vmatprep.subr.bf16.mxu0 %v10779_v3  ;;  %v5500_v2 = vld [vmem:[%s13582_s25 + $0x28] sm:$0xff] }
 0x60b   : > { %9610 = vmatprep.subr.bf16.mxu1 %v10780_v4 }
 0x60d   : > { %9575 = vmatpush3.bf16.msra.mxu0 %v10779_v3  ;;  %v5499_v3 = vld [vmem:[%s13582_s25 + $0x20] sm:$0xff] }
 0x60e   : > { %9611 = vmatpush3.bf16.msra.mxu1 %v10780_v4  ;;  %9576 = vmatprep.subr.bf16.mxu0 %v10781_v5  ;;  %v5502_v4 = vld [vmem:[%s13582_s25 + $0x38] sm:$0xff] }
 0x60f   : > { %9612 = vmatprep.subr.bf16.mxu1 %v10782_v7 }
 0x611   : > { %9577 = vmatpush3.bf16.msra.mxu0 %v10781_v5  ;;  %v5501_v5 = vld [vmem:[%s13582_s25 + $0x30] sm:$0xff] }
 0x612   : > { %9613 = vmatpush3.bf16.msra.mxu1 %v10782_v7  ;;  %9594 = vmatprep.subr.bf16.mxu0 %v10783_v8  ;;  %v10787_v7 = vld [vmem:[%s13583_s8] sm:$0xff]   ;;  %s13585_s8 = sld [smem:[#allocation16_spill]] }
 0x613   : > { %9618 = vmatprep.subr.bf16.mxu1 %v10787_v7 }
 0x614   : > { %9579 = vmatmul.mubr.msk.bf16.vlgmr.msra.gmra.mrb[48].mxu0 %vm4792_vm2, %v12733_v49 }
 0x615   : > { %9615 = vmatmul.mubr.msk.bf16.vlgmr.msra.gmra.mrb[60].mxu1 %vm4792_vm2, %v12733_v49  ;;  %9595 = vmatpush3.bf16.msra.mxu0 %v10783_v8  ;;  %v10788_v8 = vld [vmem:[%s13584_s7 + $0x38] sm:$0xff]  }
 0x616   : > { %9602 = vmatprep.mubr.msk.bf16.mxu0 %vm4792_vm2, %v12727_v44  ;;  %9596 = vmatprep.subr.bf16.mxu0 %v10784_v10 }
 0x617   : > { %9619 = vmatpush3.bf16.msra.mxu1 %v10787_v7 }
 0x618   : > { %s894_s28 = scalar_lea.vmem %s13585_s8, %s13591_s5  ;;  %s10977_s8 = smov 32  }
 0x619   : > { %9597 = vmatpush3.bf16.msra.mxu0 %v10784_v10  ;;  %v10789_v10 = vld [vmem:[%s13584_s7 + $0x8] sm:$0xff]  }
 0x61a   : > { %9598 = vmatprep.subr.bf16.mxu0 %v10785_v11  ;;  %9624 = vmatprep.subr.bf16.mxu1 %v10789_v10 }
 0x61d   : > { %9599 = vmatpush3.bf16.msra.mxu0 %v10785_v11 }
 0x61e   : > { %9600 = vmatprep.subr.bf16.mxu0 %v10786_v12 }
 0x621   : > { %9601 = vmatpush3.bf16.msra.mxu0 %v10786_v12 }
 0x622   : > { %9921 = vmatprep.subr.bf16.mxu0 %v10973_v6 }
 0x624   : > { %9603 = vmatmul.mubr.msk.bf16.vlgmr.msra.gmra.mrb[52].mxu0 %vm4792_vm2, %v12733_v49 }
 0x625   : > { %8945 = vmatprep.mubr.msk.f32.mxu0 %vm5527_vm3, %v5496_v13  ;;  %v5510_v13 = vpop.permute.xlu1 %5509 }
 0x6b7   : > { %v9520_v14 = vpop.f32.mrb[36].mxu0  ;;  %v9544_v15 = vpop.f32.mrb[48].mxu1 }
 0x6b8   : > { %v4833_v16 = vpop.f32.mrb[37].mxu0  ;;  %v4995_v17 = vpop.f32.mrb[49].mxu1 }
 0x6b9   : > { %v9521_v18 = vpop.f32.mrb[38].mxu0  ;;  %v9545_v19 = vpop.f32.mrb[50].mxu1 }
 0x6ba   : > { %v4836_v21 = vpop.f32.mrb[39].mxu0  ;;  %v4998_v22 = vpop.f32.mrb[51].mxu1 }
 0x6bb   : > { %v9922_v23 = vpack.c.bf16 %v4836_v21, %v4833_v16  ;;  %v9931_v48 = vpack.c.bf16 %v4998_v22, %v4995_v17 }
 0x6bd   : > { %9923 = vmatpush1.bf16.msra.mxu0 %v9922_v23 }
 0x6be   : > { %9924 = vmatprep.subr.bf16.mxu0 %v10973_v6 }
 0x6c7   : > { %v9532_v24 = vpop.f32.mrb[40].mxu0  ;;  %v9568_v25 = vpop.f32.mrb[52].mxu1 }
 0x6c8   : > { %v4914_v26 = vpop.f32.mrb[41].mxu0  ;;  %v5157_v27 = vpop.f32.mrb[53].mxu1 }
 0x6c9   : > { %v9925_v28 = vpack.c.bf16 %v4914_v26, %v9520_v14  ;;  %v9533_v29 = vpop.f32.mrb[42].mxu0  ;;  %v9569_v30 = vpop.f32.mrb[54].mxu1 }
 0x6ca   : > { %v4917_v31 = vpop.f32.mrb[43].mxu0  ;;  %v5160_v32 = vpop.f32.mrb[55].mxu1 }
 0x6cb   : > { %v9928_v33 = vpack.c.bf16 %v9532_v24, %v4917_v31  ;;  %v9940_v34 = vpack.c.bf16 %v5160_v32, %v5157_v27  ;;  %9926 = vmatpush1.bf16.msra.mxu0 %v9925_v28  ;;  %v5520_v24 = vpop.permute.xlu1 %5519 }
 0x6cc   : > { %9927 = vmatprep.subr.bf16.mxu0 %v10973_v6 }
 0x6cf   : > { %9929 = vmatpush1.bf16.msra.mxu0 %v9928_v33  ;;  %v10790_v33 = vld [vmem:[%s13584_s7 + $0x10] sm:$0xff]  }
 0x6d0   : > { %9930 = vmatprep.subr.bf16.mxu0 %v10973_v6 }
 0x6d3   : > { %9932 = vmatpush1.bf16.msra.mxu0 %v9931_v48 }
 0x6d4   : > { %9933 = vmatprep.subr.bf16.mxu0 %v10973_v6 }
 0x6d7   : > { %v9556_v35 = vpop.f32.mrb[44].mxu0 }
 0x6d8   : > { %v9592_v36 = vpop.f32.mrb[56].mxu1  ;;  %v5076_v37 = vpop.f32.mrb[45].mxu0 }
 0x6d9   : > { %v9934_v38 = vpack.c.bf16 %v5076_v37, %v9544_v15  ;;  %v5319_v39 = vpop.f32.mrb[57].mxu1  ;;  %v9557_v40 = vpop.f32.mrb[46].mxu0  ;;  %v10794_v37 = vld [vmem:[%s13584_s7 + $0x30] sm:$0xff]  }
 0x6da   : > { %v9593_v41 = vpop.f32.mrb[58].mxu1  ;;  %v5079_v42 = vpop.f32.mrb[47].mxu0  ;;  %v6160_v40 = vld [vmem:[%s13514_s12 + $0x10] sm:$0xff] }
 0x6db   : > { %v9937_v43 = vpack.c.bf16 %v9556_v35, %v5079_v42  ;;  %v5322_v44 = vpop.f32.mrb[59].mxu1  ;;  %9935 = vmatpush1.bf16.msra.mxu0 %v9934_v38  ;;  %v5515_v15 = vpop.permute.xlu0 %5514  ;;  %v10792_v35 = vld [vmem:[%s13584_s7 + $0x20] sm:$0xff]  }
 0x6dc   : > { %v9949_v45 = vpack.c.bf16 %v5322_v44, %v5319_v39  ;;  %9936 = vmatprep.subr.bf16.mxu0 %v10973_v6  ;;  %v10795_v38 = vld [vmem:[%s13584_s7 + $0x40] sm:$0xff]   ;;  %v6159_v39 = vld [vmem:[%s13514_s12 + $0x8] sm:$0xff] }
 0x6df   : > { %9938 = vmatpush1.bf16.msra.mxu0 %v9937_v43  ;;  %v5525_v26 = vpop.permute.xlu0 %5524 }
 0x6e0   : > { %9939 = vmatprep.subr.bf16.mxu0 %v10973_v6 }
 0x6e3   : > { %9941 = vmatpush1.bf16.msra.mxu0 %v9940_v34  ;;  %v10791_v34 = vld [vmem:[%s13584_s7 + $0x18] sm:$0xff]  }
 0x6e4   : > { %9942 = vmatprep.subr.bf16.mxu0 %v10973_v6 }
 0x6e7   : > { %v9580_v46 = vpop.f32.mrb[48].mxu0 }
 0x6e8   : > { %v9616_v47 = vpop.f32.mrb[60].mxu1  ;;  %v5238_v49 = vpop.f32.mrb[49].mxu0 }
 0x6e9   : > { %v9943_v50 = vpack.c.bf16 %v5238_v49, %v9568_v25  ;;  %v5481_v51 = vpop.f32.mrb[61].mxu1  ;;  %v9581_v52 = vpop.f32.mrb[50].mxu0 }
 0x6ea   : > { %v9617_v53 = vpop.f32.mrb[62].mxu1  ;;  %v5241_v54 = vpop.f32.mrb[51].mxu0 }
 0x6eb   : > { %v9946_v55 = vpack.c.bf16 %v9580_v46, %v5241_v54  ;;  %v5484_v56 = vpop.f32.mrb[63].mxu1  ;;  %9944 = vmatpush1.bf16.msra.mxu0 %v9943_v50 }
 0x6ec   : > { %v9958_v57 = vpack.c.bf16 %v5484_v56, %v5481_v51  ;;  %9945 = vmatprep.subr.bf16.mxu0 %v10973_v6 }
 0x6ef   : > { %9947 = vmatpush1.bf16.msra.mxu0 %v9946_v55 }
 0x6f0   : > { %9948 = vmatprep.subr.bf16.mxu0 %v10973_v6 }
 0x6f3   : > { %9950 = vmatpush1.bf16.msra.mxu0 %v9949_v45 }
 0x6f4   : > { %9951 = vmatprep.subr.bf16.mxu0 %v10973_v6 }
 0x6f7   : > { %v9604_v58 = vpop.f32.mrb[52].mxu0 }
 0x6f8   : > { %v5400_v59 = vpop.f32.mrb[53].mxu0 }
 0x6f9   : > { %v9952_v60 = vpack.c.bf16 %v5400_v59, %v9592_v36  ;;  %v9605_v61 = vpop.f32.mrb[54].mxu0  ;;  %v10793_v36 = vld [vmem:[%s13584_s7 + $0x28] sm:$0xff]  }
 0x6fa   : > { %v5403_v20 = vpop.f32.mrb[55].mxu0 }
 0x6fb   : > { %v9955_v62 = vpack.c.bf16 %v9604_v58, %v5403_v20  ;;  %9953 = vmatpush1.bf16.msra.mxu0 %v9952_v60 }
 0x6fc   : > { %9954 = vmatprep.subr.bf16.mxu0 %v10973_v6 }
 0x6ff   : > { %9956 = vmatpush1.bf16.msra.mxu0 %v9955_v62 }
 0x700   : > { %9957 = vmatprep.subr.bf16.mxu0 %v10973_v6 }
 0x703   : > { %9959 = vmatpush1.bf16.msra.mxu0 %v9958_v57 }
 0x704   : > { %5592 = vmatprep.subr.mxu0 %v10971_v9 }
 0x707   : > { %5593 = vmatpush1.msra.mxu0 %v9616_v47 }
 0x708   : > { %5605 = vmatmul.mubr.f32.vlgmr.msra.gmra.mrb[56].mxu0 %v5495_v63  ;;  %9660 = vmatprep.subr.bf16.mxu0 %v10788_v8 }
 0x709   : > { %8946 = vmatprep.mubr.msk.f32.mxu0 %vm5527_vm3, %v5498_v0  ;;  %9661 = vmatpush3.bf16.msra.mxu0 %v10788_v8 }
 0x70c   : > { %5610 = vmatmul.mubr.f32.gmra.mrb[58].mxu0 %v5497_v1 }
 0x70d   : > { %8947 = vmatprep.mubr.msk.f32.mxu0 %vm5527_vm3, %v5500_v2 }
 0x710   : > { %5615 = vmatmul.mubr.f32.gmra.mrb[60].mxu0 %v5499_v3 }
 0x711   : > { %8948 = vmatprep.mubr.msk.f32.mxu0 %vm5527_vm3, %v5502_v4 }
 0x714   : > { %5620 = vmatmul.mubr.f32.gmra.mrb[62].mxu0 %v5501_v5 }
 0x7db   : > { %v5606_v11 = vpop.f32.mrb[56].mxu0 }
 0x7dc   : > { %v5608_v12 = vpop.f32.mrb[57].mxu0  ;;  %v5607_v14 = vadd.f32 %v5606_v11, %v5510_v13 }
 0x7de   : > { %v5625_v19 = vmax.f32 %v5607_v14, 0.0 }
 0x7df   : > { %v5611_v16 = vpop.f32.mrb[58].mxu0 }
 0x7e0   : > { %v5612_v17 = vadd.f32 %v5611_v16, %v5515_v15  ;;  %v5613_v18 = vpop.f32.mrb[59].mxu0 }
 0x7e2   : > { %v5626_v21 = vmax.f32 %v5612_v17, 0.0 }
 0x7e3   : > { %v5616_v22 = vpop.f32.mrb[60].mxu0 }
 0x7e4   : > { %v5629_v23 = vpack.c.bf16 %v5626_v21, %v5625_v19  ;;  %v5618_v48 = vpop.f32.mrb[61].mxu0  ;;  %v5617_v25 = vadd.f32 %v5616_v22, %v5520_v24 }
 0x7e6   : > { %9620 = vmatprep.mubr.msk.bf16.mxu1 %vm4665_vm1, %v5629_v23  ;;  %9662 = vmatprep.mubr.msk.bf16.mxu0 %vm4665_vm1, %v5629_v23  ;;  %v5627_v30 = vmax.f32 %v5617_v25, 0.0 }
 0x7e7   : > { %v5621_v27 = vpop.f32.mrb[62].mxu0 }
 0x7e8   : > { %v5622_v28 = vadd.f32 %v5621_v27, %v5525_v26  ;;  %v5623_v29 = vpop.f32.mrb[63].mxu0 }
 0x7ea   : > { %v5628_v31 = vmax.f32 %v5622_v28, 0.0 }
 0x7ec   : > { %v5630_v32 = vpack.c.bf16 %v5628_v31, %v5627_v30 }
 0x7ee   : > { %9621 = vmatmul.mubr.msk.bf16.vlgmr.msra.gmra.mrb[64].mxu1 %vm4665_vm1, %v5630_v32  ;;  %9663 = vmatmul.mubr.msk.bf16.vlgmr.msra.gmra.mrb[64].mxu0 %vm4665_vm1, %v5630_v32 }
 0x7ef   : > { %9625 = vmatpush3.bf16.msra.mxu1 %v10789_v10  ;;  %9626 = vmatprep.mubr.msk.bf16.mxu1 %vm4665_vm1, %v5629_v23 }
 0x7f0   : > { %9630 = vmatprep.subr.bf16.mxu1 %v10790_v33  ;;  %6295 = vmatprep.mubr.f32.mxu0 %v6159_v39  ;;  %v6165_v39 = vld [vmem:[%s13514_s12 + $0x38] sm:$0xff] }
 0x7f6   : > { %9627 = vmatmul.mubr.msk.bf16.vlgmr.msra.gmra.mrb[68].mxu1 %vm4665_vm1, %v5630_v32 }
 0x7f7   : > { %9631 = vmatpush3.bf16.msra.mxu1 %v10790_v33  ;;  %9632 = vmatprep.mubr.msk.bf16.mxu1 %vm4665_vm1, %v5629_v23  ;;  %v6158_v33 = vld [vmem:[%s13514_s12] sm:$0xff] }
 0x7f8   : > { %9636 = vmatprep.subr.bf16.mxu1 %v10791_v34 }
 0x7fe   : > { %9633 = vmatmul.mubr.msk.bf16.vlgmr.msra.gmra.mrb[72].mxu1 %vm4665_vm1, %v5630_v32 }
 0x7ff   : > { %9637 = vmatpush3.bf16.msra.mxu1 %v10791_v34  ;;  %9638 = vmatprep.mubr.msk.bf16.mxu1 %vm4665_vm1, %v5629_v23  ;;  %v6163_v34 = vld [vmem:[%s13514_s12 + $0x28] sm:$0xff] }
 0x800   : > { %9642 = vmatprep.subr.bf16.mxu1 %v10792_v35 }
 0x806   : > { %9639 = vmatmul.mubr.msk.bf16.vlgmr.msra.gmra.mrb[76].mxu1 %vm4665_vm1, %v5630_v32 }
 0x807   : > { %9643 = vmatpush3.bf16.msra.mxu1 %v10792_v35  ;;  %9644 = vmatprep.mubr.msk.bf16.mxu1 %vm4665_vm1, %v5629_v23  ;;  %v6162_v35 = vld [vmem:[%s13514_s12 + $0x20] sm:$0xff] }
 0x808   : > { %9648 = vmatprep.subr.bf16.mxu1 %v10793_v36 }
 0x80e   : > { %9645 = vmatmul.mubr.msk.bf16.vlgmr.msra.gmra.mrb[80].mxu1 %vm4665_vm1, %v5630_v32 }
 0x80f   : > { %9649 = vmatpush3.bf16.msra.mxu1 %v10793_v36  ;;  %9650 = vmatprep.mubr.msk.bf16.mxu1 %vm4665_vm1, %v5629_v23  ;;  %v6166_v36 = vld [vmem:[%s13514_s12 + $0x40] sm:$0xff] }
 0x810   : > { %9654 = vmatprep.subr.bf16.mxu1 %v10794_v37 }
 0x816   : > { %9651 = vmatmul.mubr.msk.bf16.vlgmr.msra.gmra.mrb[84].mxu1 %vm4665_vm1, %v5630_v32 }
 0x817   : > { %9655 = vmatpush3.bf16.msra.mxu1 %v10794_v37  ;;  %9656 = vmatprep.mubr.msk.bf16.mxu1 %vm4665_vm1, %v5629_v23  ;;  %v6161_v37 = vld [vmem:[%s13514_s12 + $0x18] sm:$0xff] }
 0x818   : > { %9666 = vmatprep.subr.bf16.mxu1 %v10795_v38 }
 0x81e   : > { %9657 = vmatmul.mubr.msk.bf16.vlgmr.msra.gmra.mrb[88].mxu1 %vm4665_vm1, %v5630_v32 }
 0x81f   : > { %9668 = vmatprep.mubr.msk.bf16.mxu1 %vm4665_vm1, %v5629_v23  ;;  %9667 = vmatpush3.bf16.msra.mxu1 %v10795_v38  ;;  %v6169_v38 = vld [vmem:[%s13514_s12 + $0x58] sm:$0xff] }
 0x826   : > { %9669 = vmatmul.mubr.msk.bf16.vlgmr.msra.gmra.mrb[92].mxu1 %vm4665_vm1, %v5630_v32 }
 0x827   : > { %9680 = vmatprep.mubr.msk.f32.mxu1 %vm6212_vm4, %v6160_v40  ;;  %v6172_v40 = vld [vmem:[%s13514_s12 + $0x70] sm:$0xff] }
 0x8c1   : > { %v9622_v41 = vpop.f32.mrb[64].mxu1  ;;  %v12939_v42 = vpop.f32.mrb[64].mxu0 }
 0x8c2   : > { %v5679_v43 = vpop.f32.mrb[65].mxu1  ;;  %v12941_v44 = vpop.f32.mrb[65].mxu0 }
 0x8c3   : > { %v9623_v45 = vpop.f32.mrb[66].mxu1  ;;  %v12943_v46 = vpop.f32.mrb[66].mxu0 }
 0x8c4   : > { %v9966_v47 = vpack.c.bf16 %v9623_v45, %v9622_v41  ;;  %v9988_v49 = vpack.c.bf16 %v12943_v46, %v12939_v42  ;;  %v5682_v50 = vpop.f32.mrb[67].mxu1  ;;  %v6088_v51 = vpop.f32.mrb[67].mxu0  ;;  %v6164_v41 = vld [vmem:[%s13514_s12 + $0x30] sm:$0xff]  ;;  %v6175_v42 = vld [vmem:[%s13514_s12 + $0x88] sm:$0xff]  ;;  %v6170_v46 = vld [vmem:[%s13514_s12 + $0x60] sm:$0xff] }
 0x8c5   : > { %v9962_v52 = vpack.c.bf16 %v5682_v50, %v5679_v43  ;;  %v9984_v53 = vpack.c.bf16 %v6088_v51, %v12941_v44  ;;  %v6168_v43 = vld [vmem:[%s13514_s12 + $0x50] sm:$0xff]  ;;  %v6167_v44 = vld [vmem:[%s13514_s12 + $0x48] sm:$0xff]  ;;  %v6430_v50 = vld [vmem:[%s13516_s14] sm:$0x3] }
 0x8c6   : > { %v6171_v45 = vld [vmem:[%s13514_s12 + $0x68] sm:$0xff]  ;;  %v6443_v51 = vsel %vm6441_vm5, %v6430_v50, 0 }
 0x8c9   : > { %v9628_v54 = vpop.f32.mrb[68].mxu1 }
 0x8ca   : > { %v5737_v55 = vpop.f32.mrb[69].mxu1 }
 0x8cb   : > { %v9629_v56 = vpop.f32.mrb[70].mxu1 }
 0x8cc   : > { %v9974_v57 = vpack.c.bf16 %v9629_v56, %v9628_v54  ;;  %v5740_v58 = vpop.f32.mrb[71].mxu1 }
 0x8cd   : > { %v9970_v59 = vpack.c.bf16 %v5740_v58, %v5737_v55 }
 0x8d1   : > { %v9634_v60 = vpop.f32.mrb[72].mxu1 }
 0x8d2   : > { %v5795_v61 = vpop.f32.mrb[73].mxu1 }
 0x8d3   : > { %v9635_v20 = vpop.f32.mrb[74].mxu1 }
 0x8d4   : > { %v9982_v62 = vpack.c.bf16 %v9635_v20, %v9634_v60  ;;  %v5798_v63 = vpop.f32.mrb[75].mxu1 }
 0x8d5   : > { %v9978_v0 = vpack.c.bf16 %v5798_v63, %v5795_v61 }
 0x8d9   : > { %v9640_v1 = vpop.f32.mrb[76].mxu1 }
 0x8da   : > { %v5853_v2 = vpop.f32.mrb[77].mxu1 }
 0x8db   : > { %v9641_v3 = vpop.f32.mrb[78].mxu1 }
 0x8dc   : > { %v9990_v4 = vpack.c.bf16 %v9641_v3, %v9640_v1  ;;  %v5856_v5 = vpop.f32.mrb[79].mxu1 }
 0x8dd   : > { %v9986_v7 = vpack.c.bf16 %v5856_v5, %v5853_v2  ;;  %v6190_v2 = vpop.permute.xlu0 %6189 }
 0x8e1   : > { %v9646_v8 = vpop.f32.mrb[80].mxu1 }
 0x8e2   : > { %v5911_v10 = vpop.f32.mrb[81].mxu1 }
 0x8e3   : > { %v9647_v11 = vpop.f32.mrb[82].mxu1 }
 0x8e4   : > { %v9964_v12 = vpack.c.bf16 %v9647_v11, %v9646_v8  ;;  %v5914_v13 = vpop.f32.mrb[83].mxu1 }
 0x8e5   : > { %v9960_v14 = vpack.c.bf16 %v5914_v13, %v5911_v10  ;;  %v9001_v13 = vld [vmem:[%s13516_s14 + $0x2] sm:$0x3] }
 0x8e7   : > { %9961 = vmatprep.subr.bf16.mxu0 %v9960_v14 }
 0x8e8   : > { %9963 = vmatpush3.bf16.msra.mxu0 %v9962_v52  ;;  %v9005_v52 = vld [vmem:[%s13516_s14 + $0x4] sm:$0x3] }
 0x8e9   : > { %v9652_v15 = vpop.f32.mrb[84].mxu1  ;;  %9965 = vmatprep.subr.bf16.mxu0 %v9964_v12 }
 0x8ea   : > { %v5969_v16 = vpop.f32.mrb[85].mxu1 }
 0x8eb   : > { %v9653_v17 = vpop.f32.mrb[86].mxu1 }
 0x8ec   : > { %v9972_v18 = vpack.c.bf16 %v9653_v17, %v9652_v15  ;;  %v5972_v19 = vpop.f32.mrb[87].mxu1  ;;  %9967 = vmatpush3.bf16.msra.mxu0 %v9966_v47  ;;  %v6174_v47 = vld [vmem:[%s13514_s12 + $0x80] sm:$0xff] }
 0x8ed   : > { %v9968_v21 = vpack.c.bf16 %v5972_v19, %v5969_v16 }
 0x8ef   : > { %9969 = vmatprep.subr.bf16.mxu0 %v9968_v21 }
 0x8f0   : > { %9971 = vmatpush3.bf16.msra.mxu0 %v9970_v59  ;;  %v6185_v59 = vpop.permute.xlu1 %6184 }
 0x8f1   : > { %v9658_v22 = vpop.f32.mrb[88].mxu1  ;;  %9973 = vmatprep.subr.bf16.mxu0 %v9972_v18  ;;  %v9013_v18 = vld [vmem:[%s13516_s14 + $0x8] sm:$0x3] }
 0x8f2   : > { %v6027_v23 = vpop.f32.mrb[89].mxu1 }
 0x8f3   : > { %v9659_v48 = vpop.f32.mrb[90].mxu1 }
 0x8f4   : > { %v9980_v24 = vpack.c.bf16 %v9659_v48, %v9658_v22  ;;  %v6030_v25 = vpop.f32.mrb[91].mxu1  ;;  %9975 = vmatpush3.bf16.msra.mxu0 %v9974_v57  ;;  %v6195_v12 = vpop.permute.xlu1 %6194  ;;  %v6505_v48 = vsel %vm6441_vm5, %v9001_v13, 0 }
 0x8f5   : > { %v9976_v26 = vpack.c.bf16 %v6030_v25, %v6027_v23  ;;  %v6691_v25 = vsel %vm6441_vm5, %v9013_v18, 0 }
 0x8f7   : > { %9977 = vmatprep.subr.bf16.mxu0 %v9976_v26 }
 0x8f8   : > { %9979 = vmatpush3.bf16.msra.mxu0 %v9978_v0 }
 0x8f9   : > { %v9670_v27 = vpop.f32.mrb[92].mxu1  ;;  %9981 = vmatprep.subr.bf16.mxu0 %v9980_v24  ;;  %v6200_v24 = vpop.permute.xlu0 %6199 }
 0x8fa   : > { %v6143_v28 = vpop.f32.mrb[93].mxu1 }
 0x8fb   : > { %v9671_v29 = vpop.f32.mrb[94].mxu1 }
 0x8fc   : > { %v9996_v30 = vpack.c.bf16 %v9671_v29, %v9670_v27  ;;  %v6146_v31 = vpop.f32.mrb[95].mxu1  ;;  %9983 = vmatpush3.bf16.msra.mxu0 %v9982_v62 }
 0x8fd   : > { %v9992_v32 = vpack.c.bf16 %v6146_v31, %v6143_v28  ;;  %9985 = vmatprep.subr.bf16.mxu0 %v9984_v53  ;;  %v6567_v53 = vsel %vm6441_vm5, %v9005_v52, 0  ;;  %v6205_v31 = vpop.permute.xlu1 %6204  ;;  %v9029_v52 = vld [vmem:[%s13516_s14 + $0x10] sm:$0x3] }
 0x8ff   : > { %9993 = vmatprep.subr.bf16.mxu1 %v9992_v32 }
 0x900   : > { %9987 = vmatpush3.bf16.msra.mxu0 %v9986_v7  ;;  %9995 = vmatpush3.bf16.msra.mxu1 %v9992_v32 }
 0x901   : > { %9989 = vmatprep.subr.bf16.mxu0 %v9988_v49  ;;  %9997 = vmatprep.subr.bf16.mxu1 %v9996_v30  ;;  %v6173_v49 = vld [vmem:[%s13514_s12 + $0x78] sm:$0xff] }
 0x904   : > { %9991 = vmatpush3.bf16.msra.mxu0 %v9990_v4  ;;  %9999 = vmatpush3.bf16.msra.mxu1 %v9996_v30 }
 0x905   : > { %9689 = vmatprep.subr.bf16.mxu1 %v10971_v9  ;;  %9717 = vmatprep.subr.bf16.mxu0 %v10971_v9 }
 0x907   : > { %6296 = vmatmul.mubr.f32.vlgmr.msra.gmra.mrb[68].mxu0 %v6158_v33  ;;  %9681 = vmatmul.mubr.msk.f32.vlgmr.msra.gmra.mrb[46].mxu1 %vm6212_vm4, %v6163_v34 }
 0x908   : > { %6300 = vmatprep.mubr.f32.mxu0 %v6162_v35  ;;  %9683 = vmatprep.mubr.msk.f32.mxu1 %vm6212_vm4, %v6166_v36 }
 0x909   : > { %9690 = vmatpush3.bf16.msra.mxu1 %v6443_v51  ;;  %9718 = vmatpush3.bf16.msra.mxu0 %v6567_v53  ;;  %v9017_v51 = vld [vmem:[%s13516_s14 + $0xa] sm:$0x3] }
 0x90a   : > { %9703 = vmatprep.subr.bf16.mxu1 %v10971_v9  ;;  %9745 = vmatprep.subr.bf16.mxu0 %v10971_v9  ;;  %v6753_v53 = vsel %vm6441_vm5, %v9017_v51, 0 }
 0x90b   : > { %6301 = vmatmul.mubr.f32.gmra.mrb[70].mxu0 %v6161_v37  ;;  %9684 = vmatmul.mubr.msk.f32.gmra.mrb[96].mxu1 %vm6212_vm4, %v6169_v38 }
 0x90c   : > { %6305 = vmatprep.mubr.f32.mxu0 %v6165_v39  ;;  %9686 = vmatprep.mubr.msk.f32.mxu1 %vm6212_vm4, %v6172_v40  ;;  %v6210_v40 = vpop.permute.xlu0 %6209 }
 0x90f   : > { %6306 = vmatmul.mubr.f32.gmra.mrb[72].mxu0 %v6164_v41  ;;  %9687 = vmatmul.mubr.msk.f32.gmra.mrb[98].mxu1 %vm6212_vm4, %v6175_v42 }
 0x910   : > { %6310 = vmatprep.mubr.f32.mxu0 %v6168_v43  ;;  %9691 = vmatprep.mubr.msk.bf16.mxu1 %vm10974_vm6, %v10971_v9 }
 0x913   : > { %6311 = vmatmul.mubr.f32.gmra.mrb[74].mxu0 %v6167_v44 }
 0x914   : > { %6315 = vmatprep.mubr.f32.mxu0 %v6171_v45 }
 0x917   : > { %6316 = vmatmul.mubr.f32.gmra.mrb[76].mxu0 %v6170_v46  ;;  %v9009_v46 = vld [vmem:[%s13516_s14 + $0x6] sm:$0x3] }
 0x918   : > { %6320 = vmatprep.mubr.f32.mxu0 %v6174_v47  ;;  %v9021_v47 = vld [vmem:[%s13516_s14 + $0xc] sm:$0x3] }
 0x919   : > { %v6815_v50 = vsel %vm6441_vm5, %v9021_v47, 0 }
 0x91b   : > { %6321 = vmatmul.mubr.f32.gmra.mrb[78].mxu0 %v6173_v49  ;;  %v6629_v49 = vsel %vm6441_vm5, %v9009_v46, 0 }
 0x91c   : > { %9719 = vmatprep.mubr.msk.bf16.mxu0 %vm10974_vm6, %v10971_v9 }
 0x9da   : > { %v9361_v54 = vpop.f32.mrb[68].mxu0  ;;  %v9682_v55 = vpop.f32.mrb[46].mxu1 }
 0x9db   : > { %v9362_v56 = vpop.f32.mrb[69].mxu0  ;;  %v6392_v57 = vpop.f32.mrb[47].mxu1 }
 0x9dc   : > { %v9363_v58 = vadd.f32 %v9362_v56, %v9361_v54  ;;  %v6939_v54 = vsel %vm6441_vm5, %v9029_v52, 0 }
 0x9de   : > { %v9364_v60 = vpop.f32.mrb[70].mxu0  ;;  %v6298_v61 = vadd.f32 %v9363_v58, %v6185_v59  ;;  %v9685_v20 = vpop.f32.mrb[96].mxu1 }
 0x9df   : > { %v9365_v62 = vpop.f32.mrb[71].mxu0  ;;  %v6402_v63 = vpop.f32.mrb[97].mxu1 }
 0x9e0   : > { %v9366_v0 = vadd.f32 %v9365_v62, %v9364_v60  ;;  %v6393_v1 = vadd.f32 %v6392_v57, %v6298_v61  ;;  %v6999_v57 = vld [vmem:[%s13517_s15 + $0x8] sm:$0xff] }
 0x9e2   : > { %v6303_v3 = vadd.f32 %v9366_v0, %v6190_v2  ;;  %v9367_v4 = vpop.f32.mrb[72].mxu0  ;;  %v9688_v5 = vpop.f32.mrb[98].mxu1  ;;  %v6421_v14 = vmax.f32 %v6393_v1, 0.0 }
 0x9e3   : > { %v9368_v7 = vpop.f32.mrb[73].mxu0  ;;  %v6412_v8 = vpop.f32.mrb[99].mxu1 }
 0x9e4   : > { %v6398_v10 = vadd.f32 %v9682_v55, %v6303_v3  ;;  %v9369_v11 = vadd.f32 %v9368_v7, %v9367_v4  ;;  %v9025_v55 = vld [vmem:[%s13516_s14 + $0xe] sm:$0x3] }
 0x9e5   : > { %v6877_v56 = vsel %vm6441_vm5, %v9025_v55, 0 }
 0x9e6   : > { %v6422_v15 = vmax.f32 %v6398_v10, 0.0  ;;  %v9370_v16 = vpop.f32.mrb[74].mxu0  ;;  %v6308_v17 = vadd.f32 %v9369_v11, %v6195_v12 }
 0x9e7   : > { %v9371_v19 = vpop.f32.mrb[75].mxu0 }
 0x9e8   : > { %v13023_v21 = vpack.c.bf16 %v6422_v15, %v6421_v14  ;;  %v9372_v22 = vadd.f32 %v9371_v19, %v9370_v16  ;;  %v6403_v23 = vadd.f32 %v6402_v63, %v6308_v17 }
 0x9ea   : > { %v6313_v26 = vadd.f32 %v9372_v22, %v6200_v24  ;;  %v9373_v27 = vpop.f32.mrb[76].mxu0  ;;  %9692 = vmatmul.mubr.msk.bf16.vlgmr.msra.gmra.mrb[100].mxu1 %vm6431_vm7, %v13023_v21  ;;  %9720 = vmatmul.mubr.msk.bf16.vlgmr.msra.gmra.mrb[80].mxu0 %vm6431_vm7, %v13023_v21  ;;  %v6423_v32 = vmax.f32 %v6403_v23, 0.0 }
 0x9eb   : > { %9704 = vmatpush3.bf16.msra.mxu1 %v6505_v48  ;;  %v9374_v28 = vpop.f32.mrb[77].mxu0  ;;  %9695 = vmatprep.mubr.msk.bf16.mxu1 %vm10974_vm6, %v10971_v9 }
 0x9ec   : > { %v6408_v29 = vadd.f32 %v9685_v20, %v6313_v26  ;;  %v9375_v30 = vadd.f32 %v9374_v28, %v9373_v27  ;;  %9723 = vmatprep.mubr.msk.bf16.mxu0 %vm10974_vm6, %v10971_v9  ;;  %9746 = vmatpush3.bf16.msra.mxu0 %v6691_v25  ;;  %v7001_v20 = vld [vmem:[%s13517_s15 + $0x18] sm:$0xff] }
 0x9ed   : > { %9731 = vmatprep.subr.bf16.mxu1 %v10971_v9  ;;  %9773 = vmatprep.subr.bf16.mxu0 %v10971_v9 }
 0x9ee   : > { %v6424_v33 = vmax.f32 %v6408_v29, 0.0  ;;  %v9376_v34 = vpop.f32.mrb[78].mxu0  ;;  %v6318_v35 = vadd.f32 %v9375_v30, %v6205_v31 }
 0x9ef   : > { %v9377_v36 = vpop.f32.mrb[79].mxu0 }
 0x9f0   : > { %v13037_v37 = vpack.c.bf16 %v6424_v33, %v6423_v32  ;;  %v9378_v38 = vadd.f32 %v9377_v36, %v9376_v34  ;;  %v6413_v39 = vadd.f32 %v6412_v8, %v6318_v35 }
 0x9f2   : > { %v6323_v41 = vadd.f32 %v9378_v38, %v6210_v40  ;;  %9696 = vmatmul.mubr.msk.bf16.gmra.mrb[104].mxu1 %vm6431_vm7, %v13037_v37  ;;  %9724 = vmatmul.mubr.msk.bf16.gmra.mrb[84].mxu0 %vm6431_vm7, %v13037_v37  ;;  %v6425_v43 = vmax.f32 %v6413_v39, 0.0 }
 0x9f3   : > { %9699 = vmatprep.mubr.msk.bf16.mxu1 %vm10974_vm6, %v10971_v9  ;;  %9727 = vmatprep.mubr.msk.bf16.mxu0 %vm10974_vm6, %v10971_v9 }
 0x9f4   : > { %v6418_v42 = vadd.f32 %v9688_v5, %v6323_v41 }
 0x9f6   : > { %v6426_v44 = vmax.f32 %v6418_v42, 0.0 }
 0x9f8   : > { %v13047_v45 = vpack.c.bf16 %v6426_v44, %v6425_v43 }
 0x9fa   : > { %9700 = vmatmul.mubr.msk.bf16.gmra.mrb[108].mxu1 %vm6431_vm7, %v13047_v45  ;;  %9728 = vmatmul.mubr.msk.bf16.gmra.mrb[88].mxu0 %vm6431_vm7, %v13047_v45 }
 0x9fb   : > { %9705 = vmatprep.mubr.msk.bf16.mxu1 %vm10974_vm6, %v10971_v9  ;;  %9747 = vmatprep.mubr.msk.bf16.mxu0 %vm10974_vm6, %v10971_v9 }
 0xa02   : > { %9706 = vmatmul.mubr.msk.bf16.vlgmr.msra.gmra.mrb[112].mxu1 %vm6431_vm7, %v13023_v21  ;;  %9748 = vmatmul.mubr.msk.bf16.vlgmr.msra.gmra.mrb[92].mxu0 %vm6431_vm7, %v13023_v21 }
 0xa03   : > { %9732 = vmatpush3.bf16.msra.mxu1 %v6629_v49  ;;  %9709 = vmatprep.mubr.msk.bf16.mxu1 %vm10974_vm6, %v10971_v9 }
 0xa04   : > { %9751 = vmatprep.mubr.msk.bf16.mxu0 %vm10974_vm6, %v10971_v9  ;;  %9774 = vmatpush3.bf16.msra.mxu0 %v6815_v50 }
 0xa05   : > { %9759 = vmatprep.subr.bf16.mxu1 %v10971_v9  ;;  %9801 = vmatprep.subr.bf16.mxu0 %v10971_v9 }
 0xa0a   : > { %9710 = vmatmul.mubr.msk.bf16.gmra.mrb[116].mxu1 %vm6431_vm7, %v13037_v37  ;;  %9752 = vmatmul.mubr.msk.bf16.gmra.mrb[96].mxu0 %vm6431_vm7, %v13037_v37 }
 0xa0b   : > { %9713 = vmatprep.mubr.msk.bf16.mxu1 %vm10974_vm6, %v10971_v9  ;;  %9755 = vmatprep.mubr.msk.bf16.mxu0 %vm10974_vm6, %v10971_v9 }
 0xa12   : > { %9714 = vmatmul.mubr.msk.bf16.gmra.mrb[120].mxu1 %vm6431_vm7, %v13047_v45  ;;  %9756 = vmatmul.mubr.msk.bf16.gmra.mrb[100].mxu0 %vm6431_vm7, %v13047_v45 }
 0xa13   : > { %9733 = vmatprep.mubr.msk.bf16.mxu1 %vm10974_vm6, %v10971_v9  ;;  %9775 = vmatprep.mubr.msk.bf16.mxu0 %vm10974_vm6, %v10971_v9 }
 0xa1a   : > { %9734 = vmatmul.mubr.msk.bf16.vlgmr.msra.gmra.mrb[124].mxu1 %vm6431_vm7, %v13023_v21  ;;  %9776 = vmatmul.mubr.msk.bf16.vlgmr.msra.gmra.mrb[104].mxu0 %vm6431_vm7, %v13023_v21 }
 0xa1b   : > { %9760 = vmatpush3.bf16.msra.mxu1 %v6753_v53  ;;  %9737 = vmatprep.mubr.msk.bf16.mxu1 %vm10974_vm6, %v10971_v9 }
 0xa1c   : > { %9779 = vmatprep.mubr.msk.bf16.mxu0 %vm10974_vm6, %v10971_v9  ;;  %9802 = vmatpush3.bf16.msra.mxu0 %v6939_v54 }
 0xa1d   : > { %9787 = vmatprep.subr.bf16.mxu1 %v10971_v9  ;;  %10032 = vmatprep.subr.bf16.mxu0 %v10973_v6 }
 0xa22   : > { %9738 = vmatmul.mubr.msk.bf16.gmra.mrb[128].mxu1 %vm6431_vm7, %v13037_v37  ;;  %9780 = vmatmul.mubr.msk.bf16.gmra.mrb[108].mxu0 %vm6431_vm7, %v13037_v37 }
 0xa23   : > { %9741 = vmatprep.mubr.msk.bf16.mxu1 %vm10974_vm6, %v10971_v9  ;;  %9783 = vmatprep.mubr.msk.bf16.mxu0 %vm10974_vm6, %v10971_v9 }
 0xa2a   : > { %9742 = vmatmul.mubr.msk.bf16.gmra.mrb[132].mxu1 %vm6431_vm7, %v13047_v45  ;;  %9784 = vmatmul.mubr.msk.bf16.gmra.mrb[112].mxu0 %vm6431_vm7, %v13047_v45 }
 0xa2b   : > { %9761 = vmatprep.mubr.msk.bf16.mxu1 %vm10974_vm6, %v10971_v9  ;;  %9803 = vmatprep.mubr.msk.bf16.mxu0 %vm10974_vm6, %v10971_v9 }
 0xa32   : > { %9762 = vmatmul.mubr.msk.bf16.vlgmr.msra.gmra.mrb[136].mxu1 %vm6431_vm7, %v13023_v21  ;;  %9804 = vmatmul.mubr.msk.bf16.vlgmr.msra.gmra.mrb[116].mxu0 %vm6431_vm7, %v13023_v21 }
 0xa33   : > { %9788 = vmatpush3.bf16.msra.mxu1 %v6877_v56  ;;  %9765 = vmatprep.mubr.msk.bf16.mxu1 %vm10974_vm6, %v10971_v9 }
 0xa34   : > { %9807 = vmatprep.mubr.msk.bf16.mxu0 %vm10974_vm6, %v10971_v9 }
 0xa3a   : > { %9766 = vmatmul.mubr.msk.bf16.gmra.mrb[140].mxu1 %vm6431_vm7, %v13037_v37  ;;  %9808 = vmatmul.mubr.msk.bf16.gmra.mrb[120].mxu0 %vm6431_vm7, %v13037_v37 }
 0xa3b   : > { %9769 = vmatprep.mubr.msk.bf16.mxu1 %vm10974_vm6, %v10971_v9  ;;  %9811 = vmatprep.mubr.msk.bf16.mxu0 %vm10974_vm6, %v10971_v9 }
 0xa42   : > { %9770 = vmatmul.mubr.msk.bf16.gmra.mrb[144].mxu1 %vm6431_vm7, %v13047_v45  ;;  %9812 = vmatmul.mubr.msk.bf16.gmra.mrb[124].mxu0 %vm6431_vm7, %v13047_v45 }
 0xa43   : > { %9789 = vmatprep.mubr.msk.bf16.mxu1 %vm10974_vm6, %v10971_v9  ;;  %9033 = vmatprep.mubr.msk.f32.mxu0 %vm7038_vm8, %v7001_v20 }
 0xa4a   : > { %9790 = vmatmul.mubr.msk.bf16.vlgmr.msra.gmra.mrb[148].mxu1 %vm6431_vm7, %v13023_v21 }
 0xa4b   : > { %9793 = vmatprep.mubr.msk.bf16.mxu1 %vm10974_vm6, %v10971_v9 }
 0xa52   : > { %9794 = vmatmul.mubr.msk.bf16.gmra.mrb[152].mxu1 %vm6431_vm7, %v13037_v37 }
 0xa53   : > { %9797 = vmatprep.mubr.msk.bf16.mxu1 %vm10974_vm6, %v10971_v9 }
 0xa5a   : > { %9798 = vmatmul.mubr.msk.bf16.gmra.mrb[156].mxu1 %vm6431_vm7, %v13047_v45 }
 0xa5b   : > { %7127 = vmatprep.mubr.f32.mxu1 %v6999_v57 }
 0xabd   : > { %v6479_v58 = vpop.f32.mrb[100].mxu1  ;;  %v13164_v59 = vpop.f32.mrb[80].mxu0 }
 0xabe   : > { %v9693_v60 = vpop.f32.mrb[101].mxu1  ;;  %v9721_v61 = vpop.f32.mrb[81].mxu0 }
 0xabf   : > { %v6482_v62 = vpop.f32.mrb[102].mxu1  ;;  %v13169_v63 = vpop.f32.mrb[82].mxu0 }
 0xac0   : > { %v10002_v0 = vpack.c.bf16 %v6482_v62, %v6479_v58  ;;  %v10026_v1 = vpack.c.bf16 %v13169_v63, %v13164_v59  ;;  %v9694_v2 = vpop.f32.mrb[103].mxu1  ;;  %v9722_v3 = vpop.f32.mrb[83].mxu0  ;;  %v7003_v59 = vld [vmem:[%s13517_s15 + $0x28] sm:$0xff] }
 0xac5   : > { %v13174_v4 = vpop.f32.mrb[104].mxu1  ;;  %v13176_v5 = vpop.f32.mrb[84].mxu0 }
 0xac6   : > { %v9697_v7 = vpop.f32.mrb[105].mxu1  ;;  %v9725_v8 = vpop.f32.mrb[85].mxu0 }
 0xac7   : > { %v6490_v10 = vpop.f32.mrb[106].mxu1  ;;  %v13178_v11 = vpop.f32.mrb[86].mxu0 }
 0xac8   : > { %v10006_v12 = vpack.c.bf16 %v6490_v10, %v13174_v4  ;;  %v10030_v13 = vpack.c.bf16 %v13178_v11, %v13176_v5  ;;  %v9698_v14 = vpop.f32.mrb[107].mxu1  ;;  %v9726_v15 = vpop.f32.mrb[87].mxu0 }
 0xacd   : > { %v13183_v16 = vpop.f32.mrb[108].mxu1  ;;  %v6619_v17 = vpop.f32.mrb[88].mxu0 }
 0xace   : > { %v9701_v18 = vpop.f32.mrb[109].mxu1  ;;  %v9729_v19 = vpop.f32.mrb[89].mxu0 }
 0xacf   : > { %v6498_v21 = vpop.f32.mrb[110].mxu1  ;;  %v6622_v22 = vpop.f32.mrb[90].mxu0 }
 0xad0   : > { %v10010_v23 = vpack.c.bf16 %v6498_v21, %v13183_v16  ;;  %v10000_v48 = vpack.c.bf16 %v6622_v22, %v6619_v17  ;;  %v9702_v24 = vpop.f32.mrb[111].mxu1  ;;  %v9730_v25 = vpop.f32.mrb[91].mxu0 }
 0xad2   : > { %10001 = vmatprep.subr.bf16.mxu1 %v10000_v48 }
 0xad3   : > { %10003 = vmatpush3.bf16.msra.mxu1 %v10002_v0 }
 0xad5   : > { %v13186_v26 = vpop.f32.mrb[112].mxu1  ;;  %v13188_v27 = vpop.f32.mrb[92].mxu0 }
 0xad6   : > { %v9707_v28 = vpop.f32.mrb[113].mxu1  ;;  %v9749_v29 = vpop.f32.mrb[93].mxu0 }
 0xad7   : > { %v6544_v30 = vpop.f32.mrb[114].mxu1  ;;  %v6730_v31 = vpop.f32.mrb[94].mxu0 }
 0xad8   : > { %v10014_v32 = vpack.c.bf16 %v6544_v30, %v13186_v26  ;;  %v10016_v33 = vpack.c.bf16 %v6730_v31, %v13188_v27  ;;  %v9708_v34 = vpop.f32.mrb[115].mxu1  ;;  %v9750_v35 = vpop.f32.mrb[95].mxu0 }
 0xadd   : > { %v13192_v36 = vpop.f32.mrb[116].mxu1  ;;  %v13194_v37 = vpop.f32.mrb[96].mxu0 }
 0xade   : > { %v9711_v38 = vpop.f32.mrb[117].mxu1  ;;  %v9753_v39 = vpop.f32.mrb[97].mxu0 }
 0xadf   : > { %v6552_v40 = vpop.f32.mrb[118].mxu1  ;;  %v13196_v41 = vpop.f32.mrb[98].mxu0 }
 0xae0   : > { %v10018_v42 = vpack.c.bf16 %v6552_v40, %v13192_v36  ;;  %v10020_v43 = vpack.c.bf16 %v13196_v41, %v13194_v37  ;;  %v9712_v44 = vpop.f32.mrb[119].mxu1  ;;  %v9754_v45 = vpop.f32.mrb[99].mxu0 }
 0xae5   : > { %v6557_v46 = vpop.f32.mrb[120].mxu1  ;;  %v6743_v47 = vpop.f32.mrb[100].mxu0 }
 0xae6   : > { %v9715_v49 = vpop.f32.mrb[121].mxu1  ;;  %v9757_v50 = vpop.f32.mrb[101].mxu0 }
 0xae7   : > { %v6560_v51 = vpop.f32.mrb[122].mxu1  ;;  %v6746_v52 = vpop.f32.mrb[102].mxu0 }
 0xae8   : > { %v10022_v53 = vpack.c.bf16 %v6560_v51, %v6557_v46  ;;  %v10024_v54 = vpack.c.bf16 %v6746_v52, %v6743_v47  ;;  %v9716_v55 = vpop.f32.mrb[123].mxu1  ;;  %v9758_v56 = vpop.f32.mrb[103].mxu0  ;;  %v6998_v51 = vld [vmem:[%s13517_s15] sm:$0xff] }
 0xaed   : > { %v6665_v57 = vpop.f32.mrb[124].mxu1  ;;  %v13201_v58 = vpop.f32.mrb[104].mxu0 }
 0xaee   : > { %v9735_v60 = vpop.f32.mrb[125].mxu1  ;;  %v9777_v61 = vpop.f32.mrb[105].mxu0 }
 0xaef   : > { %v6668_v20 = vpop.f32.mrb[126].mxu1  ;;  %v13203_v62 = vpop.f32.mrb[106].mxu0  ;;  %v7007_v60 = vld [vmem:[%s13517_s15 + $0x48] sm:$0xff]  ;;  %v7006_v61 = vld [vmem:[%s13517_s15 + $0x40] sm:$0xff] }
 0xaf0   : > { %v10004_v0 = vpack.c.bf16 %v6668_v20, %v6665_v57  ;;  %v10039_v2 = vpack.c.bf16 %v13203_v62, %v13201_v58  ;;  %v9736_v3 = vpop.f32.mrb[127].mxu1  ;;  %v9778_v4 = vpop.f32.mrb[107].mxu0  ;;  %v7011_v20 = vld [vmem:[%s13517_s15 + $0x68] sm:$0xff]  ;;  %v7014_v58 = vld [vmem:[%s13517_s15 + $0x80] sm:$0xff] }
 0xaf1   : > { %v7019_v62 = vld [vmem:[%s13517_s15 + $0xa8] sm:$0xff] }
 0xaf2   : > { %10005 = vmatprep.subr.bf16.mxu1 %v10004_v0 }
 0xaf3   : > { %10007 = vmatpush3.bf16.msra.mxu1 %v10006_v12 }
 0xaf5   : > { %v6673_v7 = vpop.f32.mrb[128].mxu1  ;;  %v13207_v8 = vpop.f32.mrb[108].mxu0 }
 0xaf6   : > { %v9739_v10 = vpop.f32.mrb[129].mxu1  ;;  %v9781_v14 = vpop.f32.mrb[109].mxu0 }
 0xaf7   : > { %v6676_v15 = vpop.f32.mrb[130].mxu1  ;;  %v13209_v16 = vpop.f32.mrb[110].mxu0 }
 0xaf8   : > { %v10008_v17 = vpack.c.bf16 %v6676_v15, %v6673_v7  ;;  %v10042_v18 = vpack.c.bf16 %v13209_v16, %v13207_v8  ;;  %v9740_v19 = vpop.f32.mrb[131].mxu1  ;;  %v9782_v21 = vpop.f32.mrb[111].mxu0  ;;  %v7010_v7 = vld [vmem:[%s13517_s15 + $0x60] sm:$0xff]  ;;  %v7015_v15 = vld [vmem:[%s13517_s15 + $0x88] sm:$0xff] }
 0xaf9   : > { %v7018_v16 = vld [vmem:[%s13517_s15 + $0xa0] sm:$0xff]  ;;  %v7023_v21 = vld [vmem:[%s13517_s15 + $0xc8] sm:$0xff] }
 0xafa   : > { %10009 = vmatprep.subr.bf16.mxu1 %v10008_v17 }
 0xafb   : > { %10011 = vmatpush3.bf16.msra.mxu1 %v10010_v23 }
 0xafd   : > { %v6681_v22 = vpop.f32.mrb[132].mxu1  ;;  %v13213_v48 = vpop.f32.mrb[112].mxu0 }
 0xafe   : > { %v9743_v12 = vpop.f32.mrb[133].mxu1  ;;  %v9785_v24 = vpop.f32.mrb[113].mxu0 }
 0xaff   : > { %v6684_v25 = vpop.f32.mrb[134].mxu1  ;;  %v13215_v26 = vpop.f32.mrb[114].mxu0 }
 0xb00   : > { %v10012_v27 = vpack.c.bf16 %v6684_v25, %v6681_v22  ;;  %v10045_v28 = vpack.c.bf16 %v13215_v26, %v13213_v48  ;;  %v9744_v29 = vpop.f32.mrb[135].mxu1  ;;  %v9786_v30 = vpop.f32.mrb[115].mxu0  ;;  %v7022_v22 = vld [vmem:[%s13517_s15 + $0xc0] sm:$0xff]  ;;  %v7027_v48 = vld [vmem:[%s13517_s15 + $0xe8] sm:$0xff] }
 0xb01   : > { %v7026_v26 = vld [vmem:[%s13517_s15 + $0xe0] sm:$0xff]  ;;  %v7000_v29 = vld [vmem:[%s13517_s15 + $0x10] sm:$0xff]  ;;  %v7005_v30 = vld [vmem:[%s13517_s15 + $0x38] sm:$0xff] }
 0xb02   : > { %10013 = vmatprep.subr.bf16.mxu1 %v10012_v27 }
 0xb03   : > { %10015 = vmatpush3.bf16.msra.mxu1 %v10014_v32 }
 0xb04   : > { %10017 = vmatprep.subr.bf16.mxu1 %v10016_v33 }
 0xb05   : > { %v6789_v31 = vpop.f32.mrb[136].mxu1  ;;  %v13219_v34 = vpop.f32.mrb[116].mxu0 }
 0xb06   : > { %v9763_v23 = vpop.f32.mrb[137].mxu1  ;;  %v9805_v35 = vpop.f32.mrb[117].mxu0 }
 0xb07   : > { %v6792_v36 = vpop.f32.mrb[138].mxu1  ;;  %v13221_v37 = vpop.f32.mrb[118].mxu0  ;;  %10019 = vmatpush3.bf16.msra.mxu1 %v10018_v42  ;;  %v7008_v23 = vld [vmem:[%s13517_s15 + $0x50] sm:$0xff]  ;;  %v7013_v35 = vld [vmem:[%s13517_s15 + $0x78] sm:$0xff] }
 0xb08   : > { %v10028_v38 = vpack.c.bf16 %v6792_v36, %v6789_v31  ;;  %v10057_v39 = vpack.c.bf16 %v13221_v37, %v13219_v34  ;;  %v9764_v40 = vpop.f32.mrb[139].mxu1  ;;  %v9806_v41 = vpop.f32.mrb[119].mxu0  ;;  %10021 = vmatprep.subr.bf16.mxu1 %v10020_v43  ;;  %v7004_v31 = vld [vmem:[%s13517_s15 + $0x30] sm:$0xff]  ;;  %v7009_v34 = vld [vmem:[%s13517_s15 + $0x58] sm:$0xff] }
 0xb09   : > { %v7012_v36 = vld [vmem:[%s13517_s15 + $0x70] sm:$0xff]  ;;  %v7017_v37 = vld [vmem:[%s13517_s15 + $0x98] sm:$0xff] }
 0xb0a   : > { %v7020_v40 = vld [vmem:[%s13517_s15 + $0xb0] sm:$0xff]  ;;  %v7025_v41 = vld [vmem:[%s13517_s15 + $0xd8] sm:$0xff] }
 0xb0b   : > { %10023 = vmatpush3.bf16.msra.mxu1 %v10022_v53 }
 0xb0c   : > { %10025 = vmatprep.subr.bf16.mxu1 %v10024_v54 }
 0xb0d   : > { %v6797_v32 = vpop.f32.mrb[140].mxu1  ;;  %v13225_v33 = vpop.f32.mrb[120].mxu0 }
 0xb0e   : > { %v9767_v44 = vpop.f32.mrb[141].mxu1  ;;  %v9809_v45 = vpop.f32.mrb[121].mxu0 }
 0xb0f   : > { %v6800_v46 = vpop.f32.mrb[142].mxu1  ;;  %v13227_v47 = vpop.f32.mrb[122].mxu0  ;;  %10027 = vmatpush3.bf16.msra.mxu1 %v10026_v1  ;;  %v7028_v44 = vld [vmem:[%s13517_s15 + $0xf0] sm:$0xff]  ;;  %v7313_v45 = vld [vmem:[%s13519_s17] sm:$0xff] }
 0xb10   : > { %v10033_v42 = vpack.c.bf16 %v6800_v46, %v6797_v32  ;;  %v10060_v49 = vpack.c.bf16 %v13227_v47, %v13225_v33  ;;  %v9768_v50 = vpop.f32.mrb[143].mxu1  ;;  %v9810_v43 = vpop.f32.mrb[123].mxu0  ;;  %10029 = vmatprep.subr.bf16.mxu1 %v10028_v38  ;;  %v7016_v38 = vld [vmem:[%s13517_s15 + $0x90] sm:$0xff]  ;;  %v7029_v33 = vld [vmem:[%s13517_s15 + $0xf8] sm:$0xff]  ;;  %v7314_v46 = vld [vmem:[%s13519_s17 + $0x8] sm:$0xff] }
 0xb11   : > { %v7024_v32 = vld [vmem:[%s13517_s15 + $0xd0] sm:$0xff]  ;;  %v7317_v43 = vld [vmem:[%s13519_s17 + $0x20] sm:$0xff] }
 0xb12   : > { %10034 = vmatpush1.bf16.msra.mxu0 %v10033_v42  ;;  %v7315_v47 = vld [vmem:[%s13519_s17 + $0x10] sm:$0xff]  ;;  %v10066_v42 = vpack.c.bf16 %v7314_v46, %v7313_v45 }
 0xb13   : > { %10031 = vmatpush3.bf16.msra.mxu1 %v10030_v13  ;;  %10035 = vmatprep.subr.bf16.mxu0 %v10973_v6  ;;  %v7002_v13 = vld [vmem:[%s13517_s15 + $0x20] sm:$0xff] }
 0xb14   : > { %10065 = vmatprep.subr.bf16.mxu1 %v10973_v6 }
 0xb15   : > { %v6805_v63 = vpop.f32.mrb[144].mxu1  ;;  %v13245_v1 = vpop.f32.mrb[124].mxu0 }
 0xb16   : > { %v9771_v52 = vpop.f32.mrb[145].mxu1  ;;  %v9813_v53 = vpop.f32.mrb[125].mxu0  ;;  %7128 = vmatmul.mubr.f32.vlgmr.msra.gmra.mrb[160].mxu1 %v6998_v51  ;;  %v7318_v51 = vld [vmem:[%s13519_s17 + $0x28] sm:$0xff] }
 0xb17   : > { %v6808_v5 = vpop.f32.mrb[146].mxu1  ;;  %v13247_v11 = vpop.f32.mrb[126].mxu0  ;;  %7132 = vmatprep.mubr.f32.mxu1 %v7003_v59  ;;  %10067 = vmatpush3.bf16.msra.mxu1 %v10066_v42  ;;  %v10072_v59 = vpack.c.bf16 %v7318_v51, %v7317_v43 }
 0xb18   : > { %v10036_v54 = vpack.c.bf16 %v6808_v5, %v6805_v63  ;;  %v10063_v55 = vpack.c.bf16 %v13247_v11, %v13245_v1  ;;  %v9772_v56 = vpop.f32.mrb[147].mxu1  ;;  %v9814_v57 = vpop.f32.mrb[127].mxu0  ;;  %10068 = vmatprep.subr.bf16.mxu1 %v10973_v6  ;;  %v7319_v63 = vld [vmem:[%s13519_s17 + $0x30] sm:$0xff]  ;;  %v7320_v1 = vld [vmem:[%s13519_s17 + $0x38] sm:$0xff] }
 0xb19   : > { %v10075_v52 = vpack.c.bf16 %v7320_v1, %v7319_v63 }
 0xb1a   : > { %10037 = vmatpush1.bf16.msra.mxu0 %v10036_v54  ;;  %7133 = vmatmul.mubr.f32.gmra.mrb[162].mxu1 %v7002_v13 }
 0xb1b   : > { %10038 = vmatprep.subr.bf16.mxu0 %v10973_v6  ;;  %7137 = vmatprep.mubr.f32.mxu1 %v7007_v60 }
 0xb1d   : > { %v6913_v0 = vpop.f32.mrb[148].mxu1 }
 0xb1e   : > { %v9791_v3 = vpop.f32.mrb[149].mxu1  ;;  %10040 = vmatpush1.bf16.msra.mxu0 %v10039_v2  ;;  %7138 = vmatmul.mubr.f32.gmra.mrb[164].mxu1 %v7006_v61 }
 0xb1f   : > { %v6916_v4 = vpop.f32.mrb[150].mxu1  ;;  %10041 = vmatprep.subr.bf16.mxu0 %v10973_v6  ;;  %7142 = vmatprep.mubr.f32.mxu1 %v7011_v20 }
 0xb20   : > { %v10048_v10 = vpack.c.bf16 %v6916_v4, %v6913_v0  ;;  %v9792_v14 = vpop.f32.mrb[151].mxu1 }
 0xb22   : > { %10043 = vmatpush1.bf16.msra.mxu0 %v10042_v18  ;;  %7143 = vmatmul.mubr.f32.gmra.mrb[166].mxu1 %v7010_v7 }
 0xb23   : > { %10044 = vmatprep.subr.bf16.mxu0 %v10973_v6  ;;  %7147 = vmatprep.mubr.f32.mxu1 %v7015_v15 }
 0xb25   : > { %v6921_v2 = vpop.f32.mrb[152].mxu1 }
 0xb26   : > { %v9795_v17 = vpop.f32.mrb[153].mxu1  ;;  %10046 = vmatpush1.bf16.msra.mxu0 %v10045_v28  ;;  %7148 = vmatmul.mubr.f32.gmra.mrb[168].mxu1 %v7014_v58 }
 0xb27   : > { %v6924_v8 = vpop.f32.mrb[154].mxu1  ;;  %10047 = vmatprep.subr.bf16.mxu0 %v10973_v6  ;;  %7152 = vmatprep.mubr.f32.mxu1 %v7019_v62 }
 0xb28   : > { %v10051_v18 = vpack.c.bf16 %v6924_v8, %v6921_v2  ;;  %v9796_v19 = vpop.f32.mrb[155].mxu1 }
 0xb2a   : > { %10049 = vmatpush1.bf16.msra.mxu0 %v10048_v10  ;;  %7153 = vmatmul.mubr.f32.gmra.mrb[170].mxu1 %v7018_v16 }
 0xb2b   : > { %10050 = vmatprep.subr.bf16.mxu0 %v10973_v6  ;;  %7157 = vmatprep.mubr.f32.mxu1 %v7023_v21  ;;  %v7031_v21 = vld [vmem:[%s13518_s16 + $0x8] sm:$0xff] }
 0xb2d   : > { %v6929_v12 = vpop.f32.mrb[156].mxu1 }
 0xb2e   : > { %v9799_v24 = vpop.f32.mrb[157].mxu1  ;;  %10052 = vmatpush1.bf16.msra.mxu0 %v10051_v18  ;;  %7158 = vmatmul.mubr.f32.gmra.mrb[172].mxu1 %v7022_v22  ;;  %v7030_v18 = vld [vmem:[%s13518_s16] sm:$0xff] }
 0xb2f   : > { %v6932_v25 = vpop.f32.mrb[158].mxu1  ;;  %10053 = vmatprep.subr.bf16.mxu0 %v10973_v6  ;;  %7162 = vmatprep.mubr.f32.mxu1 %v7027_v48 }
 0xb30   : > { %v10054_v27 = vpack.c.bf16 %v6932_v25, %v6929_v12  ;;  %v9800_v28 = vpop.f32.mrb[159].mxu1  ;;  %v7032_v25 = vld [vmem:[%s13518_s16 + $0x10] sm:$0xff] }
 0xb32   : > { %10055 = vmatpush1.bf16.msra.mxu0 %v10054_v27  ;;  %7163 = vmatmul.mubr.f32.gmra.mrb[174].mxu1 %v7026_v26 }
 0xb33   : > { %10056 = vmatprep.subr.bf16.mxu0 %v10973_v6  ;;  %9831 = vmatprep.mubr.msk.f32.mxu1 %vm10974_vm6, %v10971_v9 }
 0xb36   : > { %10058 = vmatpush1.bf16.msra.mxu0 %v10057_v39  ;;  %v7021_v39 = vld [vmem:[%s13517_s15 + $0xb8] sm:$0xff] }
 0xb37   : > { %10059 = vmatprep.subr.bf16.mxu0 %v10973_v6 }
 0xb3a   : > { %10061 = vmatpush1.bf16.msra.mxu0 %v10060_v49  ;;  %v7316_v49 = vld [vmem:[%s13519_s17 + $0x18] sm:$0xff] }
 0xb3b   : > { %10062 = vmatprep.subr.bf16.mxu0 %v10973_v6  ;;  %v10069_v50 = vpack.c.bf16 %v7316_v49, %v7315_v47 }
 0xb3d   : > { %10070 = vmatpush3.bf16.msra.mxu1 %v10069_v50  ;;  %v7036_v50 = vld [vmem:[%s13518_s16 + $0x30] sm:$0xff] }
 0xb3e   : > { %10064 = vmatpush1.bf16.msra.mxu0 %v10063_v55  ;;  %10071 = vmatprep.subr.bf16.mxu1 %v10973_v6 }
 0xb3f   : > { %10089 = vmatprep.subr.bf16.mxu0 %v10973_v6 }
 0xb41   : > { %7233 = vmatmul.mubr.f32.vlgmr.msra.gmra.mrb[128].mxu0 %v7000_v29  ;;  %10073 = vmatpush3.bf16.msra.mxu1 %v10072_v59 }
 0xb42   : > { %9034 = vmatprep.mubr.msk.f32.mxu0 %vm7038_vm8, %v7005_v30  ;;  %10074 = vmatprep.subr.bf16.mxu1 %v10973_v6 }
 0xb45   : > { %7238 = vmatmul.mubr.f32.gmra.mrb[130].mxu0 %v7004_v31  ;;  %10076 = vmatpush3.bf16.msra.mxu1 %v10075_v52  ;;  %v7033_v31 = vld [vmem:[%s13518_s16 + $0x18] sm:$0xff] }
 0xb46   : > { %9035 = vmatprep.mubr.msk.f32.mxu0 %vm7038_vm8, %v7009_v34  ;;  %10077 = vmatprep.subr.bf16.mxu1 %v10973_v6  ;;  %v7037_v52 = vld [vmem:[%s13518_s16 + $0x38] sm:$0xff] }
 0xb49   : > { %7243 = vmatmul.mubr.f32.gmra.mrb[132].mxu0 %v7008_v23 }
 0xb4a   : > { %9036 = vmatprep.mubr.msk.f32.mxu0 %vm7038_vm8, %v7013_v35 }
 0xb4d   : > { %7248 = vmatmul.mubr.f32.gmra.mrb[134].mxu0 %v7012_v36 }
 0xb4e   : > { %9037 = vmatprep.mubr.msk.f32.mxu0 %vm7038_vm8, %v7017_v37 }
 0xb51   : > { %7253 = vmatmul.mubr.f32.gmra.mrb[136].mxu0 %v7016_v38  ;;  %v7034_v38 = vld [vmem:[%s13518_s16 + $0x20] sm:$0xff] }
 0xb52   : > { %9038 = vmatprep.mubr.msk.f32.mxu0 %vm7038_vm8, %v7021_v39 }
 0xb55   : > { %7258 = vmatmul.mubr.f32.gmra.mrb[138].mxu0 %v7020_v40 }
 0xb56   : > { %9039 = vmatprep.mubr.msk.f32.mxu0 %vm7038_vm8, %v7025_v41 }
 0xb59   : > { %7263 = vmatmul.mubr.f32.gmra.mrb[140].mxu0 %v7024_v32 }
 0xb5a   : > { %9040 = vmatprep.mubr.msk.f32.mxu0 %vm7038_vm8, %v7029_v33 }
 0xb5d   : > { %7268 = vmatmul.mubr.f32.gmra.mrb[142].mxu0 %v7028_v44  ;;  %v7035_v44 = vld [vmem:[%s13518_s16 + $0x28] sm:$0xff] }
 0xb5e   : > { %9864 = vmatprep.mubr.msk.f32.mxu0 %vm10974_vm6, %v10971_v9 }
 0xbe9   : > { %v9457_v53 = vpop.f32.mrb[160].mxu1 }
 0xbea   : > { %v9458_v5 = vpop.f32.mrb[161].mxu1 }
 0xbeb   : > { %v9459_v11 = vadd.f32 %v9458_v5, %v9457_v53 }
 0xbed   : > { %v9460_v13 = vpop.f32.mrb[162].mxu1  ;;  %v7130_v19 = vadd.f32 %v9459_v11, %v7030_v18 }
 0xbee   : > { %v9461_v54 = vpop.f32.mrb[163].mxu1 }
 0xbef   : > { %v9462_v55 = vadd.f32 %v9461_v54, %v9460_v13 }
 0xbf1   : > { %v9463_v56 = vpop.f32.mrb[164].mxu1  ;;  %v7135_v24 = vadd.f32 %v9462_v55, %v7031_v21  ;;  %v7478_v21 = vld [vmem:[%s13523_s21 + $0x18] sm:$0xff] }
 0xbf2   : > { %v9464_v57 = vpop.f32.mrb[165].mxu1 }
 0xbf3   : > { %v9465_v60 = vadd.f32 %v9464_v57, %v9463_v56 }
 0xbf5   : > { %v9466_v61 = vpop.f32.mrb[166].mxu1  ;;  %v7140_v30 = vadd.f32 %v9465_v60, %v7032_v25  ;;  %v7479_v25 = vld [vmem:[#allocation10] sm:$0x1] }
 0xbf6   : > { %v9467_v20 = vpop.f32.mrb[167].mxu1 }
 0xbf7   : > { %v9468_v0 = vadd.f32 %v9467_v20, %v9466_v61  ;;  %v7397_v20 = vld [vmem:[%s13521_s19] sm:$0xff] }
 0xbf9   : > { %v9469_v3 = vpop.f32.mrb[168].mxu1  ;;  %v7145_v37 = vadd.f32 %v9468_v0, %v7033_v31  ;;  %v7398_v0 = vld [vmem:[%s13521_s19 + $0x8] sm:$0xff] }
 0xbfa   : > { %v9470_v4 = vpop.f32.mrb[169].mxu1 }
 0xbfb   : > { %v9471_v7 = vadd.f32 %v9470_v4, %v9469_v3  ;;  %v10078_v3 = vpack.c.bf16 %v7398_v0, %v7397_v20 }
 0xbfd   : > { %v9472_v10 = vpop.f32.mrb[170].mxu1  ;;  %v7150_v33 = vadd.f32 %v9471_v7, %v7034_v38  ;;  %v7399_v7 = vld [vmem:[%s13521_s19 + $0x10] sm:$0xff] }
 0xbfe   : > { %v9473_v14 = vpop.f32.mrb[171].mxu1 }
 0xbff   : > { %v9474_v15 = vadd.f32 %v9473_v14, %v9472_v10  ;;  %v7400_v10 = vld [vmem:[%s13521_s19 + $0x18] sm:$0xff] }
 0xc00   : > { %v10081_v14 = vpack.c.bf16 %v7400_v10, %v7399_v7 }
 0xc01   : > { %v9475_v58 = vpop.f32.mrb[172].mxu1  ;;  %v7155_v49 = vadd.f32 %v9474_v15, %v7035_v44  ;;  %v7321_v15 = vld [vmem:[#allocation7] sm:$0x1]  ;;  %v7588_v44 = vld [vmem:[%s13525_s23 + $0x10] sm:$0xff] }
 0xc02   : > { %v9476_v62 = vpop.f32.mrb[173].mxu1 }
 0xc03   : > { %v9477_v2 = vadd.f32 %v9476_v62, %v9475_v58  ;;  %v7475_v58 = vld [vmem:[%s13523_s21] sm:$0xff]  ;;  %v7476_v62 = vld [vmem:[%s13523_s21 + $0x8] sm:$0xff] }
 0xc05   : > { %v9478_v17 = vpop.f32.mrb[174].mxu1  ;;  %v7160_v1 = vadd.f32 %v9477_v2, %v7036_v50 }
 0xc06   : > { %v9479_v8 = vpop.f32.mrb[175].mxu1 }
 0xc07   : > { %v9480_v16 = vadd.f32 %v9479_v8, %v9478_v17 }
 0xc09   : > { %v7165_v54 = vadd.f32 %v9480_v16, %v7037_v52  ;;  %v10084_v16 = vpack.c.bf16 %v7476_v62, %v7475_v58 }
 0xc14   : > { %v7234_v22 = vpop.f32.mrb[128].mxu0 }
 0xc15   : > { %v7235_v48 = vadd.f32 %v7234_v22, %v7130_v19  ;;  %v7236_v12 = vpop.f32.mrb[129].mxu0  ;;  %v7477_v19 = vld [vmem:[%s13523_s21 + $0x10] sm:$0xff] }
 0xc16   : > { %v10087_v22 = vpack.c.bf16 %v7478_v21, %v7477_v19 }
 0xc17   : > { %v7273_v26 = vmax.f32 %v7235_v48, 0.0  ;;  %v7396_v48 = vld [vmem:[%s894_s28] sm:$0x1] }
 0xc18   : > { %v7239_v27 = vpop.f32.mrb[130].mxu0 }
 0xc19   : > { %v7240_v28 = vadd.f32 %v7239_v27, %v7135_v24  ;;  %v7241_v29 = vpop.f32.mrb[131].mxu0  ;;  %7281 = vxpose.xlu1.b32.start [1/8] (short) (narrow) %v7273_v26, 8 }
 0xc1a   : > { %v7401_v29 = vld [vmem:[#allocation8] sm:$0x1] }
 0xc1b   : > { %v7274_v34 = vmax.f32 %v7240_v28, 0.0 }
 0xc1c   : > { %v7244_v23 = vpop.f32.mrb[132].mxu0 }
 0xc1d   : > { %v7245_v35 = vadd.f32 %v7244_v23, %v7140_v30  ;;  %v7246_v36 = vpop.f32.mrb[133].mxu0  ;;  %7282 = vxpose.xlu1.b32.cont [2/8] (short) (narrow) %v7274_v34, 8 }
 0xc1f   : > { %v7275_v39 = vmax.f32 %v7245_v35, 0.0 }
 0xc20   : > { %v7249_v40 = vpop.f32.mrb[134].mxu0 }
 0xc21   : > { %v7250_v41 = vadd.f32 %v7249_v40, %v7145_v37  ;;  %v7251_v32 = vpop.f32.mrb[135].mxu0  ;;  %7283 = vxpose.xlu1.b32.cont [3/8] (short) (narrow) %v7275_v39, 8  ;;  %v7577_v40 = vlaneseq }
 0xc22   : > { %v7586_v32 = vld [vmem:[%s13525_s23] sm:$0xff] }
 0xc23   : > { %v7276_v45 = vmax.f32 %v7250_v41, 0.0  ;;  %v7578_v41 = vshrl.u32 %v7577_v40, 7 }
 0xc24   : > { %v7254_v46 = vpop.f32.mrb[136].mxu0 }
 0xc25   : > { %v7255_v47 = vadd.f32 %v7254_v46, %v7150_v33  ;;  %v7256_v42 = vpop.f32.mrb[137].mxu0  ;;  %7284 = vxpose.xlu1.b32.cont [4/8] (short) (narrow) %v7276_v45, 8  ;;  %v7587_v33 = vld [vmem:[%s13525_s23 + $0x8] sm:$0xff]  ;;  %v7579_v45 = vsub.s32 0, %v7578_v41 }
 0xc26   : > { %v10090_v46 = vpack.c.bf16 %v7587_v33, %v7586_v32  ;;  %v7666_v42 = vld [vmem:[%s13586_s3] sm:$0xff] }
 0xc27   : > { %v7277_v43 = vmax.f32 %v7255_v47, 0.0  ;;  %v7589_v47 = vld [vmem:[%s13525_s23 + $0x18] sm:$0xff]  ;;  %v7580_v52 = vrot.slane %v7396_v48, %v7579_v45 }
 0xc28   : > { %v7259_v51 = vpop.f32.mrb[138].mxu0  ;;  %10091 = vmatpush3.bf16.msra.mxu0 %v10090_v46 }
 0xc29   : > { %v7260_v59 = vadd.f32 %v7259_v51, %v7155_v49  ;;  %v7261_v63 = vpop.f32.mrb[139].mxu0  ;;  %7285 = vxpose.xlu1.b32.cont [5/8] (short) (narrow) %v7277_v43, 8  ;;  %v7667_v49 = vld [vmem:[%s13586_s3 + $0x8] sm:$0xff]  ;;  %v7668_v43 = vld [vmem:[%s13586_s3 + $0x10] sm:$0xff]  ;;  %v7669_v51 = vld [vmem:[%s13586_s3 + $0x18] sm:$0xff]  ;;  %10092 = vmatprep.subr.bf16.mxu0 %v10973_v6 }
 0xc2a   : > { %v10096_v50 = vpack.c.bf16 %v7667_v49, %v7666_v42 }
 0xc2b   : > { %v7278_v53 = vmax.f32 %v7260_v59, 0.0  ;;  %v10093_v59 = vpack.c.bf16 %v7589_v47, %v7588_v44 }
 0xc2c   : > { %v7264_v5 = vpop.f32.mrb[140].mxu0 }
 0xc2d   : > { %v7265_v11 = vadd.f32 %v7264_v5, %v7160_v1  ;;  %v7266_v13 = vpop.f32.mrb[141].mxu0  ;;  %7286 = vxpose.xlu1.b32.cont [6/8] (short) (narrow) %v7278_v53, 8  ;;  %v10099_v1 = vpack.c.bf16 %v7669_v51, %v7668_v43  ;;  %10094 = vmatpush3.bf16.msra.mxu0 %v10093_v59 }
 0xc2f   : > { %v7279_v55 = vmax.f32 %v7265_v11, 0.0 }
 0xc30   : > { %v7269_v56 = vpop.f32.mrb[142].mxu0 }
 0xc31   : > { %v7270_v57 = vadd.f32 %v7269_v56, %v7165_v54  ;;  %v7271_v60 = vpop.f32.mrb[143].mxu0  ;;  %7287 = vxpose.xlu1.b32.cont [7/8] (short) (narrow) %v7279_v55, 8 }
 0xc33   : > { %v7280_v61 = vmax.f32 %v7270_v57, 0.0 }
 0xc35   : > { %7288 = vxpose.xlu1.b32.end [8/8] (short) (narrow) %v7280_v61, 8 }
 0xc99   : > { %v7297_v4 = vpop.trf.xlu1 }
 0xc9a   : > { %9832 = vmatmul.mubr.msk.f32.vlgmr.msra.gmra.mrb[176].mxu1 %vm4792_vm2, %v7297_v4 }
 0xc9b   : > { %10079 = vmatpush3.bf16.msra.mxu1 %v10078_v3  ;;  %9842 = vmatprep.mubr.msk.f32.mxu1 %vm10974_vm6, %v10971_v9  ;;  %v7670_v3 = vld [vmem:[#allocation2] sm:$0x1] }
 0xc9c   : > { %10080 = vmatprep.subr.bf16.mxu1 %v10973_v6 }
 0xc9f   : > { %10082 = vmatpush3.bf16.msra.mxu1 %v10081_v14 }
 0xca0   : > { %10083 = vmatprep.subr.bf16.mxu1 %v10973_v6 }
 0xd6d   : > { %v7391_v2 = vpop.f32.mrb[176].mxu1 }
 0xd6e   : > { %v7392_v17 = vadd.f32 %v7391_v2, %v7321_v15  ;;  %v9833_v8 = vpop.f32.mrb[177].mxu1 }
 0xd70   : > { %v7395_v18 = vmax.f32 %v7392_v17, 0.0 }
 0xd72   : > { %9843 = vmatmul.mubr.msk.f32.vlgmr.msra.gmra.mrb[178].mxu1 %vm6212_vm4, %v7395_v18 }
 0xd73   : > { %10085 = vmatpush3.bf16.msra.mxu1 %v10084_v16  ;;  %9853 = vmatprep.mubr.msk.f32.mxu1 %vm10974_vm6, %v10971_v9 }
 0xd74   : > { %10086 = vmatprep.subr.bf16.mxu1 %v10973_v6 }
 0xd77   : > { %10088 = vmatpush3.bf16.msra.mxu1 %v10087_v22 }
 0xd78   : > { %10095 = vmatprep.subr.bf16.mxu1 %v10973_v6 }
 0xd7a   : > { %9854 = vmatmul.mubr.msk.f32.vlgmr.msra.gmra.mrb[180].mxu1 %vm6212_vm4, %v7396_v48 }
 0xd7b   : > { %9875 = vmatprep.mubr.msk.f32.mxu1 %vm10974_vm6, %v10971_v9  ;;  %10097 = vmatpush3.bf16.msra.mxu1 %v10096_v50 }
 0xd7c   : > { %10098 = vmatprep.subr.bf16.mxu1 %v10973_v6  ;;  %v7590_v6 = vld [vmem:[%s13587_s0] sm:$0x1] }
 0xd7f   : > { %10100 = vmatpush3.bf16.msra.mxu1 %v10099_v1 }
 0xe45   : > { %v7471_v12 = vpop.f32.mrb[178].mxu1 }
 0xe46   : > { %v9844_v24 = vpop.f32.mrb[179].mxu1  ;;  %v7472_v30 = vadd.f32 %v7471_v12, %v7401_v29 }
 0xe4d   : > { %v7549_v26 = vpop.f32.mrb[180].mxu1 }
 0xe4e   : > { %v7550_v27 = vadd.f32 %v7549_v26, %v7479_v25  ;;  %v9855_v28 = vpop.f32.mrb[181].mxu1 }
 0xe50   : > { %7561 = vrot.lane.b32.xlu0 %v7550_v27, %s10975_s1  ;;  %v7553_v31 = vadd.f32 %v7550_v27, %v7472_v30 }
 0xe52   : > { %v9044_v34 = vmul.f32 -1.442695, %v7553_v31 }
 0xe54   : > { %10796 = vpow2.f32 %v9044_v34 }
 0xe5e   : > { %v10797_v23 = vpop.eup %10796 }
 0xe5f   : > { %v7557_v35 = vadd.f32 1.0, %v10797_v23 }
 0xe61   : > { %10798 = vrcp.f32 %v7557_v35 }
 0xe6b   : > { %v10799_v36 = vpop.eup %10798 }
 0xe6c   : > { %v7571_v5 = vsub.f32 1.0, %v10799_v36 }
 0xec2   : > { %v7562_v37 = vpop.permute.xlu0 %7561 }
 0xec3   : > { %v7564_v38 = vmul.f32 %v10799_v36, %v7562_v37 }
 0xec5   : > { %7566 = vrot.lane.b32.xlu0 %v7564_v38, %s10975_s1 }
 0xf37   : > { %v7567_v9 = vpop.permute.xlu0 %7566 }
 0xf38   : > { %v7569_v39 = vadd.f32 %v7567_v9, %v7472_v30 }
 0xf3a   : > { %10800 = vtanh.f32 %v7569_v39 }
 0xf44   : > { %v10801_v63 = vpop.eup %10800 }
 0xf45   : > { %7573 = vrot.lane.b32.xlu0 %v10801_v63, %s10976_s27 }
 0xf49   : > { %7581 = vrot.lane.b32.xlu0 %v7580_v52, %s10977_s8 }
 0xfb7   : > { %v7574_v53 = vpop.permute.xlu0 %7573 }
 0xfb8   : > { %v7576_v13 = vmul.f32 %v7574_v53, %v7571_v5 }
 0xfbb   : > { %v7582_v11 = vpop.permute.xlu0 %7581 }
 0xfbc   : > { %v7584_v54 = vmul.f32 %v10799_v36, %v7582_v11 }
 0xfbe   : > { %v7585_v55 = vadd.f32 %v7584_v54, %v7576_v13 }
 0xfc0   : > { %7592 = vrot.lane.b32.xlu0 %v7585_v55, %s10976_s27  ;;  %s897_s27 = scalar_lea.vmem %s13588_s2, %s13591_s5 }
0x1032   : > { %v7593_v56 = vpop.permute.xlu0 %7592 }
0x1033   : > { %9865 = vmatmul.mubr.msk.f32.vlgmr.msra.gmra.mrb[144].mxu0 %vm6212_vm4, %v7593_v56  ;;  %9876 = vmatmul.mubr.msk.f32.vlgmr.msra.gmra.mrb[182].mxu1 %vm6212_vm4, %v7593_v56 }
0x1106   : > { %v7662_v57 = vpop.f32.mrb[144].mxu0  ;;  %v7737_v60 = vpop.f32.mrb[182].mxu1 }
0x1107   : > { %v7663_v61 = vadd.f32 %v7662_v57, %v7590_v6  ;;  %v9866_v20 = vpop.f32.mrb[145].mxu0  ;;  %v9877_v0 = vpop.f32.mrb[183].mxu1  ;;  %v7738_v7 = vadd.f32 %v7737_v60, %v7670_v3 }
0x1109   : > { %7742 = vrot.lane.b32.xlu0 %v7663_v61, %s10978_s9 }
0x110d   : > { %7745 = vrot.lane.b32.xlu0 %v7585_v55, %s10979_s24 }
0x117b   : > { %v7743_v4 = vpop.permute.xlu0 %7742 }
0x117c   : > { %v7749_v10 = vsel %vm7748_vm9, %v7738_v7, %v7743_v4 }
0x117f   : > { %v7746_v14 = vpop.permute.xlu0 %7745 }
0x1180   : > { %v7751_v15 = vsel %vm7750_vm10, %v7749_v10, %v7746_v14 }
0x1181   : > { %v7753_v58 = vsel %vm7752_vm11, %v7751_v15, 0.0 }
0x1182   : > { %7754 = vst [vmem:[%s897_s27] sm:$0x1] %v7753_v58 }
0x1183 PF: > { %s13589_s8 = sld [smem:[#allocation14_spill]] }
0x1189   : > { %s42_s8 = sadd.s32 1, %s13589_s8  }
0x118a   : > { %p39_p6 = scmp.ge.s32.totalorder %s42_s8, 4  }
0x118c   :  { %41 = sbr.rel (!%p39_p6) target bundleno = 19 (0x13), region = 222 }
0x1193   :  { %7772 = vsyncpa [#allocation4], 1 }
0x1194   :  { %7774 = vsyncpa [#allocation4 + $0x1], 1 }
0x1195   :  { %7775 = vsyncpa [#allocation6], 1 }
0x1196   :  { %7776 = vsyncpa [#allocation9], 1 }

</bundles_post_ra>
